<compile_context>
chip_gen: v7x
topology: tpu7x:2x2x1
jax: 0.10.0
libtpu: 0.0.40
codegen_flags: <defaults>
</compile_context>

<pallas_src>
import functools

import numpy as np
import jax
import jax.numpy as jnp
from jax.experimental import pallas as pl
from jax.experimental.pallas import tpu as pltpu


def _encoding_kernel(x_ref, emat_ref, o_ref, *, num_sin: int, out_dim: int):
    """One tile of super-rows: block-diagonal expansion on the MXU, lane-masked sin/cos."""
    x = x_ref[...].astype(jnp.float32)                      # (tile_rows, G*D)
    # (tile_rows, G*D) @ (G*D, G*out_dim): each output element is a single f32
    # product (block-diagonal, one nonzero per column), so HIGHEST precision makes
    # the MXU result match the element-wise reference to ~1 ulp.
    s = jnp.dot(x, emat_ref[...],
                precision=jax.lax.Precision.HIGHEST,
                preferred_element_type=jnp.float32)         # (tile_rows, G*out_dim)
    # Lane position within each out_dim-wide group selects sin / cos / passthrough.
    # Mask is built at (1, W) (a few vregs of iota/rem/cmp) and broadcast in the select.
    col = jax.lax.broadcasted_iota(jnp.int32, (1, s.shape[-1]), 1) % out_dim
    out = jnp.where(col < num_sin, jnp.sin(s),
                    jnp.where(col < 2 * num_sin, jnp.cos(s), s))
    o_ref[...] = out.astype(o_ref.dtype)


class BaseEncodingPallas:
    """JAX/Pallas port of BaseEncoding (multi-scale sinusoidal encoding)."""

    def __init__(self, in_dim: int, num_frequencies: int = 6,
                 min_freq_exp: float = 0.0, max_freq_exp: float = 5.0,
                 include_input: bool = True, group: int = 32):
        self.in_dim = in_dim
        self.num_frequencies = num_frequencies
        self.min_freq_exp = min_freq_exp
        self.max_freq_exp = max_freq_exp
        self.include_input = include_input
        self.group = int(group)                               # rows per super-row

        D, F, G = in_dim, num_frequencies, self.group
        out_dim = self.get_out_dim()

        # Per-frequency weights with 2*pi folded in; kernel and reference share the
        # exact same float32 constants.
        w = (2.0 * np.pi) * (2.0 ** np.linspace(min_freq_exp, max_freq_exp, F))
        w = w.astype(np.float32)
        self.freq_weights = jnp.asarray(w)                    # (F,)

        # Per-row expansion e1: cols [0, D*F) sin args, [D*F, 2*D*F) cos args,
        # [2*D*F, out_dim) identity passthrough (if include_input).
        e1 = np.zeros((D, out_dim), dtype=np.float32)
        for d in range(D):
            e1[d, d * F:(d + 1) * F] = w
            e1[d, D * F + d * F: D * F + (d + 1) * F] = w
            if include_input:
                e1[d, 2 * D * F + d] = 1.0

        # Block-diagonal grouped expansion (G*D, G*out_dim); column order
        # g*out_dim + c so the output reshape back to [N, out_dim] is a free view.
        emat = np.zeros((G * D, G * out_dim), dtype=np.float32)
        for g in range(G):
            emat[g * D:(g + 1) * D, g * out_dim:(g + 1) * out_dim] = e1
        self.emat = jnp.asarray(emat)

    def get_out_dim(self) -> int:
        out = self.in_dim * self.num_frequencies * 2
        if self.include_input:
            out += self.in_dim
        return out

    def __call__(self, x: jnp.ndarray, tile_rows: int = 256) -> jnp.ndarray:
        # x: [N, in_dim]
        N, D = x.shape
        assert D == self.in_dim
        G = self.group
        out_dim = self.get_out_dim()
        gd = G * D                      # grouped input width  (e.g. 96)
        width = G * out_dim             # grouped output width (e.g. 1248, ~97.5% lane-dense)

        # ---- tiling over super-rows (G original rows each) -------------------
        S = pl.cdiv(N, G)
        tr = max(8, (min(int(tile_rows), 256) // 8) * 8)      # cap keeps v5e VMEM happy
        if S >= 16:
            # At least two grid steps so ("parallel",) feeds both v7x TensorCores.
            half = pl.cdiv(pl.cdiv(S, 2), 8) * 8
            tr = min(tr, half)
        elif S >= 8:
            tr = 8
        else:
            tr = S                      # single full-extent block for tiny inputs
        S_pad = pl.cdiv(S, tr) * tr
        N_pad = S_pad * G

        x_p = jnp.pad(x, ((0, N_pad - N), (0, 0))) if N_pad != N else x
        xg = x_p.reshape(S_pad, gd)     # free contiguous view: [N/G, G*D]

        kernel = functools.partial(_encoding_kernel,
                                   num_sin=D * self.num_frequencies,
                                   out_dim=out_dim)

        cost = pl.CostEstimate(
            flops=2 * S_pad * gd * width,
            transcendentals=2 * S_pad * width,
            bytes_accessed=4 * (S_pad * gd + gd * width + S_pad * width),
        )

        out = pl.pallas_call(
            kernel,
            out_shape=jax.ShapeDtypeStruct((S_pad, width), x.dtype),
            grid_spec=pltpu.PrefetchScalarGridSpec(
                num_scalar_prefetch=0,
                grid=(S_pad // tr,),
                in_specs=[
                    pl.BlockSpec((tr, gd), lambda i: (i, 0)),
                    pl.BlockSpec((gd, width), lambda i: (0, 0)),   # resident weights
                ],
                out_specs=pl.BlockSpec((tr, width), lambda i: (i, 0)),
            ),
            compiler_params=pltpu.CompilerParams(
                dimension_semantics=("parallel",),        # shard row tiles across v7x TCs
                vmem_limit_bytes=32 * 1024 * 1024,        # explicit headroom (v5e default is 16 MiB)
            ),
            cost_estimate=cost,
        )(xg, self.emat)

        out = out.reshape(N_pad, out_dim)                 # free contiguous view
        # Ragged N: one slice copy to preserve the [N, out_dim] contract.
        return out[:N] if N_pad != N else out


def _reference(x, freq_weights, include_input):
    # freq_weights already include the 2*pi factor (same f32 constants as the kernel).
    scaled = x[..., None] * freq_weights                   # (N, D, F)
    scaled = scaled.reshape(*scaled.shape[:-2], -1)        # (N, D*F), frequency fastest
    enc = jnp.concatenate([jnp.sin(scaled), jnp.cos(scaled)], axis=-1)
    if include_input:
        enc = jnp.concatenate([enc, x], axis=-1)
    return enc


if __name__ == "__main__":
    # TODO(synk): BaseEncoding.forward/get_out_dim are abstract (`pass`) in the spec;
    # semantics follow the docstring (nerfstudio NeRFEncoding convention). Integrated
    # positional encodings (covariance inputs) are not implemented.
    key = jax.random.PRNGKey(0)
    D, F = 3, 6
    enc = BaseEncodingPallas(in_dim=D, num_frequencies=F,
                             min_freq_exp=0.0, max_freq_exp=5.0,
                             include_input=True, group=32)

    # Aligned, ragged, and multi-grid-step row counts.
    for N in (256, 250, 1000):
        key, sub = jax.random.split(key)
        x = jax.random.uniform(sub, (N, D), dtype=jnp.float32,
                               minval=-1.0, maxval=1.0)
        out = jax.block_until_ready(enc(x))
        ref = _reference(x, enc.freq_weights, enc.include_input)
        assert out.shape == (N, enc.get_out_dim())
        # atol budget: largest argument is 2*pi*2^5*|x| ~ 201 whose f32 ulp is ~1.5e-5;
        # the MXU HIGHEST product and the VPU reference product can differ by ~1-2 ulp,
        # sin/cos are Lipschitz-1 in that argument, plus ~1 ulp of implementation slack.
        np.testing.assert_allclose(np.asarray(out), np.asarray(ref),
                                   rtol=1e-4, atol=4e-5)

    print("KERNEL_OK")
</pallas_src>

<mosaic_0001>
module attributes {stable_mosaic.version = 11 : i64} {
  func.func @_encoding_kernel(%arg0: i32, %arg1: memref<8x96xf32, #tpu.memory_space<vmem>>, %arg2: memref<96x1248xf32, #tpu.memory_space<vmem>>, %arg3: memref<8x1248xf32, #tpu.memory_space<vmem>>) attributes {dimension_semantics = [#tpu.dimension_semantics<parallel>], iteration_bounds = array<i64: 1>, scalar_prefetch = 0 : i64, scratch_operands = 0 : i64, tpu.core_type = #tpu.core_type<tc>, window_params = [{transform_indices = @transform_0, window_bounds = array<i64: 8, 96>}, {pipeline_mode = #tpu.pipeline_mode<synchronous>, transform_indices = @transform_1, window_bounds = array<i64: 96, 1248>}, {transform_indices = @transform_2, window_bounds = array<i64: 8, 1248>}]} {
    %c0 = arith.constant 0 : index
    %c0_0 = arith.constant 0 : index
    %0 = vector.load %arg1[%c0, %c0_0] : memref<8x96xf32, #tpu.memory_space<vmem>>, vector<8x96xf32>
    %c0_1 = arith.constant 0 : index
    %c0_2 = arith.constant 0 : index
    %1 = vector.load %arg2[%c0_1, %c0_2] : memref<96x1248xf32, #tpu.memory_space<vmem>>, vector<96x1248xf32>
    %cst = arith.constant dense<0.000000e+00> : vector<8x1248xf32>
    %2 = tpu.matmul %0, %1, %cst {dimension_numbers = #tpu.dot_dimension_numbers<[1], [0], [0], [1], [0, 0, 1, 1], [], []>, precision = #tpu.contract_precision<fp32>} : vector<8x96xf32>, vector<96x1248xf32>, vector<8x1248xf32> -> vector<8x1248xf32>
    %3 = tpu.iota {dimensions = array<i32: 1>} : vector<1x1248xi32>
    %c39_i32 = arith.constant 39 : i32
    %c0_i32 = arith.constant 0 : i32
    %4 = arith.cmpi eq, %c39_i32, %c0_i32 : i32
    %c1_i32 = arith.constant 1 : i32
    %5 = arith.select %4, %c1_i32, %c39_i32 : i32
    %6 = vector.broadcast %5 : i32 to vector<1x1248xi32>
    %7 = arith.remsi %3, %6 : vector<1x1248xi32>
    %c0_i32_3 = arith.constant 0 : i32
    %8 = vector.broadcast %c0_i32_3 : i32 to vector<1x1248xi32>
    %9 = arith.cmpi ne, %7, %8 : vector<1x1248xi32>
    %c0_i32_4 = arith.constant 0 : i32
    %10 = vector.broadcast %c0_i32_4 : i32 to vector<1x1248xi32>
    %11 = arith.cmpi slt, %7, %10 : vector<1x1248xi32>
    %c0_i32_5 = arith.constant 0 : i32
    %12 = arith.cmpi slt, %5, %c0_i32_5 : i32
    %13 = vector.broadcast %12 : i1 to vector<1x1248xi1>
    %14 = vector.broadcast %13 : vector<1x1248xi1> to vector<1x1248xi1>
    %15 = arith.xori %11, %14 : vector<1x1248xi1>
    %16 = arith.andi %15, %9 : vector<1x1248xi1>
    %17 = vector.broadcast %5 : i32 to vector<1x1248xi32>
    %18 = arith.addi %7, %17 : vector<1x1248xi32>
    %19 = arith.select %16, %18, %7 : vector<1x1248xi1>, vector<1x1248xi32>
    %c18_i32 = arith.constant 18 : i32
    %20 = vector.broadcast %c18_i32 : i32 to vector<1x1248xi32>
    %21 = arith.cmpi slt, %19, %20 : vector<1x1248xi32>
    %22 = math.sin %2 : vector<8x1248xf32>
    %c36_i32 = arith.constant 36 : i32
    %23 = vector.broadcast %c36_i32 : i32 to vector<1x1248xi32>
    %24 = arith.cmpi slt, %19, %23 : vector<1x1248xi32>
    %25 = math.cos %2 : vector<8x1248xf32>
    %26 = vector.shape_cast %24 : vector<1x1248xi1> to vector<1x1248xi1>
    %27 = vector.broadcast %26 : vector<1x1248xi1> to vector<8x1248xi1>
    %28 = arith.select %27, %25, %2 : vector<8x1248xi1>, vector<8x1248xf32>
    %29 = vector.shape_cast %21 : vector<1x1248xi1> to vector<1x1248xi1>
    %30 = vector.broadcast %29 : vector<1x1248xi1> to vector<8x1248xi1>
    %31 = arith.select %30, %22, %28 : vector<8x1248xi1>, vector<8x1248xf32>
    %c0_6 = arith.constant 0 : index
    %c0_7 = arith.constant 0 : index
    %32 = vector.load %arg3[%c0_6, %c0_7] : memref<8x1248xf32, #tpu.memory_space<vmem>>, vector<8x1248xf32>
    tpu.vector_store %arg3[%c0_6, %c0_7], %31 {strides = array<i32>} : memref<8x1248xf32, #tpu.memory_space<vmem>>, vector<8x1248xf32>,
    return
  }
  func.func @transform_0(%arg0: i32) -> (i32, i32) {
    %c0_i32 = arith.constant 0 : i32
    %c0_i32_0 = arith.constant 0 : i32
    return %arg0, %c0_i32 : i32, i32
  }
  func.func @transform_1(%arg0: i32) -> (i32, i32) {
    %c0_i32 = arith.constant 0 : i32
    %c0_i32_0 = arith.constant 0 : i32
    %c0_i32_1 = arith.constant 0 : i32
    return %c0_i32, %c0_i32_0 : i32, i32
  }
  func.func @transform_2(%arg0: i32) -> (i32, i32) {
    %c0_i32 = arith.constant 0 : i32
    %c0_i32_0 = arith.constant 0 : i32
    return %arg0, %c0_i32 : i32, i32
  }
}

</mosaic_0001>

<bundles_post_ra>
// kernel: tpu_custom_call.1
= control target key start
LH: loop header
LB: loop body
LE: loop exit
PB: predicated region body
PF: predicated region fallthrough
CT: control target
= control target key end

     0   :  { %7 = vsyncpa [#allocation3], 0  ;;  %s10223_s0 = inlined_call_operand.hbm [shape: f32[8,96], index: 0, kind: input, shape index: {}]   ;;  %s10224_s1 = inlined_call_operand.hbm [shape: f32[96,1248], index: 1, kind: input, shape index: {}]   ;;  %s10225_s2 = inlined_call_operand.hbm [shape: f32[8,1248], index: 2, kind: output, shape index: {}]  }
   0x1   :  { %8 = vsyncpa [#allocation6], 0 }
   0x2   :  { %9 = vsyncpa [#allocation4], 0  ;;  %s7330_s9 = smov [#allocation2]   ;;  %s7331_s11 = smov [#allocation5]  }
   0x3   :  { %s16_s10 = sshll.u32 %s7330_s9, 4  ;;  %s25_s12 = sshll.u32 %s7331_s11, 4  ;;  %s17_s10 = int_to_ptr.vmem [resolvable:$true] %s16_s10  ;;  %s7358_s12 = int_to_ptr.vmem [resolvable:$true] %s25_s12 }
   0x4   :  { %s7258_s15 = scalar_lea.hbm %s10223_s0, 128 }
   0x5   :  { %p7259_p0 = scmp.ne.s32.totalorder %s10223_s0, %s7258_s15  ;;  %p7262_p1 = scmp.lt.u32.totalorder %s7258_s15, %s10223_s0 }
   0x7   :  { %p7264_p2 = pnand %p7262_p1, %p7259_p0 }
   0x9   :  { %7267 = shalt.err (!%p7264_p2)
}
   0xa   :  { %s7268_s20 = scalar_lea.vmem %s17_s10, 128  ;;  %p7273_p4 = scmp.lt.s32.totalorder %s17_s10, %s17_s10 }
   0xb   :  { %p7269_p3 = scmp.ne.s32.totalorder %s17_s10, %s7268_s20  ;;  %p7274_p5 = scmp.lt.s32.totalorder %s7268_s20, %s7268_s20 }
   0xd   :  { %p7275_p6 = por %p7274_p5, %p7273_p4 }
   0xf   :  { %p7276_p7 = pnand %p7275_p6, %p7269_p3 }
  0x11   :  { %7279 = shalt.err (!%p7276_p7)
}
  0x12   :  { %19 = dma.hbm_to_vmem [thread:$0]  %s10223_s0, 128, %s17_s10, [#allocation3]  }
  0x13   :  { %s7280_s25 = scalar_lea.hbm %s10224_s1, 15360 }
  0x14   :  { %p7281_p8 = scmp.ne.s32.totalorder %s10224_s1, %s7280_s25  ;;  %p7284_p9 = scmp.lt.u32.totalorder %s7280_s25, %s10224_s1 }
  0x16   :  { %p7286_p10 = pnand %p7284_p9, %p7281_p8 }
  0x18   :  { %7289 = shalt.err (!%p7286_p10)
}
  0x19   :  { %s7290_s30 = scalar_lea.vmem %s7358_s12, 15360  ;;  %p7295_p12 = scmp.lt.s32.totalorder %s7358_s12, %s7358_s12 }
  0x1a   :  { %p7291_p11 = scmp.ne.s32.totalorder %s7358_s12, %s7290_s30  ;;  %p7296_p13 = scmp.lt.s32.totalorder %s7290_s30, %s7290_s30 }
  0x1c   :  { %p7297_p0 = por %p7296_p13, %p7295_p12 }
  0x1e   :  { %p7298_p1 = pnand %p7297_p0, %p7291_p11 }
  0x20   :  { %7301 = shalt.err (!%p7298_p1)
}
  0x21   :  { %s7332_s0 = smov 1280   ;;  %s7333_s3 = smov 80  }
  0x22   :  { %31 = dma.hbm_to_vmem [thread:$0]  %s10224_s1, 15360, %s7358_s12, [#allocation6], %s7332_s0, %s7332_s0, %s7333_s3  }
  0x23   :  { %7324 = dma.done.wait [#allocation3], 128  }
  0x24   :  { %7325 = vsyncadd [#allocation3], 4294967168 }
  0x25   :  { %7326 = dma.done.wait [#allocation6], 15360  }
  0x26   :  { %7327 = vsyncadd [#allocation6], 4294951936  ;;  %v10226_v0 = vmov 0.0   ;;  %v40_v1 = vld [vmem:[#allocation5 + $0x8] sm:$0xff]  ;;  %v50_v2 = vld [vmem:[#allocation5 + $0x58] sm:$0xff]  ;;  %vm159_vm0 = vcmask 785408  }
  0x27   :  { %251 = vmatprep.mubr.f32.mxu1 %v10226_v0  ;;  %664 = vmatprep.mubr.f32.mxu0 %v10226_v0  ;;  %v39_v3 = vld [vmem:[#allocation5] sm:$0xff]  ;;  %v163_v4 = vand.u32 4294901760, %v40_v1  ;;  %v167_v5 = vand.u32 4294901760, %v50_v2  ;;  %v49_v6 = vld [vmem:[#allocation5 + $0x50] sm:$0xff]  ;;  %v60_v8 = vld [vmem:[#allocation5 + $0xa8] sm:$0xff]  ;;  %s7342_s1 = smov [#allocation7]  }
  0x28   :  { %v165_v7 = vand.u32 4294901760, %v39_v3  ;;  %v70_v9 = vld [vmem:[#allocation5 + $0xf8] sm:$0xff]  ;;  %v169_v10 = vand.u32 4294901760, %v49_v6  ;;  %v171_v11 = vand.u32 4294901760, %v60_v8  ;;  %v59_v13 = vld [vmem:[#allocation5 + $0xa0] sm:$0xff]  ;;  %v69_v14 = vld [vmem:[#allocation5 + $0xf0] sm:$0xff] }
  0x29   :  { %v175_v12 = vand.u32 4294901760, %v70_v9  ;;  %v80_v15 = vld [vmem:[#allocation5 + $0x148] sm:$0xff]  ;;  %v7391_v16 = vpack.c.bf16 %v167_v5, %v163_v4  ;;  %v7393_v17 = vsub.f32 %v40_v1, %v163_v4  ;;  %v7395_v18 = vsub.f32 %v50_v2, %v167_v5  ;;  %v90_v19 = vld [vmem:[#allocation5 + $0x198] sm:$0xff]  ;;  %v79_v20 = vld [vmem:[#allocation5 + $0x140] sm:$0xff]  ;;  %s6285_s6 = sshll.u32 %s7342_s1, 4  ;;  %s6286_s6 = int_to_ptr.vmem [resolvable:$true] %s6285_s6 }
  0x2a   :  { %v89_v21 = vld [vmem:[#allocation5 + $0x190] sm:$0xff]  ;;  %v7397_v22 = vpack.c.bf16 %v169_v10, %v165_v7  ;;  %v7399_v23 = vsub.f32 %v39_v3, %v165_v7  ;;  %v7401_v24 = vsub.f32 %v49_v6, %v169_v10  ;;  %v100_v26 = vld [vmem:[#allocation5 + $0x1e8] sm:$0xff]  ;;  %v110_v27 = vld [vmem:[#allocation5 + $0x238] sm:$0xff]  ;;  %v7407_v28 = vsub.f32 %v60_v8, %v171_v11  ;;  %s7302_s7 = scalar_lea.vmem %s6286_s6, 1280  ;;  %p7307_p3 = scmp.lt.s32.totalorder %s6286_s6, %s6286_s6 }
  0x2b   :  { %v7403_v25 = vpack.c.bf16 %v175_v12, %v171_v11  ;;  %6376 = vmatprep.subr.bf16.mxu1 %v7391_v16  ;;  %6448 = vmatprep.subr.bf16.mxu0 %v7391_v16  ;;  %v173_v29 = vand.u32 4294901760, %v59_v13  ;;  %v177_v30 = vand.u32 4294901760, %v69_v14  ;;  %v179_v31 = vand.u32 4294901760, %v80_v15  ;;  %v99_v40 = vld [vmem:[#allocation5 + $0x1e0] sm:$0xff]  ;;  %v109_v41 = vld [vmem:[#allocation5 + $0x230] sm:$0xff]  ;;  %v120_v42 = vld [vmem:[#allocation5 + $0x288] sm:$0xff]  ;;  %p7303_p2 = scmp.ne.s32.totalorder %s6286_s6, %s7302_s7  ;;  %p7308_p4 = scmp.lt.s32.totalorder %s7302_s7, %s7302_s7 }
  0x2c   :  { %6378 = vmatpush1.bf16.msra.mxu1 %v7397_v22  ;;  %6450 = vmatpush1.bf16.msra.mxu0 %v7397_v22  ;;  %v183_v32 = vand.u32 4294901760, %v90_v19  ;;  %v181_v33 = vand.u32 4294901760, %v79_v20  ;;  %v185_v34 = vand.u32 4294901760, %v89_v21  ;;  %v187_v35 = vand.u32 4294901760, %v100_v26  ;;  %v130_v47 = vld [vmem:[#allocation5 + $0x2d8] sm:$0xff]  ;;  %v119_v48 = vld [vmem:[#allocation5 + $0x280] sm:$0xff] }
  0x2d   :  { %6380 = vmatprep.subr.bf16.mxu1 %v7403_v25  ;;  %v7412_v36 = vsub.f32 %v70_v9, %v175_v12  ;;  %6452 = vmatprep.subr.bf16.mxu0 %v7403_v25  ;;  %v7415_v37 = vpack.c.bf16 %v177_v30, %v173_v29  ;;  %v7417_v38 = vsub.f32 %v59_v13, %v173_v29  ;;  %v191_v39 = vand.u32 4294901760, %v110_v27  ;;  %v129_v49 = vld [vmem:[#allocation5 + $0x2d0] sm:$0xff]  ;;  %v140_v54 = vld [vmem:[#allocation5 + $0x328] sm:$0xff]  ;;  %v150_v63 = vld [vmem:[#allocation5 + $0x378] sm:$0xff]  ;;  %p7309_p5 = por %p7308_p4, %p7307_p3 }
  0x2e   :  { %v7419_v43 = vsub.f32 %v69_v14, %v177_v30  ;;  %v7421_v44 = vpack.c.bf16 %v183_v32, %v179_v31  ;;  %v7423_v45 = vsub.f32 %v80_v15, %v179_v31  ;;  %v7425_v46 = vsub.f32 %v90_v19, %v183_v32  ;;  %v139_v1 = vld [vmem:[#allocation5 + $0x320] sm:$0xff]  ;;  %v149_v6 = vld [vmem:[#allocation5 + $0x370] sm:$0xff]  ;;  %v38_v7 = vld [vmem:[#allocation2] sm:$0xff] }
  0x2f   :  { %v7427_v50 = vpack.c.bf16 %v185_v34, %v181_v33  ;;  %v7429_v51 = vsub.f32 %v79_v20, %v181_v33  ;;  %v7431_v52 = vsub.f32 %v89_v21, %v185_v34  ;;  %v7433_v53 = vpack.c.bf16 %v191_v39, %v187_v35  ;;  %p7310_p6 = pnand %p7309_p5, %p7303_p2 }
  0x30   :  { %6382 = vmatpush1.bf16.msra.mxu1 %v7415_v37  ;;  %6454 = vmatpush1.bf16.msra.mxu0 %v7415_v37  ;;  %v7437_v55 = vsub.f32 %v100_v26, %v187_v35  ;;  %v189_v56 = vand.u32 4294901760, %v99_v40  ;;  %v193_v57 = vand.u32 4294901760, %v109_v41  ;;  %v195_v58 = vand.u32 4294901760, %v120_v42 }
  0x31   :  { %6384 = vmatprep.subr.bf16.mxu1 %v7421_v44  ;;  %6456 = vmatprep.subr.bf16.mxu0 %v7421_v44  ;;  %v7441_v59 = vsub.f32 %v110_v27, %v191_v39  ;;  %v199_v60 = vand.u32 4294901760, %v130_v47  ;;  %v197_v61 = vand.u32 4294901760, %v119_v48  ;;  %v201_v62 = vand.u32 4294901760, %v129_v49 }
  0x32   :  { %v7443_v2 = vpack.c.bf16 %v193_v57, %v189_v56  ;;  %v7445_v3 = vsub.f32 %v99_v40, %v189_v56  ;;  %v7447_v4 = vsub.f32 %v109_v41, %v193_v57  ;;  %v203_v5 = vand.u32 4294901760, %v140_v54 }
  0x33   :  { %v7449_v8 = vpack.c.bf16 %v199_v60, %v195_v58  ;;  %v7451_v9 = vsub.f32 %v120_v42, %v195_v58  ;;  %v7453_v10 = vsub.f32 %v130_v47, %v199_v60  ;;  %v7455_v11 = vpack.c.bf16 %v201_v62, %v197_v61 }
  0x34   :  { %6386 = vmatpush1.bf16.msra.mxu1 %v7427_v50  ;;  %6458 = vmatpush1.bf16.msra.mxu0 %v7427_v50  ;;  %v7459_v12 = vsub.f32 %v119_v48, %v197_v61  ;;  %v7461_v13 = vsub.f32 %v129_v49, %v201_v62  ;;  %v207_v14 = vand.u32 4294901760, %v150_v63  ;;  %v205_v15 = vand.u32 4294901760, %v139_v1 }
  0x35   :  { %10497 = vst [vmem:[#allocation11_spill] sm:$0xff] %v7455_v11  ;;  %6388 = vmatprep.subr.bf16.mxu1 %v7433_v53  ;;  %6460 = vmatprep.subr.bf16.mxu0 %v7433_v53  ;;  %v209_v19 = vand.u32 4294901760, %v149_v6  ;;  %v265_v20 = vand.u32 4294901760, %v7393_v17  ;;  %v277_v21 = vand.u32 4294901760, %v7395_v18  ;;  %v161_v26 = vsel %vm159_vm0, %v38_v7, 0 }
  0x36   :  { %v7468_v27 = vpack.c.bf16 %v207_v14, %v203_v5  ;;  %v7470_v29 = vsub.f32 %v140_v54, %v203_v5  ;;  %v7472_v30 = vsub.f32 %v150_v63, %v207_v14  ;;  %v7474_v31 = vand.u32 4294901760, %v161_v26 }
  0x37   :  { %v7476_v32 = vpack.c.bf16 %v209_v19, %v205_v15  ;;  %v7478_v33 = vsub.f32 %v139_v1, %v205_v15  ;;  %v266_v34 = vsub.f32 %v7393_v17, %v265_v20  ;;  %v278_v35 = vsub.f32 %v7395_v18, %v277_v21 }
  0x38   :  { %10498 = vst [vmem:[#allocation12_spill] sm:$0xff] %v7468_v27  ;;  %10499 = vst [vmem:[#allocation13_spill] sm:$0xff] %v7470_v29  ;;  %6390 = vmatpush1.bf16.msra.mxu1 %v7443_v2  ;;  %6462 = vmatpush1.bf16.msra.mxu0 %v7443_v2  ;;  %v7484_v39 = vsub.f32 %v149_v6, %v209_v19  ;;  %v7487_v40 = vsub.f32 %v161_v26, %v7474_v31  ;;  %v271_v41 = vand.u32 4294901760, %v7399_v23 }
  0x39   :  { %10500 = vst [vmem:[#allocation14_spill] sm:$0xff] %v7472_v30  ;;  %10501 = vst [vmem:[#allocation15_spill] sm:$0xff] %v7474_v31  ;;  %v283_v42 = vand.u32 4294901760, %v7401_v24  ;;  %6392 = vmatprep.subr.bf16.mxu1 %v7449_v8  ;;  %6464 = vmatprep.subr.bf16.mxu0 %v7449_v8  ;;  %v267_v47 = vand.u32 4294901760, %v266_v34  ;;  %v279_v48 = vand.u32 4294901760, %v278_v35  ;;  %v289_v49 = vand.u32 4294901760, %v7407_v28 }
  0x3a   :  { %10502 = vst [vmem:[#allocation16_spill] sm:$0xff] %v7476_v32  ;;  %10503 = vst [vmem:[#allocation17_spill] sm:$0xff] %v7478_v33  ;;  %v301_v54 = vand.u32 4294901760, %v7412_v36  ;;  %v6471_v56 = vpack.c.bf16 %v277_v21, %v265_v20  ;;  %v7496_v57 = vand.u32 4294901760, %v7487_v40  ;;  %v272_v58 = vsub.f32 %v7399_v23, %v271_v41 }
  0x3b   :  { %10504 = vst [vmem:[#allocation18_spill] sm:$0xff] %v7484_v39  ;;  %10505 = vst [vmem:[#allocation19_spill] sm:$0xff] %v7487_v40  ;;  %v284_v60 = vsub.f32 %v7401_v24, %v283_v42  ;;  %v6399_v61 = vpack.c.bf16 %v279_v48, %v267_v47  ;;  %v6473_v62 = vpack.c.bf16 %v283_v42, %v271_v41  ;;  %v295_v14 = vand.u32 4294901760, %v7417_v38 }
  0x3c   :  { %10506 = vst [vmem:[#allocation20_spill] sm:$0xff] %v7496_v57  ;;  %v290_v63 = vsub.f32 %v7407_v28, %v289_v49  ;;  %v302_v1 = vsub.f32 %v7412_v36, %v301_v54  ;;  %6394 = vmatpush1.bf16.msra.mxu1 %v7455_v11  ;;  %6466 = vmatpush1.bf16.msra.mxu0 %v7455_v11  ;;  %v273_v6 = vand.u32 4294901760, %v272_v58  ;;  %v307_v20 = vand.u32 4294901760, %v7419_v43  ;;  %v73_v11 = vld [vmem:[#allocation5 + $0x110] sm:$0xff] }
  0x3d   :  { %v255_v5 = vsub.f32 %v7487_v40, %v7496_v57  ;;  %v285_v7 = vand.u32 4294901760, %v284_v60  ;;  %6396 = vmatprep.subr.bf16.mxu1 %v7468_v27  ;;  %6468 = vmatprep.subr.bf16.mxu0 %v7468_v27  ;;  %v313_v21 = vand.u32 4294901760, %v7423_v45  ;;  %v6475_v34 = vpack.c.bf16 %v301_v54, %v289_v49 }
  0x3e   :  { %v291_v15 = vand.u32 4294901760, %v290_v63  ;;  %v303_v19 = vand.u32 4294901760, %v302_v1  ;;  %v296_v35 = vsub.f32 %v7417_v38, %v295_v14  ;;  %v325_v41 = vand.u32 4294901760, %v7425_v46 }
  0x3f   :  { %v7511_v26 = vand.u32 4294901760, %v255_v5  ;;  %v6401_v42 = vpack.c.bf16 %v285_v7, %v273_v6  ;;  %v308_v48 = vsub.f32 %v7419_v43, %v307_v20  ;;  %v314_v58 = vsub.f32 %v7423_v45, %v313_v21 }
  0x40   :  { %v6403_v47 = vpack.c.bf16 %v303_v19, %v291_v15  ;;  %6398 = vmatpush1.bf16.msra.mxu1 %v7476_v32  ;;  %6470 = vmatpush1.bf16.msra.mxu0 %v7476_v32  ;;  %v297_v60 = vand.u32 4294901760, %v296_v35  ;;  %v6477_v63 = vpack.c.bf16 %v307_v20, %v295_v14  ;;  %v326_v1 = vsub.f32 %v7425_v46, %v325_v41 }
  0x41   :  { %10507 = vst [vmem:[#allocation21_spill] sm:$0xff] %v7511_v26  ;;  %v319_v49 = vand.u32 4294901760, %v7429_v51  ;;  %6400 = vmatprep.subr.bf16.mxu1 %v6399_v61  ;;  %6472 = vmatprep.subr.bf16.mxu0 %v6471_v56  ;;  %v309_v54 = vand.u32 4294901760, %v308_v48  ;;  %v315_v5 = vand.u32 4294901760, %v314_v58  ;;  %v331_v6 = vand.u32 4294901760, %v7431_v52 }
  0x42   :  { %v337_v7 = vand.u32 4294901760, %v7437_v55  ;;  %v327_v15 = vand.u32 4294901760, %v326_v1  ;;  %v349_v0 = vand.u32 4294901760, %v7441_v59  ;;  %v343_v35 = vand.u32 4294901760, %v7445_v3 }
  0x43   :  { %v320_v19 = vsub.f32 %v7429_v51, %v319_v49  ;;  %257 = vmatmul.mubr.f32.vlgmr.msra.gmra.mrb[0].mxu1 %v7511_v26  ;;  %668 = vmatmul.mubr.f32.vlgmr.msra.gmra.mrb[0].mxu0 %v7496_v57  ;;  %v6405_v14 = vpack.c.bf16 %v309_v54, %v297_v60  ;;  %v6479_v61 = vpack.c.bf16 %v325_v41, %v313_v21  ;;  %v355_v20 = vand.u32 4294901760, %v7447_v4 }
  0x44   :  { %v332_v56 = vsub.f32 %v7431_v52, %v331_v6  ;;  %6402 = vmatpush1.bf16.msra.mxu1 %v6401_v42  ;;  %6474 = vmatpush1.bf16.msra.mxu0 %v6473_v62  ;;  %v6481_v58 = vpack.c.bf16 %v331_v6, %v319_v49  ;;  %v338_v1 = vsub.f32 %v7437_v55, %v337_v7  ;;  %v361_v42 = vand.u32 4294901760, %v7451_v9 }
  0x45   :  { %v321_v48 = vand.u32 4294901760, %v320_v19  ;;  %v350_v40 = vsub.f32 %v7441_v59, %v349_v0  ;;  %6404 = vmatprep.subr.bf16.mxu1 %v6403_v47  ;;  %6476 = vmatprep.subr.bf16.mxu0 %v6475_v34  ;;  %v6407_v32 = vpack.c.bf16 %v327_v15, %v315_v5  ;;  %v344_v57 = vsub.f32 %v7445_v3, %v343_v35 }
  0x46   :  { %v333_v26 = vand.u32 4294901760, %v332_v56  ;;  %v356_v21 = vsub.f32 %v7447_v4, %v355_v20  ;;  %v339_v41 = vand.u32 4294901760, %v338_v1  ;;  %v6483_v54 = vpack.c.bf16 %v349_v0, %v337_v7 }
  0x47   :  { %v351_v60 = vand.u32 4294901760, %v350_v40  ;;  %v10508_v62 = vmov 0.0   ;;  %v345_v49 = vand.u32 4294901760, %v344_v57  ;;  %v6485_v19 = vpack.c.bf16 %v355_v20, %v343_v35 }
  0x48   :  { %447 = vmatprep.mubr.f32.mxu1 %v10508_v62  ;;  %810 = vmatprep.mubr.f32.mxu0 %v10508_v62  ;;  %v357_v6 = vand.u32 4294901760, %v356_v21  ;;  %v373_v34 = vand.u32 4294901760, %v7453_v10  ;;  %v6409_v47 = vpack.c.bf16 %v333_v26, %v321_v48  ;;  %v362_v5 = vsub.f32 %v7451_v9, %v361_v42 }
  0x49   :  { %6406 = vmatpush1.bf16.msra.mxu1 %v6405_v14  ;;  %6478 = vmatpush1.bf16.msra.mxu0 %v6477_v63  ;;  %v367_v15 = vand.u32 4294901760, %v7459_v12  ;;  %v379_v0 = vand.u32 4294901760, %v7461_v13  ;;  %v6411_v40 = vpack.c.bf16 %v351_v60, %v339_v41  ;;  %v385_v57 = vand.u32 4294901760, %v7470_v29 }
  0x4a   :  { %6408 = vmatprep.subr.bf16.mxu1 %v6407_v32  ;;  %6480 = vmatprep.subr.bf16.mxu0 %v6479_v61  ;;  %v6413_v7 = vpack.c.bf16 %v357_v6, %v345_v49  ;;  %v374_v56 = vsub.f32 %v7453_v10, %v373_v34  ;;  %v363_v35 = vand.u32 4294901760, %v362_v5  ;;  %v6487_v20 = vpack.c.bf16 %v373_v34, %v361_v42 }
  0x4b   :  { %v368_v14 = vsub.f32 %v7459_v12, %v367_v15  ;;  %v380_v26 = vsub.f32 %v7461_v13, %v379_v0  ;;  %v386_v48 = vsub.f32 %v7470_v29, %v385_v57  ;;  %v397_v1 = vand.u32 4294901760, %v7472_v30 }
  0x4c   :  { %v375_v63 = vand.u32 4294901760, %v374_v56  ;;  %v391_v32 = vand.u32 4294901760, %v7478_v33  ;;  %v6489_v41 = vpack.c.bf16 %v379_v0, %v367_v15  ;;  %v403_v60 = vand.u32 4294901760, %v7484_v39 }
  0x4d   :  { %6410 = vmatpush1.bf16.msra.mxu1 %v6409_v47  ;;  %6482 = vmatpush1.bf16.msra.mxu0 %v6481_v58  ;;  %v369_v61 = vand.u32 4294901760, %v368_v14  ;;  %v381_v21 = vand.u32 4294901760, %v380_v26  ;;  %v387_v49 = vand.u32 4294901760, %v386_v48  ;;  %v398_v6 = vsub.f32 %v7472_v30, %v397_v1  ;;  %v42_v47 = vld [vmem:[#allocation5 + $0x18] sm:$0xff]  ;;  %v44_v48 = vld [vmem:[#allocation5 + $0x28] sm:$0xff] }
  0x4e   :  { %6412 = vmatprep.subr.bf16.mxu1 %v6411_v40  ;;  %6484 = vmatprep.subr.bf16.mxu0 %v6483_v54  ;;  %v6415_v42 = vpack.c.bf16 %v375_v63, %v363_v35  ;;  %v6491_v56 = vpack.c.bf16 %v397_v1, %v385_v57  ;;  %v392_v27 = vsub.f32 %v7478_v33, %v391_v32  ;;  %v52_v63 = vld [vmem:[#allocation5 + $0x68] sm:$0xff]  ;;  %v54_v1 = vld [vmem:[#allocation5 + $0x78] sm:$0xff] }
  0x4f   :  { %v6417_v5 = vpack.c.bf16 %v381_v21, %v369_v61  ;;  %v404_v58 = vsub.f32 %v7484_v39, %v403_v60  ;;  %v399_v14 = vand.u32 4294901760, %v398_v6  ;;  %v6493_v15 = vpack.c.bf16 %v403_v60, %v391_v32  ;;  %v51_v21 = vld [vmem:[#allocation5 + $0x60] sm:$0xff]  ;;  %v62_v54 = vld [vmem:[#allocation5 + $0xb8] sm:$0xff]  ;;  %v72_v26 = vld [vmem:[#allocation5 + $0x108] sm:$0xff] }
  0x50   :  { %v393_v40 = vand.u32 4294901760, %v392_v27  ;;  %v914_v27 = vand.u32 4294901760, %v42_v47  ;;  %v43_v60 = vld [vmem:[#allocation5 + $0x20] sm:$0xff]  ;;  %v1665_v61 = vand.u32 4294901760, %v44_v48  ;;  %v74_v33 = vld [vmem:[#allocation5 + $0x118] sm:$0xff]  ;;  %v61_v39 = vld [vmem:[#allocation5 + $0xb0] sm:$0xff] }
  0x51   :  { %6414 = vmatpush1.bf16.msra.mxu1 %v6413_v7  ;;  %6486 = vmatpush1.bf16.msra.mxu0 %v6485_v19  ;;  %v405_v35 = vand.u32 4294901760, %v404_v58  ;;  %v6419_v32 = vpack.c.bf16 %v399_v14, %v387_v49  ;;  %v41_v7 = vld [vmem:[#allocation5 + $0x10] sm:$0xff]  ;;  %v918_v19 = vand.u32 4294901760, %v52_v63  ;;  %v920_v58 = vand.u32 4294901760, %v51_v21  ;;  %v64_v14 = vld [vmem:[#allocation5 + $0xc8] sm:$0xff] }
  0x52   :  { %6416 = vmatprep.subr.bf16.mxu1 %v6415_v42  ;;  %6488 = vmatprep.subr.bf16.mxu0 %v6487_v20  ;;  %v53_v42 = vld [vmem:[#allocation5 + $0x70] sm:$0xff]  ;;  %v1667_v57 = vand.u32 4294901760, %v43_v60  ;;  %v7578_v0 = vsub.f32 %v42_v47, %v914_v27 }
  0x53   :  { %v6421_v6 = vpack.c.bf16 %v405_v35, %v393_v40  ;;  %v1669_v40 = vand.u32 4294901760, %v54_v1  ;;  %v916_v35 = vand.u32 4294901760, %v41_v7  ;;  %v7576_v20 = vpack.c.bf16 %v918_v19, %v914_v27 }
  0x54   :  { %v7580_v49 = vsub.f32 %v52_v63, %v918_v19  ;;  %v1671_v34 = vand.u32 4294901760, %v53_v42  ;;  %v7592_v47 = vsub.f32 %v51_v21, %v920_v58  ;;  %v7596_v19 = vsub.f32 %v43_v60, %v1667_v57 }
  0x55   :  { %6418 = vmatpush1.bf16.msra.mxu1 %v6417_v5  ;;  %6490 = vmatpush1.bf16.msra.mxu0 %v6489_v41  ;;  %10509 = vst [vmem:[#allocation22_spill] sm:$0xff] %v7576_v20  ;;  %v7582_v5 = vpack.c.bf16 %v1669_v40, %v1665_v61  ;;  %v7584_v41 = vsub.f32 %v44_v48, %v1665_v61  ;;  %v922_v27 = vand.u32 4294901760, %v62_v54  ;;  %v926_v48 = vand.u32 4294901760, %v72_v26 }
  0x56   :  { %6420 = vmatprep.subr.bf16.mxu1 %v6419_v32  ;;  %6492 = vmatprep.subr.bf16.mxu0 %v6491_v56  ;;  %v7586_v29 = vsub.f32 %v54_v1, %v1669_v40  ;;  %v7588_v30 = vpack.c.bf16 %v920_v58, %v916_v35  ;;  %v71_v32 = vld [vmem:[#allocation5 + $0x100] sm:$0xff]  ;;  %v7590_v20 = vsub.f32 %v41_v7, %v916_v35  ;;  %v1673_v61 = vand.u32 4294901760, %v64_v14  ;;  %v82_v40 = vld [vmem:[#allocation5 + $0x158] sm:$0xff] }
  0x57   :  { %10510 = vst [vmem:[#allocation23_spill] sm:$0xff] %v7582_v5  ;;  %v63_v56 = vld [vmem:[#allocation5 + $0xc0] sm:$0xff]  ;;  %v7594_v63 = vpack.c.bf16 %v1671_v34, %v1667_v57  ;;  %10513 = vst [vmem:[#allocation26_spill] sm:$0xff] %v7596_v19  ;;  %v1677_v1 = vand.u32 4294901760, %v74_v33  ;;  %v924_v7 = vand.u32 4294901760, %v61_v39  ;;  %v928_v21 = vand.u32 4294901760, %v71_v32 }
  0x58   :  { %10511 = vst [vmem:[#allocation24_spill] sm:$0xff] %v7588_v30  ;;  %v10514_v30 = vpack.c.bf16 %v7395_v18, %v7393_v17  ;;  %v1675_v58 = vand.u32 4294901760, %v63_v56  ;;  %v1679_v35 = vand.u32 4294901760, %v73_v11  ;;  %v7602_v57 = vsub.f32 %v53_v42, %v1671_v34  ;;  %v84_v19 = vld [vmem:[#allocation5 + $0x168] sm:$0xff]  ;;  %v94_v34 = vld [vmem:[#allocation5 + $0x1b8] sm:$0xff]  ;;  %v81_v42 = vld [vmem:[#allocation5 + $0x150] sm:$0xff] }
  0x59   :  { %10512 = vst [vmem:[#allocation25_spill] sm:$0xff] %v7594_v63  ;;  %6422 = vmatpush1.bf16.msra.mxu1 %v6421_v6  ;;  %6494 = vmatpush1.bf16.msra.mxu0 %v6493_v15  ;;  %v92_v63 = vld [vmem:[#allocation5 + $0x1a8] sm:$0xff]  ;;  %v7604_v60 = vpack.c.bf16 %v926_v48, %v922_v27  ;;  %v7606_v15 = vsub.f32 %v62_v54, %v922_v27 }
  0x5a   :  { %6424 = vmatprep.subr.bf16.mxu1 %v10514_v30  ;;  %6496 = vmatprep.subr.bf16.mxu0 %v7391_v16  ;;  %v7608_v6 = vsub.f32 %v72_v26, %v926_v48  ;;  %v7612_v17 = vpack.c.bf16 %v1677_v1, %v1673_v61  ;;  %v7614_v16 = vsub.f32 %v64_v14, %v1673_v61  ;;  %v930_v30 = vand.u32 4294901760, %v82_v40  ;;  %v91_v14 = vld [vmem:[#allocation5 + $0x1a0] sm:$0xff] }
  0x5b   :  { %10515 = vst [vmem:[#allocation27_spill] sm:$0xff] %v7604_v60  ;;  %v7616_v18 = vsub.f32 %v74_v33, %v1677_v1  ;;  %v10518_v54 = vpack.c.bf16 %v7401_v24, %v7399_v23  ;;  %v7622_v26 = vpack.c.bf16 %v928_v21, %v924_v7  ;;  %v7624_v27 = vsub.f32 %v61_v39, %v924_v7  ;;  %v83_v61 = vld [vmem:[#allocation5 + $0x160] sm:$0xff]  ;;  %v93_v33 = vld [vmem:[#allocation5 + $0x1b0] sm:$0xff]  ;;  %v102_v7 = vld [vmem:[#allocation5 + $0x1f8] sm:$0xff] }
  0x5c   :  { %10516 = vst [vmem:[#allocation28_spill] sm:$0xff] %v7608_v6  ;;  %449 = vmatmul.mubr.f32.vlgmr.msra.gmra.mrb[0].mxu1 %v7474_v31  ;;  %812 = vmatmul.mubr.f32.vlgmr.msra.gmra.mrb[0].mxu0 %v7474_v31  ;;  %10517 = vst [vmem:[#allocation29_spill] sm:$0xff] %v7612_v17  ;;  %v7626_v48 = vsub.f32 %v71_v32, %v928_v21  ;;  %v934_v6 = vand.u32 4294901760, %v92_v63  ;;  %v10521_v1 = vpack.c.bf16 %v7412_v36, %v7407_v28 }
  0x5d   :  { %6426 = vmatpush1.bf16.msra.mxu1 %v10518_v54  ;;  %6498 = vmatpush1.bf16.msra.mxu0 %v7397_v22  ;;  %10519 = vst [vmem:[#allocation30_spill] sm:$0xff] %v7622_v26  ;;  %v7632_v23 = vpack.c.bf16 %v1679_v35, %v1675_v58  ;;  %v7634_v24 = vsub.f32 %v63_v56, %v1675_v58  ;;  %v1681_v39 = vand.u32 4294901760, %v84_v19  ;;  %v1685_v28 = vand.u32 4294901760, %v94_v34  ;;  %v112_v54 = vld [vmem:[#allocation5 + $0x248] sm:$0xff] }
  0x5e   :  { %10520 = vst [vmem:[#allocation31_spill] sm:$0xff] %v7626_v48  ;;  %6428 = vmatprep.subr.bf16.mxu1 %v10521_v1  ;;  %6500 = vmatprep.subr.bf16.mxu0 %v7403_v25  ;;  %v7636_v22 = vsub.f32 %v73_v11, %v1679_v35  ;;  %v7640_v32 = vpack.c.bf16 %v934_v6, %v930_v30  ;;  %v932_v36 = vand.u32 4294901760, %v81_v42  ;;  %v936_v1 = vand.u32 4294901760, %v91_v14  ;;  %v104_v11 = vld [vmem:[#allocation5 + $0x208] sm:$0xff] }
  0x5f   :  { %10522 = vst [vmem:[#allocation32_spill] sm:$0xff] %v7632_v23  ;;  %10523 = vst [vmem:[#allocation33_spill] sm:$0xff] %v7634_v24  ;;  %567 = vmatprep.mubr.f32.mxu1 %v10508_v62  ;;  %906 = vmatprep.mubr.f32.mxu0 %v10508_v62  ;;  %v7642_v21 = vsub.f32 %v82_v40, %v930_v30  ;;  %v7644_v25 = vsub.f32 %v92_v63, %v934_v6  ;;  %v1683_v56 = vand.u32 4294901760, %v83_v61  ;;  %v101_v63 = vld [vmem:[#allocation5 + $0x1f0] sm:$0xff] }
  0x60   :  { %10524 = vst [vmem:[#allocation34_spill] sm:$0xff] %v7636_v22  ;;  %10525 = vst [vmem:[#allocation35_spill] sm:$0xff] %v7640_v32  ;;  %v1687_v58 = vand.u32 4294901760, %v93_v33  ;;  %v10528_v35 = vpack.c.bf16 %v7419_v43, %v7417_v38  ;;  %v7650_v22 = vpack.c.bf16 %v1685_v28, %v1681_v39  ;;  %v7652_v24 = vsub.f32 %v84_v19, %v1681_v39  ;;  %v111_v19 = vld [vmem:[#allocation5 + $0x240] sm:$0xff] }
  0x61   :  { %10526 = vst [vmem:[#allocation36_spill] sm:$0xff] %v7642_v21  ;;  %10527 = vst [vmem:[#allocation37_spill] sm:$0xff] %v7644_v25  ;;  %6502 = vmatpush1.bf16.msra.mxu0 %v7415_v37  ;;  %v7654_v40 = vsub.f32 %v94_v34, %v1685_v28  ;;  %v938_v30 = vand.u32 4294901760, %v102_v7  ;;  %v114_v21 = vld [vmem:[#allocation5 + $0x258] sm:$0xff]  ;;  %v10531_v6 = vpack.c.bf16 %v7425_v46, %v7423_v45  ;;  %v942_v43 = vand.u32 4294901760, %v112_v54  ;;  %v103_v39 = vld [vmem:[#allocation5 + $0x200] sm:$0xff] }
  0x62   :  { %6430 = vmatpush1.bf16.msra.mxu1 %v10528_v35  ;;  %10529 = vst [vmem:[#allocation38_spill] sm:$0xff] %v7650_v22  ;;  %6504 = vmatprep.subr.bf16.mxu0 %v7421_v44  ;;  %v7660_v25 = vpack.c.bf16 %v936_v1, %v932_v36  ;;  %v7662_v38 = vsub.f32 %v81_v42, %v932_v36  ;;  %v113_v34 = vld [vmem:[#allocation5 + $0x250] sm:$0xff]  ;;  %v1689_v45 = vand.u32 4294901760, %v104_v11  ;;  %v122_v46 = vld [vmem:[#allocation5 + $0x298] sm:$0xff]  ;;  %v1693_v42 = vand.u32 4294901760, %v114_v21 }
  0x63   :  { %10530 = vst [vmem:[#allocation39_spill] sm:$0xff] %v7654_v40  ;;  %6432 = vmatprep.subr.bf16.mxu1 %v10531_v6  ;;  %v7664_v37 = vsub.f32 %v91_v14, %v936_v1  ;;  %v7666_v28 = vpack.c.bf16 %v1687_v58, %v1683_v56  ;;  %v7668_v35 = vsub.f32 %v83_v61, %v1683_v56  ;;  %v940_v36 = vand.u32 4294901760, %v101_v63 }
  0x64   :  { %10532 = vst [vmem:[#allocation40_spill] sm:$0xff] %v7660_v25  ;;  %10533 = vst [vmem:[#allocation41_spill] sm:$0xff] %v7662_v38  ;;  %v7670_v40 = vsub.f32 %v93_v33, %v1687_v58  ;;  %v7672_v6 = vpack.c.bf16 %v942_v43, %v938_v30  ;;  %v7674_v44 = vsub.f32 %v102_v7, %v938_v30  ;;  %v944_v61 = vand.u32 4294901760, %v111_v19  ;;  %v132_v58 = vld [vmem:[#allocation5 + $0x2e8] sm:$0xff] }
  0x65   :  { %10534 = vst [vmem:[#allocation42_spill] sm:$0xff] %v7664_v37  ;;  %10535 = vst [vmem:[#allocation43_spill] sm:$0xff] %v7666_v28  ;;  %v10540_v14 = vpack.c.bf16 %v7431_v52, %v7429_v51  ;;  %6506 = vmatpush1.bf16.msra.mxu0 %v7427_v50  ;;  %v7680_v1 = vsub.f32 %v112_v54, %v942_v43  ;;  %v1691_v56 = vand.u32 4294901760, %v103_v39  ;;  %v1695_v33 = vand.u32 4294901760, %v113_v34  ;;  %v121_v54 = vld [vmem:[#allocation5 + $0x290] sm:$0xff]  ;;  %v131_v43 = vld [vmem:[#allocation5 + $0x2e0] sm:$0xff] }
  0x66   :  { %10536 = vst [vmem:[#allocation44_spill] sm:$0xff] %v7668_v35  ;;  %10537 = vst [vmem:[#allocation45_spill] sm:$0xff] %v7670_v40  ;;  %v124_v40 = vld [vmem:[#allocation5 + $0x2a8] sm:$0xff]  ;;  %v134_v35 = vld [vmem:[#allocation5 + $0x2f8] sm:$0xff]  ;;  %v10542_v7 = vpack.c.bf16 %v7441_v59, %v7437_v55  ;;  %6508 = vmatprep.subr.bf16.mxu0 %v7433_v53  ;;  %v7686_v30 = vpack.c.bf16 %v1693_v42, %v1689_v45  ;;  %v7688_v51 = vsub.f32 %v104_v11, %v1689_v45 }
  0x67   :  { %10538 = vst [vmem:[#allocation46_spill] sm:$0xff] %v7672_v6  ;;  %10539 = vst [vmem:[#allocation47_spill] sm:$0xff] %v7674_v44  ;;  %6434 = vmatpush1.bf16.msra.mxu1 %v10540_v14  ;;  %v7690_v52 = vsub.f32 %v114_v21, %v1693_v42  ;;  %v946_v50 = vand.u32 4294901760, %v122_v46  ;;  %v123_v14 = vld [vmem:[#allocation5 + $0x2a0] sm:$0xff]  ;;  %v7694_v44 = vsub.f32 %v101_v63, %v940_v36  ;;  %v133_v59 = vld [vmem:[#allocation5 + $0x2f0] sm:$0xff]  ;;  %v950_v11 = vand.u32 4294901760, %v132_v58 }
  0x68   :  { %10541 = vst [vmem:[#allocation48_spill] sm:$0xff] %v7680_v1  ;;  %6436 = vmatprep.subr.bf16.mxu1 %v10542_v7  ;;  %10543 = vst [vmem:[#allocation49_spill] sm:$0xff] %v7686_v30  ;;  %v7692_v1 = vpack.c.bf16 %v944_v61, %v940_v36  ;;  %v7696_v37 = vsub.f32 %v111_v19, %v944_v61  ;;  %v7698_v55 = vpack.c.bf16 %v1695_v33, %v1691_v56  ;;  %v142_v61 = vld [vmem:[#allocation5 + $0x338] sm:$0xff] }
  0x69   :  { %10544 = vst [vmem:[#allocation50_spill] sm:$0xff] %v7688_v51  ;;  %10545 = vst [vmem:[#allocation51_spill] sm:$0xff] %v7690_v52  ;;  %v7700_v53 = vsub.f32 %v103_v39, %v1691_v56  ;;  %v7702_v7 = vsub.f32 %v113_v34, %v1695_v33  ;;  %v1697_v21 = vand.u32 4294901760, %v124_v40  ;;  %v10552_v45 = vpack.c.bf16 %v7447_v4, %v7445_v3  ;;  %v154_v33 = vld [vmem:[#allocation5 + $0x398] sm:$0xff] }
  0x6a   :  { %10546 = vst [vmem:[#allocation52_spill] sm:$0xff] %v7692_v1  ;;  %10547 = vst [vmem:[#allocation53_spill] sm:$0xff] %v7694_v44  ;;  %6510 = vmatpush1.bf16.msra.mxu0 %v7443_v2  ;;  %v1701_v42 = vand.u32 4294901760, %v134_v35  ;;  %v948_v63 = vand.u32 4294901760, %v121_v54  ;;  %v952_v36 = vand.u32 4294901760, %v131_v43  ;;  %v1699_v19 = vand.u32 4294901760, %v123_v14 }
  0x6b   :  { %10548 = vst [vmem:[#allocation54_spill] sm:$0xff] %v7696_v37  ;;  %10549 = vst [vmem:[#allocation55_spill] sm:$0xff] %v7698_v55  ;;  %6438 = vmatpush1.bf16.msra.mxu1 %v10552_v45  ;;  %v152_v37 = vld [vmem:[#allocation5 + $0x388] sm:$0xff]  ;;  %v10553_v39 = vpack.c.bf16 %v7453_v10, %v7451_v9  ;;  %6512 = vmatprep.subr.bf16.mxu0 %v7449_v8  ;;  %v7712_v34 = vpack.c.bf16 %v950_v11, %v946_v50  ;;  %v1703_v4 = vand.u32 4294901760, %v133_v59  ;;  %v141_v45 = vld [vmem:[#allocation5 + $0x330] sm:$0xff] }
  0x6c   :  { %10550 = vst [vmem:[#allocation56_spill] sm:$0xff] %v7700_v53  ;;  %10551 = vst [vmem:[#allocation57_spill] sm:$0xff] %v7702_v7  ;;  %v7714_v56 = vsub.f32 %v122_v46, %v946_v50  ;;  %v7716_v3 = vsub.f32 %v132_v58, %v950_v11  ;;  %v144_v2 = vld [vmem:[#allocation5 + $0x348] sm:$0xff]  ;;  %v7718_v7 = vpack.c.bf16 %v1701_v42, %v1697_v21  ;;  %v151_v10 = vld [vmem:[#allocation5 + $0x380] sm:$0xff] }
  0x6d   :  { %6440 = vmatprep.subr.bf16.mxu1 %v10553_v39  ;;  %10554 = vst [vmem:[#allocation58_spill] sm:$0xff] %v7712_v34  ;;  %v7720_v53 = vsub.f32 %v124_v40, %v1697_v21  ;;  %v7722_v44 = vsub.f32 %v134_v35, %v1701_v42  ;;  %v7724_v9 = vpack.c.bf16 %v952_v36, %v948_v63  ;;  %v143_v8 = vld [vmem:[#allocation5 + $0x340] sm:$0xff]  ;;  %v153_v39 = vld [vmem:[#allocation5 + $0x390] sm:$0xff]  ;;  %v954_v35 = vand.u32 4294901760, %v142_v61 }
  0x6e   :  { %10555 = vst [vmem:[#allocation59_spill] sm:$0xff] %v7716_v3  ;;  %10556 = vst [vmem:[#allocation60_spill] sm:$0xff] %v7718_v7  ;;  %v7726_v52 = vsub.f32 %v121_v54, %v948_v63  ;;  %v7728_v46 = vsub.f32 %v131_v43, %v952_v36  ;;  %v7730_v58 = vpack.c.bf16 %v1703_v4, %v1699_v19  ;;  %v10565_v40 = vld [vmem:[#allocation11_spill] sm:$0xff]  ;;  %v958_v21 = vand.u32 4294901760, %v152_v37  ;;  %v10567_v3 = vld [vmem:[#allocation13_spill] sm:$0xff] }
  0x6f   :  { %10557 = vst [vmem:[#allocation61_spill] sm:$0xff] %v7720_v53  ;;  %10558 = vst [vmem:[#allocation62_spill] sm:$0xff] %v7722_v44  ;;  %v7732_v50 = vsub.f32 %v123_v14, %v1699_v19  ;;  %v10564_v11 = vpack.c.bf16 %v7461_v13, %v7459_v12  ;;  %6514 = vmatpush1.bf16.msra.mxu0 %v10565_v40  ;;  %v1705_v42 = vand.u32 4294901760, %v144_v2  ;;  %v1709_v44 = vand.u32 4294901760, %v154_v33  ;;  %v10566_v53 = vld [vmem:[#allocation14_spill] sm:$0xff]  ;;  %v10569_v43 = vld [vmem:[#allocation12_spill] sm:$0xff] }
  0x70   :  { %10559 = vst [vmem:[#allocation63_spill] sm:$0xff] %v7724_v9  ;;  %10560 = vst [vmem:[#allocation64_spill] sm:$0xff] %v7726_v52  ;;  %v10568_v54 = vpack.c.bf16 %v10566_v53, %v10567_v3  ;;  %6516 = vmatprep.subr.bf16.mxu0 %v10569_v43  ;;  %v956_v63 = vand.u32 4294901760, %v141_v45  ;;  %v960_v36 = vand.u32 4294901760, %v151_v10  ;;  %v1707_v14 = vand.u32 4294901760, %v143_v8  ;;  %v10574_v43 = vld [vmem:[#allocation17_spill] sm:$0xff] }
  0x71   :  { %10561 = vst [vmem:[#allocation65_spill] sm:$0xff] %v7728_v46  ;;  %10562 = vst [vmem:[#allocation66_spill] sm:$0xff] %v7730_v58  ;;  %6442 = vmatpush1.bf16.msra.mxu1 %v10564_v11  ;;  %v1711_v19 = vand.u32 4294901760, %v153_v39  ;;  %v7744_v12 = vpack.c.bf16 %v958_v21, %v954_v35  ;;  %v7746_v13 = vsub.f32 %v142_v61, %v954_v35  ;;  %v10267_v35 = vand.u32 4294901760, %v7578_v0 }
  0x72   :  { %10563 = vst [vmem:[#allocation67_spill] sm:$0xff] %v7732_v50  ;;  %6444 = vmatprep.subr.bf16.mxu1 %v10568_v54  ;;  %v7742_v50 = vsub.f32 %v133_v59, %v1703_v4  ;;  %v7748_v11 = vsub.f32 %v152_v37, %v958_v21  ;;  %v7750_v40 = vpack.c.bf16 %v1709_v44, %v1705_v42  ;;  %v10573_v54 = vld [vmem:[#allocation18_spill] sm:$0xff]  ;;  %v10576_v59 = vld [vmem:[#allocation16_spill] sm:$0xff]  ;;  %v10272_v21 = vand.u32 4294901760, %v7586_v29 }
  0x73   :  { %10570 = vst [vmem:[#allocation11_spill] sm:$0xff] %v7744_v12  ;;  %v7752_v46 = vsub.f32 %v144_v2, %v1705_v42  ;;  %v7754_v53 = vsub.f32 %v154_v33, %v1709_v44  ;;  %v7756_v3 = vpack.c.bf16 %v960_v36, %v956_v63  ;;  %v10575_v52 = vpack.c.bf16 %v10573_v54, %v10574_v43  ;;  %v10578_v2 = vld [vmem:[#allocation22_spill] sm:$0xff]  ;;  %v10580_v54 = vld [vmem:[#allocation19_spill] sm:$0xff] }
  0x74   :  { %10571 = vst [vmem:[#allocation14_spill] sm:$0xff] %v7750_v40  ;;  %6518 = vmatpush1.bf16.msra.mxu0 %v10576_v59  ;;  %v7762_v4 = vsub.f32 %v141_v45, %v956_v63  ;;  %v7764_v61 = vsub.f32 %v151_v10, %v960_v36  ;;  %v7766_v37 = vpack.c.bf16 %v1711_v19, %v1707_v14  ;;  %v10268_v33 = vand.u32 4294901760, %v7580_v49  ;;  %v10579_v63 = vld [vmem:[#allocation26_spill] sm:$0xff]  ;;  %v10582_v36 = vld [vmem:[#allocation25_spill] sm:$0xff] }
  0x75   :  { %10572 = vst [vmem:[#allocation13_spill] sm:$0xff] %v7756_v3  ;;  %6446 = vmatpush1.bf16.msra.mxu1 %v10575_v52  ;;  %6664 = vmatprep.subr.bf16.mxu0 %v7582_v5  ;;  %v7771_v44 = vsub.f32 %v143_v8, %v1707_v14  ;;  %v10271_v52 = vand.u32 4294901760, %v7584_v41  ;;  %v1017_v45 = vsub.f32 %v7578_v0, %v10267_v35  ;;  %v10273_v10 = vand.u32 4294901760, %v7590_v20  ;;  %v10581_v35 = vld [vmem:[#allocation24_spill] sm:$0xff] }
  0x76   :  { %10577 = vst [vmem:[#allocation12_spill] sm:$0xff] %v7766_v37  ;;  %6520 = vmatprep.subr.bf16.mxu1 %v10578_v2  ;;  %v1029_v8 = vsub.f32 %v7580_v49, %v10268_v33  ;;  %v1780_v43 = vsub.f32 %v7586_v29, %v10272_v21  ;;  %v10583_v33 = vand.u32 4294901760, %v7592_v47 }
  0x77   :  { %908 = vmatmul.mubr.f32.vlgmr.msra.gmra.mrb[0].mxu0 %v7474_v31  ;;  %v1768_v14 = vsub.f32 %v7584_v41, %v10271_v52  ;;  %v1018_v42 = vand.u32 4294901760, %v1017_v45  ;;  %v10584_v52 = vand.u32 4294901760, %v10579_v63  ;;  %v10585_v45 = vand.u32 4294901760, %v7602_v57 }
  0x78   :  { %570 = vmatmul.mubr.f32.vlgmr.msra.gmra.mrb[0].mxu1 %v10580_v54  ;;  %6666 = vmatpush1.bf16.msra.mxu0 %v10582_v36  ;;  %v1023_v54 = vsub.f32 %v7590_v20, %v10273_v10  ;;  %v1035_v5 = vsub.f32 %v7592_v47, %v10583_v33  ;;  %v1030_v21 = vand.u32 4294901760, %v1029_v8  ;;  %v1781_v36 = vand.u32 4294901760, %v1780_v43 }
  0x79   :  { %6522 = vmatpush1.bf16.msra.mxu1 %v10581_v35  ;;  %v1774_v2 = vsub.f32 %v10579_v63, %v10584_v52  ;;  %6668 = vmatprep.subr.bf16.mxu0 %v7612_v17  ;;  %v1769_v59 = vand.u32 4294901760, %v1768_v14  ;;  %v1786_v35 = vsub.f32 %v7602_v57, %v10585_v45  ;;  %v7810_v10 = vsub.f32 %v153_v39, %v1711_v19  ;;  %v10586_v14 = vld [vmem:[#allocation28_spill] sm:$0xff] }
  0x7a   :  { %6524 = vmatprep.subr.bf16.mxu1 %v7604_v60  ;;  %1002 = vmatprep.mubr.f32.mxu1 %v10508_v62  ;;  %v1024_v33 = vand.u32 4294901760, %v1023_v54  ;;  %v1036_v31 = vand.u32 4294901760, %v1035_v5  ;;  %v10280_v52 = vand.u32 4294901760, %v7606_v15  ;;  %v7815_v60 = vpack.c.bf16 %v1030_v21, %v1018_v42 }
  0x7b   :  { %1753 = vmatprep.mubr.f32.mxu0 %v10508_v62  ;;  %v7817_v17 = vpack.c.bf16 %v1781_v36, %v1769_v59  ;;  %v1775_v8 = vand.u32 4294901760, %v1774_v2  ;;  %v10281_v43 = vand.u32 4294901760, %v10586_v14  ;;  %v1787_v39 = vand.u32 4294901760, %v1786_v35 }
  0x7c   :  { %6670 = vmatpush1.bf16.msra.mxu0 %v7632_v23  ;;  %v1041_v19 = vsub.f32 %v7606_v15, %v10280_v52  ;;  %v10286_v5 = vand.u32 4294901760, %v7614_v16  ;;  %v10289_v54 = vand.u32 4294901760, %v7616_v18  ;;  %v7829_v2 = vpack.c.bf16 %v1036_v31, %v1024_v33  ;;  %v10587_v52 = vld [vmem:[#allocation33_spill] sm:$0xff] }
  0x7d   :  { %6526 = vmatpush1.bf16.msra.mxu1 %v7622_v26  ;;  %6672 = vmatprep.subr.bf16.mxu0 %v7650_v22  ;;  %v1053_v21 = vsub.f32 %v10586_v14, %v10281_v43  ;;  %v10292_v35 = vand.u32 4294901760, %v7624_v27  ;;  %v10293_v42 = vand.u32 4294901760, %v7626_v48  ;;  %v10298_v31 = vand.u32 4294901760, %v10587_v52 }
  0x7e   :  { %6528 = vmatprep.subr.bf16.mxu1 %v7640_v32  ;;  %v1042_v36 = vand.u32 4294901760, %v1041_v19  ;;  %v1792_v59 = vsub.f32 %v7614_v16, %v10286_v5  ;;  %v1804_v45 = vsub.f32 %v7616_v18, %v10289_v54  ;;  %v10588_v19 = vld [vmem:[#allocation34_spill] sm:$0xff]  ;;  %v10589_v54 = vld [vmem:[#allocation36_spill] sm:$0xff] }
  0x7f   :  { %v1054_v33 = vand.u32 4294901760, %v1053_v21  ;;  %v1047_v43 = vsub.f32 %v7624_v27, %v10292_v35  ;;  %v1059_v22 = vsub.f32 %v7626_v48, %v10293_v42  ;;  %v1798_v21 = vsub.f32 %v10587_v52, %v10298_v31  ;;  %v10591_v52 = vld [vmem:[#allocation37_spill] sm:$0xff] }
  0x80   :  { %6674 = vmatpush1.bf16.msra.mxu0 %v7666_v28  ;;  %v1793_v5 = vand.u32 4294901760, %v1792_v59  ;;  %v1805_v23 = vand.u32 4294901760, %v1804_v45  ;;  %v10304_v26 = vand.u32 4294901760, %v10589_v54  ;;  %v7858_v35 = vpack.c.bf16 %v1787_v39, %v1775_v8 }
  0x81   :  { %6530 = vmatpush1.bf16.msra.mxu1 %v7660_v25  ;;  %6676 = vmatprep.subr.bf16.mxu0 %v7686_v30  ;;  %v1048_v42 = vand.u32 4294901760, %v1047_v43  ;;  %v1060_v32 = vand.u32 4294901760, %v1059_v22  ;;  %v10590_v25 = vand.u32 4294901760, %v10588_v19  ;;  %v7863_v59 = vpack.c.bf16 %v1054_v33, %v1042_v36  ;;  %v10592_v22 = vld [vmem:[#allocation39_spill] sm:$0xff]  ;;  %v10593_v36 = vld [vmem:[#allocation42_spill] sm:$0xff] }
  0x82   :  { %6532 = vmatprep.subr.bf16.mxu1 %v7672_v6  ;;  %v7865_v45 = vpack.c.bf16 %v1805_v23, %v1793_v5  ;;  %v1065_v31 = vsub.f32 %v10589_v54, %v10304_v26  ;;  %v10305_v6 = vand.u32 4294901760, %v10591_v52  ;;  %v1799_v8 = vand.u32 4294901760, %v1798_v21  ;;  %v10594_v21 = vld [vmem:[#allocation44_spill] sm:$0xff] }
  0x83   :  { %v1810_v28 = vsub.f32 %v10588_v19, %v10590_v25  ;;  %v7871_v48 = vpack.c.bf16 %v1060_v32, %v1048_v42  ;;  %v10316_v43 = vand.u32 4294901760, %v7652_v24  ;;  %v10317_v39 = vand.u32 4294901760, %v10592_v22 }
  0x84   :  { %6678 = vmatpush1.bf16.msra.mxu0 %v7698_v55  ;;  %v1077_v23 = vsub.f32 %v10591_v52, %v10305_v6  ;;  %v10319_v5 = vand.u32 4294901760, %v7662_v38  ;;  %v1066_v32 = vand.u32 4294901760, %v1065_v31  ;;  %v10322_v26 = vand.u32 4294901760, %v10594_v21  ;;  %v10596_v31 = vld [vmem:[#allocation45_spill] sm:$0xff] }
  0x85   :  { %6534 = vmatpush1.bf16.msra.mxu1 %v7692_v1  ;;  %v1811_v25 = vand.u32 4294901760, %v1810_v28  ;;  %6680 = vmatprep.subr.bf16.mxu0 %v7718_v7  ;;  %v1816_v42 = vsub.f32 %v7652_v24, %v10316_v43  ;;  %v1828_v28 = vsub.f32 %v10592_v22, %v10317_v39  ;;  %v10328_v55 = vand.u32 4294901760, %v10596_v31  ;;  %v10597_v39 = vld [vmem:[#allocation47_spill] sm:$0xff] }
  0x86   :  { %6536 = vmatprep.subr.bf16.mxu1 %v7712_v34  ;;  %v1078_v6 = vand.u32 4294901760, %v1077_v23  ;;  %v1071_v33 = vsub.f32 %v7662_v38, %v10319_v5  ;;  %v10595_v34 = vand.u32 4294901760, %v10593_v36  ;;  %v1822_v43 = vsub.f32 %v10594_v21, %v10322_v26 }
  0x87   :  { %v1817_v1 = vand.u32 4294901760, %v1816_v42  ;;  %v1829_v30 = vand.u32 4294901760, %v1828_v28  ;;  %v10331_v22 = vand.u32 4294901760, %v10597_v39  ;;  %v6693_v23 = vpack.c.bf16 %v1811_v25, %v1799_v8  ;;  %v10599_v25 = vld [vmem:[#allocation51_spill] sm:$0xff] }
  0x88   :  { %v1083_v7 = vsub.f32 %v10593_v36, %v10595_v34  ;;  %6682 = vmatpush1.bf16.msra.mxu0 %v7730_v58  ;;  %v1072_v5 = vand.u32 4294901760, %v1071_v33  ;;  %v1834_v34 = vsub.f32 %v10596_v31, %v10328_v55  ;;  %v6551_v42 = vpack.c.bf16 %v1078_v6, %v1066_v32  ;;  %v10600_v6 = vld [vmem:[#allocation53_spill] sm:$0xff] }
  0x89   :  { %6538 = vmatpush1.bf16.msra.mxu1 %v7724_v9  ;;  %6684 = vmatprep.subr.bf16.mxu0 %v7750_v40  ;;  %v6695_v28 = vpack.c.bf16 %v1829_v30, %v1817_v1  ;;  %v1089_v26 = vsub.f32 %v10597_v39, %v10331_v22  ;;  %v10598_v9 = vld [vmem:[#allocation48_spill] sm:$0xff]  ;;  %v1823_v8 = vand.u32 4294901760, %v1822_v43  ;;  %v10342_v33 = vand.u32 4294901760, %v10599_v25  ;;  %v10601_v30 = vld [vmem:[#allocation54_spill] sm:$0xff] }
  0x8a   :  { %v1084_v38 = vand.u32 4294901760, %v1083_v7  ;;  %6540 = vmatprep.subr.bf16.mxu1 %v7744_v12  ;;  %v10332_v21 = vand.u32 4294901760, %v10598_v9  ;;  %v10335_v7 = vand.u32 4294901760, %v7688_v51  ;;  %v1835_v55 = vand.u32 4294901760, %v1834_v34  ;;  %v10602_v34 = vld [vmem:[#allocation56_spill] sm:$0xff] }
  0x8b   :  { %v10343_v1 = vand.u32 4294901760, %v10600_v6  ;;  %v10345_v22 = vand.u32 4294901760, %v10602_v34 }
  0x8c   :  { %v7913_v58 = vpack.c.bf16 %v1084_v38, %v1072_v5  ;;  %v1101_v40 = vsub.f32 %v10598_v9, %v10332_v21  ;;  %6686 = vmatpush1.bf16.msra.mxu0 %v7766_v37  ;;  %v1090_v38 = vand.u32 4294901760, %v1089_v26  ;;  %v1840_v43 = vsub.f32 %v7688_v51, %v10335_v7  ;;  %v10604_v7 = vld [vmem:[#allocation57_spill] sm:$0xff] }
  0x8d   :  { %6542 = vmatpush1.bf16.msra.mxu1 %v7756_v3  ;;  %v1852_v5 = vsub.f32 %v10599_v25, %v10342_v33  ;;  %6688 = vmatprep.subr.bf16.mxu0 %v7817_v17  ;;  %v1095_v32 = vsub.f32 %v10600_v6, %v10343_v1  ;;  %v10603_v26 = vand.u32 4294901760, %v10601_v30  ;;  %v10348_v3 = vand.u32 4294901760, %v10604_v7  ;;  %v10605_v17 = vld [vmem:[#allocation21_spill] sm:$0xff] }
  0x8e   :  { %6544 = vmatprep.subr.bf16.mxu1 %v7815_v60  ;;  %v1102_v21 = vand.u32 4294901760, %v1101_v40  ;;  %v1841_v12 = vand.u32 4294901760, %v1840_v43  ;;  %v1846_v33 = vsub.f32 %v10602_v34, %v10345_v22  ;;  %v10352_v60 = vand.u32 4294901760, %v7714_v56  ;;  %v10606_v34 = vld [vmem:[#allocation59_spill] sm:$0xff] }
  0x8f   :  { %v1107_v37 = vsub.f32 %v10601_v30, %v10603_v26  ;;  %v1853_v51 = vand.u32 4294901760, %v1852_v5  ;;  %1759 = vmatmul.mubr.f32.vlgmr.msra.gmra.mrb[2].mxu0 %v10605_v17  ;;  %v6697_v40 = vpack.c.bf16 %v1835_v55, %v1823_v8  ;;  %v1096_v1 = vand.u32 4294901760, %v1095_v32  ;;  %v10607_v8 = vld [vmem:[#allocation61_spill] sm:$0xff] }
  0x90   :  { %1008 = vmatmul.mubr.f32.vlgmr.msra.gmra.mrb[2].mxu1 %v10605_v17  ;;  %v1858_v26 = vsub.f32 %v10604_v7, %v10348_v3  ;;  %6690 = vmatpush1.bf16.msra.mxu0 %v7858_v35  ;;  %v6555_v43 = vpack.c.bf16 %v1102_v21, %v1090_v38  ;;  %v1113_v22 = vsub.f32 %v7714_v56, %v10352_v60  ;;  %v10350_v30 = vand.u32 4294901760, %v10606_v34  ;;  %v10608_v3 = vld [vmem:[#allocation62_spill] sm:$0xff]  ;;  %v10610_v21 = vld [vmem:[#allocation65_spill] sm:$0xff] }
  0x91   :  { %v1108_v6 = vand.u32 4294901760, %v1107_v37  ;;  %6546 = vmatpush1.bf16.msra.mxu1 %v7829_v2  ;;  %v6699_v5 = vpack.c.bf16 %v1853_v51, %v1841_v12  ;;  %6692 = vmatprep.subr.bf16.mxu0 %v7865_v45  ;;  %v1847_v37 = vand.u32 4294901760, %v1846_v33  ;;  %v10351_v32 = vand.u32 4294901760, %v10607_v8  ;;  %v10609_v12 = vld [vmem:[#allocation64_spill] sm:$0xff] }
  0x92   :  { %6548 = vmatprep.subr.bf16.mxu1 %v7863_v59  ;;  %v10353_v2 = vand.u32 4294901760, %v10608_v3  ;;  %v1859_v17 = vand.u32 4294901760, %v1858_v26  ;;  %v1125_v51 = vsub.f32 %v10606_v34, %v10350_v30  ;;  %v10356_v35 = vand.u32 4294901760, %v10609_v12  ;;  %1198 = vmatprep.mubr.f32.mxu1 %v10508_v62 }
  0x93   :  { %v6557_v55 = vpack.c.bf16 %v1108_v6, %v1096_v1  ;;  %v10357_v38 = vand.u32 4294901760, %v10610_v21  ;;  %1949 = vmatprep.mubr.f32.mxu0 %v10508_v62  ;;  %v1114_v59 = vand.u32 4294901760, %v1113_v22  ;;  %v1864_v45 = vsub.f32 %v10607_v8, %v10351_v32  ;;  %v10611_v6 = vld [vmem:[#allocation67_spill] sm:$0xff] }
  0x94   :  { %v1876_v33 = vsub.f32 %v10608_v3, %v10353_v2  ;;  %v1869_v1 = vand.u32 4294901760, %v10611_v6  ;;  %6694 = vmatpush1.bf16.msra.mxu0 %v6693_v23  ;;  %v1126_v26 = vand.u32 4294901760, %v1125_v51  ;;  %v1119_v30 = vsub.f32 %v10609_v12, %v10356_v35 }
  0x95   :  { %6550 = vmatpush1.bf16.msra.mxu1 %v7871_v48  ;;  %v1131_v22 = vsub.f32 %v10610_v21, %v10357_v38  ;;  %v10367_v32 = vand.u32 4294901760, %v7742_v50  ;;  %6696 = vmatprep.subr.bf16.mxu0 %v6695_v28  ;;  %v1865_v60 = vand.u32 4294901760, %v1864_v45  ;;  %v10364_v23 = vand.u32 4294901760, %v7746_v13 }
  0x96   :  { %6552 = vmatprep.subr.bf16.mxu1 %v6551_v42  ;;  %v1877_v2 = vand.u32 4294901760, %v1876_v33  ;;  %v1870_v48 = vsub.f32 %v10611_v6, %v1869_v1  ;;  %v6701_v51 = vpack.c.bf16 %v1859_v17, %v1847_v37  ;;  %v1120_v3 = vand.u32 4294901760, %v1119_v30 }
  0x97   :  { %v1132_v8 = vand.u32 4294901760, %v1131_v22  ;;  %v1882_v35 = vsub.f32 %v7742_v50, %v10367_v32  ;;  %v6559_v38 = vpack.c.bf16 %v1126_v26, %v1114_v59  ;;  %v1137_v42 = vsub.f32 %v7746_v13, %v10364_v23 }
  0x98   :  { %v6703_v21 = vpack.c.bf16 %v1877_v2, %v1865_v60  ;;  %v10363_v28 = vand.u32 4294901760, %v7748_v11  ;;  %6698 = vmatpush1.bf16.msra.mxu0 %v6697_v40  ;;  %v1871_v45 = vand.u32 4294901760, %v1870_v48  ;;  %v10360_v30 = vand.u32 4294901760, %v7752_v46 }
  0x99   :  { %6554 = vmatpush1.bf16.msra.mxu1 %v7913_v58  ;;  %v1883_v33 = vand.u32 4294901760, %v1882_v35  ;;  %v10359_v17 = vand.u32 4294901760, %v7754_v53  ;;  %6700 = vmatprep.subr.bf16.mxu0 %v6699_v5  ;;  %v1138_v37 = vand.u32 4294901760, %v1137_v42  ;;  %v10361_v2 = vand.u32 4294901760, %v7762_v4 }
  0x9a   :  { %6556 = vmatprep.subr.bf16.mxu1 %v6555_v43  ;;  %v1149_v60 = vsub.f32 %v7748_v11, %v10363_v28  ;;  %v10362_v59 = vand.u32 4294901760, %v7764_v61  ;;  %v6561_v26 = vpack.c.bf16 %v1132_v8, %v1120_v3  ;;  %v1888_v58 = vsub.f32 %v7752_v46, %v10360_v30 }
  0x9b   :  { %v1900_v40 = vsub.f32 %v7754_v53, %v10359_v17  ;;  %v10366_v43 = vand.u32 4294901760, %v7771_v44  ;;  %v1143_v35 = vsub.f32 %v7762_v4, %v10361_v2  ;;  %v10365_v3 = vand.u32 4294901760, %v7810_v10 }
  0x9c   :  { %v1150_v5 = vand.u32 4294901760, %v1149_v60  ;;  %v1155_v22 = vsub.f32 %v7764_v61, %v10362_v59  ;;  %6702 = vmatpush1.bf16.msra.mxu0 %v6701_v51  ;;  %v6705_v8 = vpack.c.bf16 %v1883_v33, %v1871_v45  ;;  %v1889_v48 = vand.u32 4294901760, %v1888_v58  ;;  %v10614_v58 = vld [vmem:[#allocation39_spill] sm:$0xff] }
  0x9d   :  { %6558 = vmatpush1.bf16.msra.mxu1 %v6557_v55  ;;  %v1901_v42 = vand.u32 4294901760, %v1900_v40  ;;  %v1894_v17 = vsub.f32 %v7771_v44, %v10366_v43  ;;  %6704 = vmatprep.subr.bf16.mxu0 %v6703_v21  ;;  %v1144_v30 = vand.u32 4294901760, %v1143_v35  ;;  %v1906_v59 = vsub.f32 %v7810_v10, %v10365_v3 }
  0x9e   :  { %6560 = vmatprep.subr.bf16.mxu1 %v6559_v38  ;;  %v6563_v60 = vpack.c.bf16 %v1150_v5, %v1138_v37  ;;  %v1156_v2 = vand.u32 4294901760, %v1155_v22  ;;  %v6567_v38 = vpack.c.bf16 %v7580_v49, %v7578_v0  ;;  %v6711_v21 = vpack.c.bf16 %v7586_v29, %v7584_v41  ;;  %v10615_v5 = vld [vmem:[#allocation41_spill] sm:$0xff]  ;;  %v10616_v22 = vld [vmem:[#allocation44_spill] sm:$0xff] }
  0x9f   :  { %v6707_v28 = vpack.c.bf16 %v1901_v42, %v1889_v48  ;;  %v1895_v23 = vand.u32 4294901760, %v1894_v17  ;;  %v1907_v55 = vand.u32 4294901760, %v1906_v59  ;;  %v6569_v33 = vpack.c.bf16 %v7592_v47, %v7590_v20 }
  0xa0   :  { %6706 = vmatpush1.bf16.msra.mxu0 %v6705_v8  ;;  %v6565_v51 = vpack.c.bf16 %v1156_v2, %v1144_v30  ;;  %v6713_v37 = vpack.c.bf16 %v7602_v57, %v10579_v63  ;;  %v6571_v17 = vpack.c.bf16 %v10586_v14, %v7606_v15  ;;  %v6715_v30 = vpack.c.bf16 %v7616_v18, %v7614_v16  ;;  %v10613_v2 = vld [vmem:[#allocation33_spill] sm:$0xff] }
  0xa1   :  { %6562 = vmatpush1.bf16.msra.mxu1 %v6561_v26  ;;  %6708 = vmatprep.subr.bf16.mxu0 %v6707_v28  ;;  %v6709_v45 = vpack.c.bf16 %v1907_v55, %v1895_v23  ;;  %v10612_v23 = vld [vmem:[#allocation31_spill] sm:$0xff]  ;;  %v6717_v59 = vpack.c.bf16 %v10588_v19, %v10613_v2  ;;  %v6575_v26 = vpack.c.bf16 %v10591_v52, %v10589_v54  ;;  %v10617_v48 = vand.u32 4294901760, %v7578_v0 }
  0xa2   :  { %6564 = vmatprep.subr.bf16.mxu1 %v6563_v60  ;;  %v6573_v28 = vpack.c.bf16 %v10612_v23, %v7624_v27  ;;  %v6719_v40 = vpack.c.bf16 %v10614_v58, %v7652_v24  ;;  %v6577_v35 = vpack.c.bf16 %v10593_v36, %v10615_v5  ;;  %v6721_v8 = vpack.c.bf16 %v10596_v31, %v10616_v22 }
  0xa3   :  { %v10618_v42 = vand.u32 4294901760, %v7580_v49  ;;  %v10619_v55 = vand.u32 4294901760, %v7584_v41  ;;  %v10623_v43 = vand.u32 4294901760, %v10579_v63  ;;  %v10624_v0 = vand.u32 4294901760, %v7602_v57  ;;  %v10625_v49 = vld [vmem:[#allocation15_spill] sm:$0xff] }
  0xa4   :  { %6710 = vmatpush1.bf16.msra.mxu0 %v6709_v45  ;;  %v10627_v41 = vand.u32 4294901760, %v10586_v14  ;;  %v10630_v57 = vand.u32 4294901760, %v7624_v27  ;;  %v10631_v63 = vand.u32 4294901760, %v10612_v23  ;;  %v10633_v14 = vand.u32 4294901760, %v10588_v19 }
  0xa5   :  { %6566 = vmatpush1.bf16.msra.mxu1 %v6565_v51  ;;  %6712 = vmatprep.subr.bf16.mxu0 %v6711_v21  ;;  %v8048_v60 = vpack.c.bf16 %v10618_v42, %v10617_v48  ;;  %v10620_v51 = vand.u32 4294901760, %v7586_v29  ;;  %v10622_v21 = vand.u32 4294901760, %v7592_v47  ;;  %v8066_v32 = vpack.c.bf16 %v10624_v0, %v10623_v43  ;;  %v10649_v0 = vld [vmem:[#allocation54_spill] sm:$0xff] }
  0xa6   :  { %6568 = vmatprep.subr.bf16.mxu1 %v6567_v38  ;;  %v10621_v38 = vand.u32 4294901760, %v7590_v20  ;;  %v10626_v29 = vand.u32 4294901760, %v7606_v15  ;;  %v10628_v20 = vand.u32 4294901760, %v7614_v16  ;;  %v10629_v47 = vand.u32 4294901760, %v7616_v18 }
  0xa7   :  { %v8054_v45 = vpack.c.bf16 %v10620_v51, %v10619_v55  ;;  %1951 = vmatmul.mubr.f32.vlgmr.msra.gmra.mrb[2].mxu0 %v10625_v49  ;;  %v8086_v43 = vpack.c.bf16 %v10631_v63, %v10630_v57  ;;  %v10632_v15 = vand.u32 4294901760, %v10613_v2  ;;  %v10634_v16 = vand.u32 4294901760, %v10589_v54 }
  0xa8   :  { %v8060_v3 = vpack.c.bf16 %v10622_v21, %v10621_v38  ;;  %1200 = vmatmul.mubr.f32.vlgmr.msra.gmra.mrb[2].mxu1 %v10625_v49  ;;  %v8074_v48 = vpack.c.bf16 %v10627_v41, %v10626_v29  ;;  %v8080_v42 = vpack.c.bf16 %v10629_v47, %v10628_v20  ;;  %6714 = vmatpush1.bf16.msra.mxu0 %v6713_v37  ;;  %v10635_v18 = vand.u32 4294901760, %v10591_v52  ;;  %v10651_v20 = vld [vmem:[#allocation56_spill] sm:$0xff] }
  0xa9   :  { %6570 = vmatpush1.bf16.msra.mxu1 %v6569_v33  ;;  %v8092_v55 = vpack.c.bf16 %v10633_v14, %v10632_v15  ;;  %v10636_v27 = vand.u32 4294901760, %v7652_v24  ;;  %v10637_v23 = vand.u32 4294901760, %v10614_v58  ;;  %6716 = vmatprep.subr.bf16.mxu0 %v6715_v30  ;;  %v10638_v33 = vand.u32 4294901760, %v10615_v5 }
  0xaa   :  { %v8098_v51 = vpack.c.bf16 %v10635_v18, %v10634_v16  ;;  %6572 = vmatprep.subr.bf16.mxu1 %v6571_v17  ;;  %v10639_v19 = vand.u32 4294901760, %v10593_v36  ;;  %v10640_v54 = vand.u32 4294901760, %v10616_v22  ;;  %v10641_v52 = vand.u32 4294901760, %v10596_v31  ;;  %1318 = vmatprep.mubr.f32.mxu1 %v10508_v62  ;;  %v10644_v17 = vld [vmem:[#allocation50_spill] sm:$0xff]  ;;  %v10647_v22 = vld [vmem:[#allocation53_spill] sm:$0xff] }
  0xab   :  { %v8104_v38 = vpack.c.bf16 %v10637_v23, %v10636_v27  ;;  %v10642_v24 = vand.u32 4294901760, %v10597_v39  ;;  %v10643_v58 = vand.u32 4294901760, %v10598_v9  ;;  %2069 = vmatprep.mubr.f32.mxu0 %v10508_v62  ;;  %v10645_v36 = vand.u32 4294901760, %v10644_v17  ;;  %v10656_v18 = vld [vmem:[#allocation61_spill] sm:$0xff]  ;;  %v10658_v23 = vld [vmem:[#allocation62_spill] sm:$0xff] }
  0xac   :  { %v8110_v37 = vpack.c.bf16 %v10639_v19, %v10638_v33  ;;  %v8116_v2 = vpack.c.bf16 %v10641_v52, %v10640_v54  ;;  %v10646_v30 = vand.u32 4294901760, %v10599_v25  ;;  %v10648_v31 = vand.u32 4294901760, %v10647_v22  ;;  %v10661_v52 = vld [vmem:[#allocation65_spill] sm:$0xff]  ;;  %6718 = vmatpush1.bf16.msra.mxu0 %v6717_v59 }
  0xad   :  { %v8122_v21 = vpack.c.bf16 %v10643_v58, %v10642_v24  ;;  %v10650_v29 = vand.u32 4294901760, %v10649_v0  ;;  %v10652_v47 = vand.u32 4294901760, %v10651_v20  ;;  %v10653_v57 = vand.u32 4294901760, %v10604_v7  ;;  %6574 = vmatpush1.bf16.msra.mxu1 %v6573_v28  ;;  %6720 = vmatprep.subr.bf16.mxu0 %v6719_v40 }
  0xae   :  { %v8130_v5 = vpack.c.bf16 %v10646_v30, %v10645_v36  ;;  %v10654_v15 = vand.u32 4294901760, %v7714_v56  ;;  %v10655_v14 = vand.u32 4294901760, %v10606_v34  ;;  %v10657_v27 = vand.u32 4294901760, %v10656_v18  ;;  %6576 = vmatprep.subr.bf16.mxu1 %v6575_v26 }
  0xaf   :  { %v8136_v41 = vpack.c.bf16 %v10650_v29, %v10648_v31  ;;  %v8142_v63 = vpack.c.bf16 %v10653_v57, %v10652_v47  ;;  %v10659_v33 = vand.u32 4294901760, %v10658_v23  ;;  %v10660_v54 = vand.u32 4294901760, %v10609_v12 }
  0xb0   :  { %v8148_v16 = vpack.c.bf16 %v10655_v14, %v10654_v15  ;;  %v10662_v24 = vand.u32 4294901760, %v10661_v52  ;;  %v10663_v36 = vand.u32 4294901760, %v7742_v50  ;;  %v10664_v31 = vand.u32 4294901760, %v7746_v13  ;;  %6722 = vmatpush1.bf16.msra.mxu0 %v6721_v8  ;;  %v10683_v8 = vld [vmem:[#allocation40_spill] sm:$0xff] }
  0xb1   :  { %v8154_v19 = vpack.c.bf16 %v10659_v33, %v10657_v27  ;;  %v10665_v29 = vand.u32 4294901760, %v7748_v11  ;;  %v10666_v57 = vand.u32 4294901760, %v7752_v46  ;;  %v10667_v15 = vand.u32 4294901760, %v7754_v53  ;;  %6578 = vmatpush1.bf16.msra.mxu1 %v6577_v35 }
  0xb2   :  { %v8160_v58 = vpack.c.bf16 %v10662_v24, %v10660_v54  ;;  %v8166_v30 = vpack.c.bf16 %v10663_v36, %v1869_v1  ;;  %v10668_v27 = vand.u32 4294901760, %v7762_v4  ;;  %v10669_v33 = vand.u32 4294901760, %v7764_v61 }
  0xb3   :  { %v8172_v47 = vpack.c.bf16 %v10665_v29, %v10664_v31  ;;  %v8178_v14 = vpack.c.bf16 %v10667_v15, %v10666_v57  ;;  %v6579_v28 = vpack.c.bf16 %v10598_v9, %v10597_v39  ;;  %v6723_v59 = vpack.c.bf16 %v10599_v25, %v10644_v17  ;;  %v10684_v17 = vld [vmem:[#allocation43_spill] sm:$0xff]  ;;  %v10692_v57 = vld [vmem:[#allocation66_spill] sm:$0xff] }
  0xb4   :  { %v8184_v1 = vpack.c.bf16 %v10669_v33, %v10668_v27  ;;  %v10670_v54 = vand.u32 4294901760, %v7771_v44  ;;  %v10671_v24 = vand.u32 4294901760, %v7810_v10  ;;  %v6581_v31 = vpack.c.bf16 %v10649_v0, %v10647_v22  ;;  %v10685_v22 = vld [vmem:[#allocation46_spill] sm:$0xff]  ;;  %v10686_v0 = vld [vmem:[#allocation49_spill] sm:$0xff]  ;;  %v10691_v29 = vld [vmem:[#allocation63_spill] sm:$0xff] }
  0xb5   :  { %v6725_v26 = vpack.c.bf16 %v10604_v7, %v10651_v20  ;;  %6580 = vmatprep.subr.bf16.mxu1 %v6579_v28  ;;  %6724 = vmatprep.subr.bf16.mxu0 %v6723_v59  ;;  %v6583_v9 = vpack.c.bf16 %v10606_v34, %v7714_v56  ;;  %v6727_v39 = vpack.c.bf16 %v10658_v23, %v10656_v18  ;;  %v10687_v20 = vld [vmem:[#allocation52_spill] sm:$0xff]  ;;  %v10688_v18 = vld [vmem:[#allocation55_spill] sm:$0xff]  ;;  %v10689_v23 = vld [vmem:[#allocation58_spill] sm:$0xff] }
  0xb6   :  { %v8194_v36 = vpack.c.bf16 %v10671_v24, %v10670_v54  ;;  %6582 = vmatpush1.bf16.msra.mxu1 %v6581_v31  ;;  %v6585_v25 = vpack.c.bf16 %v10661_v52, %v10609_v12  ;;  %v6729_v40 = vpack.c.bf16 %v7742_v50, %v10611_v6  ;;  %v6587_v7 = vpack.c.bf16 %v7748_v11, %v7746_v13  ;;  %v10672_v50 = vld [vmem:[#allocation22_spill] sm:$0xff]  ;;  %v10673_v12 = vld [vmem:[#allocation23_spill] sm:$0xff]  ;;  %v10676_v11 = vld [vmem:[#allocation25_spill] sm:$0xff] }
  0xb7   :  { %6726 = vmatpush1.bf16.msra.mxu0 %v6725_v26  ;;  %6584 = vmatprep.subr.bf16.mxu1 %v6583_v9  ;;  %v6731_v35 = vpack.c.bf16 %v7754_v53, %v7752_v46  ;;  %v6589_v56 = vpack.c.bf16 %v7764_v61, %v7762_v4  ;;  %v6733_v34 = vpack.c.bf16 %v7810_v10, %v7771_v44  ;;  %v10674_v13 = vld [vmem:[#allocation19_spill] sm:$0xff]  ;;  %v10675_v46 = vld [vmem:[#allocation24_spill] sm:$0xff]  ;;  %v10678_v4 = vld [vmem:[#allocation29_spill] sm:$0xff] }
  0xb8   :  { %6728 = vmatprep.subr.bf16.mxu0 %v6727_v39  ;;  %v10677_v53 = vld [vmem:[#allocation27_spill] sm:$0xff]  ;;  %v10679_v61 = vld [vmem:[#allocation30_spill] sm:$0xff]  ;;  %v10680_v44 = vld [vmem:[#allocation32_spill] sm:$0xff] }
  0xb9   :  { %v10681_v10 = vld [vmem:[#allocation35_spill] sm:$0xff]  ;;  %v10682_v6 = vld [vmem:[#allocation38_spill] sm:$0xff]  ;;  %v10690_v52 = vld [vmem:[#allocation60_spill] sm:$0xff] }
  0xba   :  { %6586 = vmatpush1.bf16.msra.mxu1 %v6585_v25  ;;  %v10693_v15 = vld [vmem:[#allocation11_spill] sm:$0xff]  ;;  %v10694_v27 = vld [vmem:[#allocation14_spill] sm:$0xff]  ;;  %v10695_v33 = vld [vmem:[#allocation13_spill] sm:$0xff] }
  0xbb   :  { %6730 = vmatpush1.bf16.msra.mxu0 %v6729_v40  ;;  %6588 = vmatprep.subr.bf16.mxu1 %v6587_v7  ;;  %v10696_v28 = vld [vmem:[#allocation12_spill] sm:$0xff]  ;;  %v56_v54 = vld [vmem:[#allocation5 + $0x88] sm:$0xff]  ;;  %v45_v9 = vld [vmem:[#allocation5 + $0x30] sm:$0xff] }
  0xbc   :  { %6732 = vmatprep.subr.bf16.mxu0 %v6731_v35  ;;  %v46_v59 = vld [vmem:[#allocation5 + $0x38] sm:$0xff]  ;;  %v48_v24 = vld [vmem:[#allocation5 + $0x48] sm:$0xff]  ;;  %v55_v39 = vld [vmem:[#allocation5 + $0x80] sm:$0xff] }
  0xbd   :  { %v10697_v31 = vld [vmem:[#allocation20_spill] sm:$0xff]  ;;  %v47_v25 = vld [vmem:[#allocation5 + $0x40] sm:$0xff]  ;;  %v57_v40 = vld [vmem:[#allocation5 + $0x90] sm:$0xff]  ;;  %v3167_v35 = vand.u32 4294901760, %v48_v24 }
  0xbe   :  { %6590 = vmatpush1.bf16.msra.mxu1 %v6589_v56  ;;  %v58_v26 = vld [vmem:[#allocation5 + $0x98] sm:$0xff] }
  0xbf   :  { %6734 = vmatpush1.bf16.msra.mxu0 %v6733_v34  ;;  %6592 = vmatprep.subr.bf16.mxu1 %v10672_v50  ;;  %v66_v7 = vld [vmem:[#allocation5 + $0xd8] sm:$0xff]  ;;  %v3171_v56 = vand.u32 4294901760, %v58_v26  ;;  %v2418_v34 = vand.u32 4294901760, %v45_v9 }
  0xc0   :  { %6736 = vmatprep.subr.bf16.mxu0 %v10673_v12 }
  0xc1   :  { %1321 = vmatmul.mubr.f32.vlgmr.msra.gmra.mrb[2].mxu1 %v10674_v13 }
  0xc2   :  { %2072 = vmatmul.mubr.f32.vlgmr.msra.gmra.mrb[2].mxu0 %v10674_v13  ;;  %6594 = vmatpush1.bf16.msra.mxu1 %v10675_v46  ;;  %v68_v13 = vld [vmem:[#allocation5 + $0xe8] sm:$0xff] }
  0xc3   :  { %6738 = vmatpush1.bf16.msra.mxu0 %v10676_v11  ;;  %6596 = vmatprep.subr.bf16.mxu1 %v10677_v53 }
  0xc4   :  { %6740 = vmatprep.subr.bf16.mxu0 %v10678_v4  ;;  %1415 = vmatprep.mubr.f32.mxu1 %v10508_v62 }
  0xc5   :  { %2166 = vmatprep.mubr.f32.mxu0 %v10508_v62 }
  0xc6   :  { %6598 = vmatpush1.bf16.msra.mxu1 %v10679_v61 }
  0xc7   :  { %6742 = vmatpush1.bf16.msra.mxu0 %v10680_v44  ;;  %6600 = vmatprep.subr.bf16.mxu1 %v10681_v10 }
  0xc8   :  { %6744 = vmatprep.subr.bf16.mxu0 %v10682_v6 }
  0xca   :  { %6602 = vmatpush1.bf16.msra.mxu1 %v10683_v8 }
  0xcb   :  { %6746 = vmatpush1.bf16.msra.mxu0 %v10684_v17  ;;  %6604 = vmatprep.subr.bf16.mxu1 %v10685_v22 }
  0xcc   :  { %6748 = vmatprep.subr.bf16.mxu0 %v10686_v0 }
  0xce   :  { %6606 = vmatpush1.bf16.msra.mxu1 %v10687_v20  ;;  %v8501_v20 = vld [vmem:[#allocation5 + $0x350] sm:$0xff] }
  0xcf   :  { %6750 = vmatpush1.bf16.msra.mxu0 %v10688_v18  ;;  %6608 = vmatprep.subr.bf16.mxu1 %v10689_v23  ;;  %v8268_v23 = vsub.f32 %v58_v26, %v3171_v56 }
  0xd0   :  { %6752 = vmatprep.subr.bf16.mxu0 %v10690_v52  ;;  %v8264_v52 = vpack.c.bf16 %v3171_v56, %v3167_v35 }
  0xd1   :  { %10703 = vst [vmem:[#allocation34_spill] sm:$0xff] %v8268_v23 }
  0xd2   :  { %6610 = vmatpush1.bf16.msra.mxu1 %v10691_v29  ;;  %v65_v29 = vld [vmem:[#allocation5 + $0xd0] sm:$0xff]  ;;  %10701 = vst [vmem:[#allocation26_spill] sm:$0xff] %v8264_v52  ;;  %v8381_v52 = vld [vmem:[#allocation5 + $0x220] sm:$0xff] }
  0xd3   :  { %6754 = vmatpush1.bf16.msra.mxu0 %v10692_v57  ;;  %6612 = vmatprep.subr.bf16.mxu1 %v10693_v15  ;;  %10733 = vst [vmem:[#allocation27_spill] sm:$0xff] %v8381_v52 }
  0xd4   :  { %6756 = vmatprep.subr.bf16.mxu0 %v10694_v27 }
  0xd6   :  { %6614 = vmatpush1.bf16.msra.mxu1 %v10695_v33 }
  0xd7   :  { %6758 = vmatpush1.bf16.msra.mxu0 %v10696_v28  ;;  %6616 = vmatprep.subr.bf16.mxu1 %v8048_v60  ;;  %v2416_v60 = vand.u32 4294901760, %v46_v59  ;;  %v78_v28 = vld [vmem:[#allocation5 + $0x138] sm:$0xff] }
  0xd8   :  { %6760 = vmatprep.subr.bf16.mxu0 %v8054_v45  ;;  %v2420_v45 = vand.u32 4294901760, %v56_v54 }
  0xd9   :  { %1419 = vmatmul.mubr.f32.vlgmr.msra.gmra.mrb[2].mxu1 %v10697_v31  ;;  %v8260_v27 = vsub.f32 %v46_v59, %v2416_v60  ;;  %v3179_v59 = vand.u32 4294901760, %v78_v28 }
  0xda   :  { %2170 = vmatmul.mubr.f32.vlgmr.msra.gmra.mrb[2].mxu0 %v10697_v31  ;;  %6618 = vmatpush1.bf16.msra.mxu1 %v8060_v3  ;;  %v2422_v31 = vand.u32 4294901760, %v55_v39  ;;  %v76_v3 = vld [vmem:[#allocation5 + $0x128] sm:$0xff]  ;;  %v8258_v33 = vpack.c.bf16 %v2420_v45, %v2416_v60  ;;  %v8262_v15 = vsub.f32 %v56_v54, %v2420_v45  ;;  %v8276_v60 = vld [vmem:[#allocation5 + $0xe0] sm:$0xff]  ;;  %v8278_v54 = vld [vmem:[#allocation5 + $0x130] sm:$0xff]  ;;  %v2426_v45 = vand.u32 4294901760, %v65_v29 }
  0xdb   :  { %6762 = vmatpush1.bf16.msra.mxu0 %v8066_v32  ;;  %6620 = vmatprep.subr.bf16.mxu1 %v8074_v48  ;;  %v3169_v32 = vand.u32 4294901760, %v47_v25  ;;  %v3173_v48 = vand.u32 4294901760, %v57_v40  ;;  %10699 = vst [vmem:[#allocation17_spill] sm:$0xff] %v8260_v27  ;;  %v2428_v57 = vand.u32 4294901760, %v76_v3  ;;  %10707 = vst [vmem:[#allocation45_spill] sm:$0xff] %v8276_v60 }
  0xdc   :  { %6764 = vmatprep.subr.bf16.mxu0 %v8080_v42  ;;  %1561 = vmatprep.mubr.f32.mxu1 %v10508_v62  ;;  %v2424_v42 = vand.u32 4294901760, %v66_v7  ;;  %10698 = vst [vmem:[#allocation18_spill] sm:$0xff] %v8258_v33  ;;  %10700 = vst [vmem:[#allocation16_spill] sm:$0xff] %v8262_v15  ;;  %v8270_v18 = vpack.c.bf16 %v2422_v31, %v2418_v34  ;;  %v3175_v33 = vand.u32 4294901760, %v68_v13 }
  0xdd   :  { %2312 = vmatprep.mubr.f32.mxu0 %v10508_v62  ;;  %10708 = vst [vmem:[#allocation47_spill] sm:$0xff] %v8278_v54  ;;  %v8284_v26 = vsub.f32 %v47_v25, %v3169_v32 }
  0xde   :  { %6622 = vmatpush1.bf16.msra.mxu1 %v8086_v43  ;;  %v75_v43 = vld [vmem:[#allocation5 + $0x120] sm:$0xff]  ;;  %10704 = vst [vmem:[#allocation36_spill] sm:$0xff] %v8270_v18  ;;  %v8294_v56 = vsub.f32 %v66_v7, %v2424_v42  ;;  %v8300_v25 = vsub.f32 %v68_v13, %v3175_v33  ;;  %v8312_v7 = vsub.f32 %v65_v29, %v2426_v45  ;;  %v8377_v18 = vld [vmem:[#allocation5 + $0x210] sm:$0xff] }
  0xdf   :  { %6766 = vmatpush1.bf16.msra.mxu0 %v8092_v55  ;;  %6624 = vmatprep.subr.bf16.mxu1 %v8098_v51  ;;  %v8266_v55 = vsub.f32 %v48_v24, %v3167_v35  ;;  %v8272_v51 = vsub.f32 %v45_v9, %v2418_v34  ;;  %v8282_v24 = vpack.c.bf16 %v3173_v48, %v3169_v32  ;;  %v2430_v35 = vand.u32 4294901760, %v75_v43  ;;  %v8286_v9 = vld [vmem:[#allocation5 + $0x178] sm:$0xff]  ;;  %v8317_v13 = vld [vmem:[#allocation5 + $0x1c0] sm:$0xff] }
  0xe0   :  { %6768 = vmatprep.subr.bf16.mxu0 %v8104_v38  ;;  %v8274_v38 = vsub.f32 %v55_v39, %v2422_v31  ;;  %10710 = vst [vmem:[#allocation51_spill] sm:$0xff] %v8286_v9  ;;  %v8290_v31 = vsub.f32 %v57_v40, %v3173_v48  ;;  %v8292_v39 = vpack.c.bf16 %v2428_v57, %v2424_v42  ;;  %v10372_v34 = vand.u32 4294901760, %v8276_v60  ;;  %v8335_v48 = vld [vmem:[#allocation5 + $0x218] sm:$0xff] }
  0xe1   :  { %10702 = vst [vmem:[#allocation28_spill] sm:$0xff] %v8266_v55  ;;  %10705 = vst [vmem:[#allocation37_spill] sm:$0xff] %v8272_v51  ;;  %v10373_v32 = vand.u32 4294901760, %v8278_v54  ;;  %v8310_v40 = vsub.f32 %v78_v28, %v3179_v59  ;;  %v8323_v42 = vpack.c.bf16 %v2430_v35, %v2426_v45 }
  0xe2   :  { %10706 = vst [vmem:[#allocation42_spill] sm:$0xff] %v8274_v38  ;;  %6626 = vmatpush1.bf16.msra.mxu1 %v8110_v37  ;;  %10709 = vst [vmem:[#allocation48_spill] sm:$0xff] %v8282_v24  ;;  %v8296_v37 = vld [vmem:[#allocation5 + $0x1c8] sm:$0xff]  ;;  %v8330_v29 = vsub.f32 %v8276_v60, %v10372_v34  ;;  %v8449_v60 = vld [vmem:[#allocation5 + $0x2c0] sm:$0xff] }
  0xe3   :  { %6770 = vmatpush1.bf16.msra.mxu0 %v8116_v2  ;;  %6628 = vmatprep.subr.bf16.mxu1 %v8122_v21  ;;  %10711 = vst [vmem:[#allocation57_spill] sm:$0xff] %v8292_v39  ;;  %10712 = vst [vmem:[#allocation59_spill] sm:$0xff] %v8296_v37  ;;  %v8298_v2 = vsub.f32 %v76_v3, %v2428_v57  ;;  %v8304_v24 = vld [vmem:[#allocation5 + $0x188] sm:$0xff]  ;;  %v8306_v21 = vld [vmem:[#allocation5 + $0x1d8] sm:$0xff]  ;;  %v10377_v28 = vand.u32 4294901760, %v8296_v37 }
  0xe4   :  { %6772 = vmatprep.subr.bf16.mxu0 %v8130_v5  ;;  %10713 = vst [vmem:[#allocation64_spill] sm:$0xff] %v8304_v24  ;;  %10714 = vst [vmem:[#allocation67_spill] sm:$0xff] %v8306_v21  ;;  %v8308_v5 = vpack.c.bf16 %v3179_v59, %v3175_v33  ;;  %v8315_v57 = vld [vmem:[#allocation5 + $0x170] sm:$0xff]  ;;  %v8319_v3 = vld [vmem:[#allocation5 + $0x180] sm:$0xff]  ;;  %v8325_v33 = vsub.f32 %v75_v43, %v2430_v35  ;;  %v10380_v45 = vand.u32 4294901760, %v8304_v24  ;;  %v10730_v39 = vand.u32 4294901760, %v8306_v21 }
  0xe5   :  { %10716 = vst [vmem:[#allocation33_spill] sm:$0xff] %v8310_v40  ;;  %10717 = vst [vmem:[#allocation39_spill] sm:$0xff] %v8312_v7  ;;  %v8333_v59 = vld [vmem:[#allocation5 + $0x1d0] sm:$0xff]  ;;  %v8351_v34 = vld [vmem:[#allocation5 + $0x268] sm:$0xff] }
  0xe6   :  { %10715 = vst [vmem:[#allocation31_spill] sm:$0xff] %v8308_v5  ;;  %10718 = vst [vmem:[#allocation41_spill] sm:$0xff] %v8315_v57  ;;  %6630 = vmatpush1.bf16.msra.mxu1 %v8136_v41  ;;  %v8342_v41 = vsub.f32 %v8278_v54, %v10373_v32  ;;  %v8361_v5 = vld [vmem:[#allocation5 + $0x228] sm:$0xff]  ;;  %v8368_v35 = vsub.f32 %v8304_v24, %v10380_v45  ;;  %v10734_v45 = vand.u32 4294901760, %v8315_v57  ;;  %v10736_v32 = vand.u32 4294901760, %v8319_v3 }
  0xe7   :  { %10719 = vst [vmem:[#allocation44_spill] sm:$0xff] %v8317_v13  ;;  %10720 = vst [vmem:[#allocation50_spill] sm:$0xff] %v8319_v3  ;;  %6774 = vmatpush1.bf16.msra.mxu0 %v8142_v63  ;;  %6632 = vmatprep.subr.bf16.mxu1 %v8148_v16  ;;  %v10726_v63 = vand.u32 4294901760, %v8286_v9  ;;  %v8356_v16 = vsub.f32 %v8296_v37, %v10377_v28  ;;  %v8373_v28 = vsub.f32 %v8306_v21, %v10730_v39  ;;  %v8429_v54 = vld [vmem:[#allocation5 + $0x2c8] sm:$0xff] }
  0xe8   :  { %10721 = vst [vmem:[#allocation53_spill] sm:$0xff] %v8323_v42  ;;  %10722 = vst [vmem:[#allocation54_spill] sm:$0xff] %v8325_v33  ;;  %6776 = vmatprep.subr.bf16.mxu0 %v8154_v19  ;;  %v8379_v42 = vld [vmem:[#allocation5 + $0x260] sm:$0xff]  ;;  %v8388_v24 = vsub.f32 %v8315_v57, %v10734_v45  ;;  %v10735_v39 = vand.u32 4294901760, %v8317_v13  ;;  %v8398_v21 = vsub.f32 %v8319_v3, %v10736_v32  ;;  %v10739_v45 = vand.u32 4294901760, %v8333_v59  ;;  %v8419_v57 = vld [vmem:[#allocation5 + $0x308] sm:$0xff] }
  0xe9   :  { %10723 = vst [vmem:[#allocation56_spill] sm:$0xff] %v8330_v29  ;;  %10724 = vst [vmem:[#allocation61_spill] sm:$0xff] %v8333_v59  ;;  %v8347_v43 = vsub.f32 %v8286_v9, %v10726_v63  ;;  %v8363_v63 = vld [vmem:[#allocation5 + $0x278] sm:$0xff]  ;;  %v10393_v37 = vand.u32 4294901760, %v8361_v5 }
  0xea   :  { %10725 = vst [vmem:[#allocation62_spill] sm:$0xff] %v8335_v48  ;;  %10727 = vst [vmem:[#allocation65_spill] sm:$0xff] %v8351_v34  ;;  %6634 = vmatpush1.bf16.msra.mxu1 %v8160_v58  ;;  %v8393_v19 = vsub.f32 %v8317_v13, %v10735_v39  ;;  %v8401_v58 = vld [vmem:[#allocation5 + $0x270] sm:$0xff]  ;;  %v8410_v39 = vsub.f32 %v8333_v59, %v10739_v45  ;;  %v10740_v13 = vand.u32 4294901760, %v8335_v48  ;;  %v8447_v59 = vld [vmem:[#allocation5 + $0x300] sm:$0xff]  ;;  %v10754_v45 = vand.u32 4294901760, %v8381_v52 }
  0xeb   :  { %10728 = vst [vmem:[#allocation22_spill] sm:$0xff] %v8361_v5  ;;  %10729 = vst [vmem:[#allocation23_spill] sm:$0xff] %v8363_v63  ;;  %6778 = vmatpush1.bf16.msra.mxu0 %v8166_v30  ;;  %v8403_v30 = vld [vmem:[#allocation5 + $0x2b8] sm:$0xff]  ;;  %6636 = vmatprep.subr.bf16.mxu1 %v8172_v47  ;;  %v10742_v47 = vand.u32 4294901760, %v8351_v34  ;;  %v8436_v3 = vsub.f32 %v8361_v5, %v10393_v37  ;;  %v10750_v37 = vand.u32 4294901760, %v8377_v18 }
  0xec   :  { %10731 = vst [vmem:[#allocation24_spill] sm:$0xff] %v8377_v18  ;;  %10732 = vst [vmem:[#allocation25_spill] sm:$0xff] %v8379_v42  ;;  %6780 = vmatprep.subr.bf16.mxu0 %v8178_v14  ;;  %v8415_v32 = vsub.f32 %v8335_v48, %v10740_v13  ;;  %v8431_v13 = vld [vmem:[#allocation5 + $0x318] sm:$0xff]  ;;  %v10745_v48 = vand.u32 4294901760, %v8363_v63 }
  0xed   :  { %10737 = vst [vmem:[#allocation29_spill] sm:$0xff] %v8401_v58  ;;  %10738 = vst [vmem:[#allocation30_spill] sm:$0xff] %v8403_v30  ;;  %v8424_v14 = vsub.f32 %v8351_v34, %v10742_v47  ;;  %v8445_v34 = vld [vmem:[#allocation5 + $0x2b0] sm:$0xff]  ;;  %v8456_v5 = vsub.f32 %v8377_v18, %v10750_v37  ;;  %v10758_v37 = vand.u32 4294901760, %v8401_v58  ;;  %v8487_v18 = vld [vmem:[#allocation5 + $0x3a8] sm:$0xff] }
  0xee   :  { %10741 = vst [vmem:[#allocation32_spill] sm:$0xff] %v8419_v57  ;;  %10743 = vst [vmem:[#allocation35_spill] sm:$0xff] %v8429_v54  ;;  %v8441_v47 = vsub.f32 %v8363_v63, %v10745_v48  ;;  %6638 = vmatpush1.bf16.msra.mxu1 %v8184_v1  ;;  %v10752_v48 = vand.u32 4294901760, %v8379_v42  ;;  %v8466_v63 = vsub.f32 %v8381_v52, %v10754_v45  ;;  %v8469_v1 = vld [vmem:[#allocation5 + $0x310] sm:$0xff]  ;;  %v10764_v52 = vand.u32 4294901760, %v8429_v54 }
  0xef   :  { %10744 = vst [vmem:[#allocation38_spill] sm:$0xff] %v8431_v13  ;;  %10747 = vst [vmem:[#allocation43_spill] sm:$0xff] %v8445_v34  ;;  %6782 = vmatpush1.bf16.msra.mxu0 %v8194_v36  ;;  %v8471_v36 = vld [vmem:[#allocation5 + $0x358] sm:$0xff]  ;;  %6640 = vmatprep.subr.bf16.mxu1 %v10672_v50  ;;  %v10761_v50 = vand.u32 4294901760, %v8419_v57 }
  0xf0   :  { %10746 = vst [vmem:[#allocation40_spill] sm:$0xff] %v8441_v47  ;;  %10748 = vst [vmem:[#allocation46_spill] sm:$0xff] %v8447_v59  ;;  %v8461_v9 = vsub.f32 %v8379_v42, %v10752_v48  ;;  %6784 = vmatprep.subr.bf16.mxu0 %v10673_v12  ;;  %v8478_v48 = vsub.f32 %v8401_v58, %v10758_v37  ;;  %v10760_v42 = vand.u32 4294901760, %v8403_v30 }
  0xf1   :  { %10749 = vst [vmem:[#allocation49_spill] sm:$0xff] %v8449_v60  ;;  %10751 = vst [vmem:[#allocation68_spill] sm:$0xff] %v8456_v5  ;;  %v8492_v12 = vsub.f32 %v8419_v57, %v10761_v50  ;;  %1563 = vmatmul.mubr.f32.vlgmr.msra.gmra.mrb[2].mxu1 %v10625_v49  ;;  %v8508_v50 = vsub.f32 %v8429_v54, %v10764_v52  ;;  %v10768_v52 = vand.u32 4294901760, %v8445_v34  ;;  %v10770_v57 = vand.u32 4294901760, %v8449_v60 }
  0xf2   :  { %10753 = vst [vmem:[#allocation69_spill] sm:$0xff] %v8461_v9  ;;  %10755 = vst [vmem:[#allocation70_spill] sm:$0xff] %v8466_v63  ;;  %v8483_v45 = vsub.f32 %v8403_v30, %v10760_v42  ;;  %v8499_v42 = vld [vmem:[#allocation5 + $0x3b8] sm:$0xff]  ;;  %2314 = vmatmul.mubr.f32.vlgmr.msra.gmra.mrb[2].mxu0 %v10625_v49  ;;  %v10766_v63 = vand.u32 4294901760, %v8431_v13  ;;  %v8517_v30 = vld [vmem:[#allocation5 + $0x3a0] sm:$0xff]  ;;  %6642 = vmatpush1.bf16.msra.mxu1 %v10675_v46  ;;  %v10773_v49 = vand.u32 4294901760, %v8471_v36 }
  0xf3   :  { %10756 = vst [vmem:[#allocation71_spill] sm:$0xff] %v8469_v1  ;;  %10757 = vst [vmem:[#allocation72_spill] sm:$0xff] %v8471_v36  ;;  %6786 = vmatpush1.bf16.msra.mxu0 %v10676_v11  ;;  %v8526_v54 = vsub.f32 %v8445_v34, %v10768_v52  ;;  %v8536_v58 = vsub.f32 %v8449_v60, %v10770_v57  ;;  %v8539_v46 = vld [vmem:[#allocation5 + $0x3b0] sm:$0xff]  ;;  %6644 = vmatprep.subr.bf16.mxu1 %v10677_v53  ;;  %v10771_v11 = vand.u32 4294901760, %v8469_v1 }
  0xf4   :  { %10759 = vst [vmem:[#allocation73_spill] sm:$0xff] %v8478_v48  ;;  %10762 = vst [vmem:[#allocation74_spill] sm:$0xff] %v8492_v12  ;;  %v8497_v48 = vld [vmem:[#allocation5 + $0x368] sm:$0xff]  ;;  %v8513_v37 = vsub.f32 %v8431_v13, %v10766_v63  ;;  %v8519_v12 = vld [vmem:[#allocation5 + $0x360] sm:$0xff]  ;;  %v10769_v63 = vand.u32 4294901760, %v8447_v59  ;;  %6788 = vmatprep.subr.bf16.mxu0 %v10678_v4  ;;  %1657 = vmatprep.mubr.f32.mxu1 %v10508_v62  ;;  %v8556_v53 = vsub.f32 %v8471_v36, %v10773_v49 }
  0xf5   :  { %10763 = vst [vmem:[#allocation75_spill] sm:$0xff] %v8499_v42  ;;  %10765 = vst [vmem:[#allocation76_spill] sm:$0xff] %v8508_v50  ;;  %v8546_v52 = vsub.f32 %v8469_v1, %v10771_v11  ;;  %2408 = vmatprep.mubr.f32.mxu0 %v10508_v62  ;;  %v10775_v4 = vand.u32 4294901760, %v8487_v18  ;;  %v10777_v57 = vand.u32 4294901760, %v8497_v48  ;;  %v10779_v60 = vand.u32 4294901760, %v8499_v42 }
  0xf6   :  { %10767 = vst [vmem:[#allocation77_spill] sm:$0xff] %v8517_v30  ;;  %v8531_v13 = vsub.f32 %v8447_v59, %v10769_v63  ;;  %10774 = vst [vmem:[#allocation79_spill] sm:$0xff] %v8556_v53  ;;  %v10414_v63 = vand.u32 4294901760, %v8517_v30  ;;  %v10416_v59 = vand.u32 4294901760, %v8519_v12  ;;  %v10781_v49 = vand.u32 4294901760, %v8501_v20  ;;  %6646 = vmatpush1.bf16.msra.mxu1 %v10679_v61 }
  0xf7   :  { %10772 = vst [vmem:[#allocation78_spill] sm:$0xff] %v8546_v52  ;;  %v8561_v11 = vsub.f32 %v8487_v18, %v10775_v4  ;;  %v8568_v1 = vsub.f32 %v8497_v48, %v10777_v57  ;;  %v8573_v34 = vsub.f32 %v8499_v42, %v10779_v60  ;;  %6790 = vmatpush1.bf16.msra.mxu0 %v10680_v44  ;;  %v10417_v4 = vand.u32 4294901760, %v8274_v38  ;;  %v10798_v42 = vld [vmem:[#allocation60_spill] sm:$0xff] }
  0xf8   :  { %v8578_v36 = vsub.f32 %v8501_v20, %v10781_v49  ;;  %v8586_v57 = vsub.f32 %v8517_v30, %v10414_v63  ;;  %v8591_v60 = vsub.f32 %v8519_v12, %v10416_v59  ;;  %6648 = vmatprep.subr.bf16.mxu1 %v10681_v10  ;;  %6792 = vmatprep.subr.bf16.mxu0 %v10682_v6  ;;  %v10418_v63 = vand.u32 4294901760, %v8272_v51  ;;  %v10789_v30 = vld [vmem:[#allocation55_spill] sm:$0xff] }
  0xf9   :  { %10776 = vst [vmem:[#allocation80_spill] sm:$0xff] %v8561_v11  ;;  %10778 = vst [vmem:[#allocation81_spill] sm:$0xff] %v8568_v1  ;;  %v10785_v44 = vand.u32 4294901760, %v8260_v27  ;;  %v10790_v49 = vand.u32 4294901760, %v8266_v55  ;;  %v10820_v10 = vand.u32 4294901760, %v8393_v19 }
  0xfa   :  { %10780 = vst [vmem:[#allocation82_spill] sm:$0xff] %v8573_v34  ;;  %10782 = vst [vmem:[#allocation83_spill] sm:$0xff] %v8578_v36  ;;  %6650 = vmatpush1.bf16.msra.mxu1 %v10683_v8  ;;  %v10786_v8 = vand.u32 4294901760, %v8262_v15  ;;  %v8647_v61 = vpack.c.bf16 %v10417_v4, %v10418_v63  ;;  %v10803_v4 = vand.u32 4294901760, %v8300_v25  ;;  %v10804_v63 = vand.u32 4294901760, %v8310_v40 }
  0xfb   :  { %10783 = vst [vmem:[#allocation84_spill] sm:$0xff] %v8586_v57  ;;  %10784 = vst [vmem:[#allocation85_spill] sm:$0xff] %v8591_v60  ;;  %6794 = vmatpush1.bf16.msra.mxu0 %v10684_v17  ;;  %6652 = vmatprep.subr.bf16.mxu1 %v10685_v22  ;;  %v10788_v17 = vld [vmem:[#allocation52_spill] sm:$0xff]  ;;  %v10791_v22 = vand.u32 4294901760, %v8268_v23 }
  0xfc   :  { %6796 = vmatprep.subr.bf16.mxu0 %v10686_v0  ;;  %v8632_v6 = vpack.c.bf16 %v10786_v8, %v10785_v44  ;;  %10793 = vst [vmem:[#allocation55_spill] sm:$0xff] %v8647_v61  ;;  %v10794_v44 = vand.u32 4294901760, %v8284_v26  ;;  %v10795_v8 = vand.u32 4294901760, %v8290_v31  ;;  %v10799_v0 = vld [vmem:[#allocation70_spill] sm:$0xff]  ;;  %v8668_v61 = vpack.c.bf16 %v10804_v63, %v10803_v4 }
  0xfd   :  { %v8641_v59 = vpack.c.bf16 %v10791_v22, %v10790_v49  ;;  %v10800_v49 = vand.u32 4294901760, %v8294_v56  ;;  %v10801_v22 = vand.u32 4294901760, %v8298_v2  ;;  %v10816_v4 = vand.u32 4294901760, %v8368_v35 }
  0xfe   :  { %10787 = vst [vmem:[#allocation86_spill] sm:$0xff] %v8632_v6  ;;  %6654 = vmatpush1.bf16.msra.mxu1 %v10788_v17  ;;  %v8653_v17 = vpack.c.bf16 %v10795_v8, %v10794_v44  ;;  %10805 = vst [vmem:[#allocation60_spill] sm:$0xff] %v8668_v61  ;;  %v10806_v44 = vand.u32 4294901760, %v8312_v7  ;;  %v10807_v8 = vand.u32 4294901760, %v8325_v33  ;;  %v10811_v6 = vand.u32 4294901760, %v8342_v41 }
  0xff   :  { %6798 = vmatpush1.bf16.msra.mxu0 %v10789_v30  ;;  %10792 = vst [vmem:[#allocation52_spill] sm:$0xff] %v8641_v59  ;;  %v10797_v30 = vld [vmem:[#allocation58_spill] sm:$0xff]  ;;  %v8662_v59 = vpack.c.bf16 %v10801_v22, %v10800_v49  ;;  %v10813_v22 = vand.u32 4294901760, %v8347_v43  ;;  %v10817_v61 = vand.u32 4294901760, %v8373_v28 }
 0x100   :  { %10796 = vst [vmem:[#allocation87_spill] sm:$0xff] %v8653_v17  ;;  %6656 = vmatprep.subr.bf16.mxu1 %v10797_v30  ;;  %6800 = vmatprep.subr.bf16.mxu0 %v10798_v42  ;;  %v8674_v30 = vpack.c.bf16 %v10807_v8, %v10806_v44  ;;  %v10809_v42 = vld [vmem:[#allocation73_spill] sm:$0xff]  ;;  %v10810_v17 = vand.u32 4294901760, %v8330_v29  ;;  %v10819_v8 = vand.u32 4294901760, %v8388_v24 }
 0x101   :  { %10802 = vst [vmem:[#allocation58_spill] sm:$0xff] %v8662_v59  ;;  %v10814_v59 = vand.u32 4294901760, %v8356_v16  ;;  %v8693_v44 = vpack.c.bf16 %v10817_v61, %v10816_v4  ;;  %v10828_v61 = vand.u32 4294901760, %v8436_v3  ;;  %v10829_v4 = vand.u32 4294901760, %v8441_v47 }
 0x102   :  { %10808 = vst [vmem:[#allocation88_spill] sm:$0xff] %v8674_v30  ;;  %v8681_v49 = vpack.c.bf16 %v10811_v6, %v10810_v17  ;;  %v8699_v30 = vpack.c.bf16 %v10820_v10, %v10819_v8  ;;  %v10822_v6 = vand.u32 4294901760, %v8398_v21  ;;  %v10823_v17 = vand.u32 4294901760, %v8410_v39  ;;  %v10831_v10 = vld [vmem:[#allocation63_spill] sm:$0xff]  ;;  %v10832_v8 = vld [vmem:[#allocation66_spill] sm:$0xff] }
 0x103   :  { %v8687_v63 = vpack.c.bf16 %v10814_v59, %v10813_v22  ;;  %10818 = vst [vmem:[#allocation91_spill] sm:$0xff] %v8693_v44  ;;  %v10825_v59 = vand.u32 4294901760, %v8415_v32  ;;  %v10826_v22 = vand.u32 4294901760, %v8424_v14  ;;  %v8717_v44 = vpack.c.bf16 %v10829_v4, %v10828_v61  ;;  %6658 = vmatpush1.bf16.msra.mxu1 %v10831_v10  ;;  %6802 = vmatpush1.bf16.msra.mxu0 %v10832_v8  ;;  %v10841_v10 = vld [vmem:[#allocation11_spill] sm:$0xff]  ;;  %v10842_v8 = vld [vmem:[#allocation14_spill] sm:$0xff] }
 0x104   :  { %10812 = vst [vmem:[#allocation89_spill] sm:$0xff] %v8681_v49  ;;  %10821 = vst [vmem:[#allocation92_spill] sm:$0xff] %v8699_v30  ;;  %v8705_v49 = vpack.c.bf16 %v10823_v17, %v10822_v6  ;;  %v10833_v30 = vand.u32 4294901760, %v8539_v46  ;;  %v10835_v17 = vand.u32 4294901760, %v8456_v5  ;;  %v10839_v61 = vand.u32 4294901760, %v10809_v42  ;;  %6660 = vmatprep.subr.bf16.mxu1 %v10841_v10  ;;  %6804 = vmatprep.subr.bf16.mxu0 %v10842_v8 }
 0x105   :  { %10815 = vst [vmem:[#allocation90_spill] sm:$0xff] %v8687_v63  ;;  %v8711_v63 = vpack.c.bf16 %v10826_v22, %v10825_v59  ;;  %10830 = vst [vmem:[#allocation95_spill] sm:$0xff] %v8717_v44  ;;  %v10836_v59 = vand.u32 4294901760, %v8461_v9  ;;  %v10849_v44 = vld [vmem:[#allocation51_spill] sm:$0xff] }
 0x106   :  { %10824 = vst [vmem:[#allocation93_spill] sm:$0xff] %v8705_v49  ;;  %v8724_v6 = vsub.f32 %v8539_v46, %v10833_v30  ;;  %v10843_v30 = vld [vmem:[#allocation74_spill] sm:$0xff]  ;;  %v10850_v49 = vand.u32 4294901760, %v10849_v44  ;;  %v10862_v44 = vld [vmem:[#allocation64_spill] sm:$0xff] }
 0x107   :  { %10827 = vst [vmem:[#allocation94_spill] sm:$0xff] %v8711_v63  ;;  %v8730_v22 = vpack.c.bf16 %v10836_v59, %v10835_v17  ;;  %v10838_v63 = vand.u32 4294901760, %v10799_v0  ;;  %v10851_v0 = vld [vmem:[#allocation59_spill] sm:$0xff]  ;;  %v10854_v17 = vand.u32 4294901760, %v8483_v45  ;;  %v10855_v59 = vand.u32 4294901760, %v10843_v30 }
 0x108   :  { %10834 = vst [vmem:[#allocation63_spill] sm:$0xff] %v8724_v6  ;;  %v10852_v5 = vand.u32 4294901760, %v10851_v0  ;;  %v10863_v0 = vand.u32 4294901760, %v10862_v44  ;;  %v10867_v30 = vand.u32 4294901760, %v8526_v54 }
 0x109   :  { %10837 = vst [vmem:[#allocation66_spill] sm:$0xff] %v8730_v22  ;;  %v8736_v4 = vpack.c.bf16 %v10839_v61, %v10838_v63  ;;  %v10844_v61 = vld [vmem:[#allocation45_spill] sm:$0xff]  ;;  %v8764_v9 = vpack.c.bf16 %v10855_v59, %v10854_v17  ;;  %v10857_v63 = vand.u32 4294901760, %v8508_v50  ;;  %v10868_v17 = vand.u32 4294901760, %v8531_v13 }
 0x10a   :  { %v10845_v10 = vand.u32 4294901760, %v10844_v61  ;;  %v8758_v47 = vpack.c.bf16 %v10852_v5, %v10850_v49  ;;  %v10858_v61 = vand.u32 4294901760, %v8513_v37  ;;  %v10864_v5 = vld [vmem:[#allocation67_spill] sm:$0xff] }
 0x10b   :  { %10840 = vst [vmem:[#allocation96_spill] sm:$0xff] %v8736_v4  ;;  %v10846_v4 = vld [vmem:[#allocation47_spill] sm:$0xff]  ;;  %10856 = vst [vmem:[#allocation45_spill] sm:$0xff] %v8764_v9  ;;  %v10865_v49 = vand.u32 4294901760, %v10864_v5  ;;  %v8784_v59 = vpack.c.bf16 %v10868_v17, %v10867_v30  ;;  %v10870_v9 = vand.u32 4294901760, %v8536_v58  ;;  %v10882_v30 = vand.u32 4294901760, %v8561_v11 }
 0x10c   :  { %v10847_v8 = vand.u32 4294901760, %v10846_v4  ;;  %10853 = vst [vmem:[#allocation14_spill] sm:$0xff] %v8758_v47  ;;  %v8770_v22 = vpack.c.bf16 %v10858_v61, %v10857_v63  ;;  %v10860_v4 = vld [vmem:[#allocation13_spill] sm:$0xff]  ;;  %v10871_v63 = vand.u32 4294901760, %v8546_v52  ;;  %v10894_v11 = vand.u32 4294901760, %v8578_v36  ;;  %v10907_v36 = vld [vmem:[#allocation22_spill] sm:$0xff] }
 0x10d   :  { %6662 = vmatpush1.bf16.msra.mxu1 %v10860_v4  ;;  %10869 = vst [vmem:[#allocation59_spill] sm:$0xff] %v8784_v59  ;;  %v10873_v4 = vld [vmem:[#allocation18_spill] sm:$0xff]  ;;  %v10884_v59 = vand.u32 4294901760, %v8568_v1 }
 0x10e   :  { %v8752_v42 = vpack.c.bf16 %v10847_v8, %v10845_v10  ;;  %10859 = vst [vmem:[#allocation47_spill] sm:$0xff] %v8770_v22  ;;  %v10861_v10 = vld [vmem:[#allocation12_spill] sm:$0xff]  ;;  %v8778_v8 = vpack.c.bf16 %v10865_v49, %v10863_v0  ;;  %v8790_v61 = vpack.c.bf16 %v10871_v63, %v10870_v9  ;;  %6808 = vmatprep.subr.bf16.mxu1 %v10873_v4  ;;  %v10875_v63 = vld [vmem:[#allocation15_spill] sm:$0xff]  ;;  %v10881_v49 = vand.u32 4294901760, %v8556_v53  ;;  %v10941_v53 = vld [vmem:[#allocation46_spill] sm:$0xff] }
 0x10f   :  { %6806 = vmatpush1.bf16.msra.mxu0 %v10861_v10  ;;  %v10874_v10 = vld [vmem:[#allocation26_spill] sm:$0xff]  ;;  %v10878_v22 = vld [vmem:[#allocation44_spill] sm:$0xff]  ;;  %v10885_v9 = vand.u32 4294901760, %v8573_v34 }
 0x110   :  { %10848 = vst [vmem:[#allocation11_spill] sm:$0xff] %v8752_v42  ;;  %10866 = vst [vmem:[#allocation51_spill] sm:$0xff] %v8778_v8  ;;  %6952 = vmatprep.subr.bf16.mxu0 %v10874_v10  ;;  %1659 = vmatmul.mubr.f32.vlgmr.msra.gmra.mrb[2].mxu1 %v10875_v63  ;;  %v10879_v0 = vand.u32 4294901760, %v10878_v22  ;;  %v8814_v5 = vpack.c.bf16 %v10882_v30, %v10881_v49  ;;  %v10887_v4 = vld [vmem:[#allocation36_spill] sm:$0xff]  ;;  %v10895_v49 = vand.u32 4294901760, %v8586_v57  ;;  %v10908_v57 = vand.u32 4294901760, %v10907_v36 }
 0x111   :  { %10872 = vst [vmem:[#allocation13_spill] sm:$0xff] %v8790_v61  ;;  %v10876_v61 = vld [vmem:[#allocation41_spill] sm:$0xff]  ;;  %v8820_v17 = vpack.c.bf16 %v10885_v9, %v10884_v59  ;;  %6810 = vmatpush1.bf16.msra.mxu1 %v10887_v4  ;;  %v10898_v59 = vand.u32 4294901760, %v8724_v6  ;;  %v10912_v6 = vand.u32 4294901760, %v8260_v27  ;;  %2504 = vmatprep.mubr.f32.mxu1 %v10508_v62 }
 0x112   :  { %2410 = vmatmul.mubr.f32.vlgmr.msra.gmra.mrb[2].mxu0 %v10875_v63  ;;  %v10877_v44 = vand.u32 4294901760, %v10876_v61  ;;  %10883 = vst [vmem:[#allocation64_spill] sm:$0xff] %v8814_v5  ;;  %v10888_v63 = vld [vmem:[#allocation48_spill] sm:$0xff]  ;;  %v10889_v61 = vld [vmem:[#allocation50_spill] sm:$0xff]  ;;  %v8834_v30 = vpack.c.bf16 %v10895_v49, %v10894_v11  ;;  %v10897_v5 = vand.u32 4294901760, %v8591_v60  ;;  %v10909_v11 = vld [vmem:[#allocation23_spill] sm:$0xff] }
 0x113   :  { %10886 = vst [vmem:[#allocation67_spill] sm:$0xff] %v8820_v17  ;;  %6954 = vmatpush1.bf16.msra.mxu0 %v10888_v63  ;;  %v10890_v22 = vand.u32 4294901760, %v10889_v61  ;;  %v10900_v17 = vld [vmem:[#allocation57_spill] sm:$0xff]  ;;  %v10901_v63 = vld [vmem:[#allocation31_spill] sm:$0xff]  ;;  %v10902_v61 = vld [vmem:[#allocation62_spill] sm:$0xff]  ;;  %v10910_v49 = vand.u32 4294901760, %v10909_v11  ;;  %3255 = vmatprep.mubr.f32.mxu0 %v10508_v62 }
 0x114   :  { %v8808_v10 = vpack.c.bf16 %v10879_v0, %v10877_v44  ;;  %v10891_v44 = vld [vmem:[#allocation61_spill] sm:$0xff]  ;;  %10896 = vst [vmem:[#allocation44_spill] sm:$0xff] %v8834_v30  ;;  %v8840_v9 = vpack.c.bf16 %v10898_v59, %v10897_v5  ;;  %6812 = vmatprep.subr.bf16.mxu1 %v10900_v17  ;;  %6956 = vmatprep.subr.bf16.mxu0 %v10901_v63  ;;  %v10913_v59 = vand.u32 4294901760, %v8262_v15  ;;  %v10921_v63 = vld [vmem:[#allocation27_spill] sm:$0xff]  ;;  %v10926_v60 = vand.u32 4294901760, %v8272_v51 }
 0x115   :  { %v10892_v0 = vand.u32 4294901760, %v10891_v44  ;;  %v10903_v44 = vand.u32 4294901760, %v10902_v61  ;;  %v8854_v30 = vpack.c.bf16 %v10910_v49, %v10908_v57  ;;  %v2519_v5 = vsub.f32 %v8260_v27, %v10912_v6  ;;  %v10918_v49 = vld [vmem:[#allocation25_spill] sm:$0xff] }
 0x116   :  { %10880 = vst [vmem:[#allocation12_spill] sm:$0xff] %v8808_v10  ;;  %10899 = vst [vmem:[#allocation50_spill] sm:$0xff] %v8840_v9  ;;  %v2531_v61 = vsub.f32 %v8262_v15, %v10913_v59  ;;  %v10919_v6 = vand.u32 4294901760, %v10918_v49  ;;  %v10922_v17 = vand.u32 4294901760, %v10921_v63  ;;  %v10923_v27 = vld [vmem:[#allocation29_spill] sm:$0xff]  ;;  %v10931_v49 = vld [vmem:[#allocation32_spill] sm:$0xff] }
 0x117   :  { %v8828_v52 = vpack.c.bf16 %v10892_v0, %v10890_v22  ;;  %v10904_v22 = vld [vmem:[#allocation65_spill] sm:$0xff]  ;;  %10911 = vst [vmem:[#allocation62_spill] sm:$0xff] %v8854_v30  ;;  %v10924_v59 = vand.u32 4294901760, %v10923_v27  ;;  %6958 = vmatpush1.bf16.msra.mxu0 %v8752_v42  ;;  %v10932_v63 = vand.u32 4294901760, %v10931_v49  ;;  %v10934_v27 = vld [vmem:[#allocation35_spill] sm:$0xff] }
 0x118   :  { %v10905_v0 = vand.u32 4294901760, %v10904_v22  ;;  %v10915_v22 = vand.u32 4294901760, %v8268_v23  ;;  %6960 = vmatprep.subr.bf16.mxu0 %v8778_v8  ;;  %v2532_v8 = vand.u32 4294901760, %v2531_v61 }
 0x119   :  { %10893 = vst [vmem:[#allocation41_spill] sm:$0xff] %v8828_v52  ;;  %v8880_v15 = vpack.c.bf16 %v10924_v59, %v10922_v17  ;;  %v10935_v17 = vand.u32 4294901760, %v10934_v27  ;;  %v10936_v59 = vld [vmem:[#allocation38_spill] sm:$0xff]  ;;  %v10949_v27 = vld [vmem:[#allocation72_spill] sm:$0xff] }
 0x11a   :  { %v8848_v4 = vpack.c.bf16 %v10905_v0, %v10903_v44  ;;  %v10914_v44 = vand.u32 4294901760, %v8266_v55  ;;  %v3282_v57 = vsub.f32 %v8268_v23, %v10915_v22  ;;  %v10916_v0 = vld [vmem:[#allocation24_spill] sm:$0xff]  ;;  %v10928_v23 = vld [vmem:[#allocation53_spill] sm:$0xff]  ;;  %v10937_v34 = vand.u32 4294901760, %v10936_v59 }
 0x11b   :  { %v10917_v11 = vand.u32 4294901760, %v10916_v0  ;;  %10925 = vst [vmem:[#allocation22_spill] sm:$0xff] %v8880_v15  ;;  %6814 = vmatpush1.bf16.msra.mxu1 %v10928_v23  ;;  %v10929_v0 = vld [vmem:[#allocation30_spill] sm:$0xff]  ;;  %v10950_v59 = vand.u32 4294901760, %v10949_v27  ;;  %6962 = vmatpush1.bf16.msra.mxu0 %v8828_v52 }
 0x11c   :  { %10906 = vst [vmem:[#allocation61_spill] sm:$0xff] %v8848_v4  ;;  %v3270_v36 = vsub.f32 %v8266_v55, %v10914_v44  ;;  %v2525_v44 = vsub.f32 %v8272_v51, %v10926_v60  ;;  %v10927_v55 = vand.u32 4294901760, %v8274_v38  ;;  %v8900_v1 = vpack.c.bf16 %v10937_v34, %v10935_v17  ;;  %v10939_v60 = vld [vmem:[#allocation43_spill] sm:$0xff]  ;;  %6816 = vmatprep.subr.bf16.mxu1 %v8758_v47 }
 0x11d   :  { %v8874_v9 = vpack.c.bf16 %v10919_v6, %v10917_v11  ;;  %v10930_v11 = vand.u32 4294901760, %v10929_v0  ;;  %v10940_v51 = vand.u32 4294901760, %v10939_v60  ;;  %v10944_v0 = vld [vmem:[#allocation49_spill] sm:$0xff]  ;;  %v10951_v34 = vand.u32 4294901760, %v8487_v18  ;;  %6964 = vmatprep.subr.bf16.mxu0 %v8854_v30 }
 0x11e   :  { %v2537_v22 = vsub.f32 %v8274_v38, %v10927_v55  ;;  %10938 = vst [vmem:[#allocation24_spill] sm:$0xff] %v8900_v1  ;;  %v10942_v55 = vand.u32 4294901760, %v10941_v53  ;;  %v10945_v49 = vand.u32 4294901760, %v10944_v0  ;;  %v10953_v53 = vand.u32 4294901760, %v8497_v48 }
 0x11f   :  { %10920 = vst [vmem:[#allocation65_spill] sm:$0xff] %v8874_v9  ;;  %v8894_v6 = vpack.c.bf16 %v10932_v63, %v10930_v11  ;;  %v10946_v11 = vld [vmem:[#allocation71_spill] sm:$0xff]  ;;  %v8920_v17 = vpack.c.bf16 %v10951_v34, %v10950_v59  ;;  %v2520_v47 = vand.u32 4294901760, %v2519_v5  ;;  %v3271_v23 = vand.u32 4294901760, %v3270_v36  ;;  %6818 = vmatpush1.bf16.msra.mxu1 %v8808_v10  ;;  %6966 = vmatpush1.bf16.msra.mxu0 %v8880_v15  ;;  %v10996_v15 = vld [vmem:[#allocation74_spill] sm:$0xff] }
 0x120   :  { %v8906_v38 = vpack.c.bf16 %v10942_v55, %v10940_v51  ;;  %v10947_v63 = vand.u32 4294901760, %v10946_v11  ;;  %v10954_v51 = vld [vmem:[#allocation75_spill] sm:$0xff]  ;;  %v3283_v0 = vand.u32 4294901760, %v3282_v57  ;;  %v10957_v11 = vand.u32 4294901760, %v8284_v26  ;;  %6820 = vmatprep.subr.bf16.mxu1 %v8848_v4  ;;  %6968 = vmatprep.subr.bf16.mxu0 %v8900_v1 }
 0x121   :  { %10933 = vst [vmem:[#allocation23_spill] sm:$0xff] %v8894_v6  ;;  %10952 = vst [vmem:[#allocation29_spill] sm:$0xff] %v8920_v17  ;;  %v10955_v60 = vand.u32 4294901760, %v10954_v51  ;;  %v2538_v27 = vand.u32 4294901760, %v2537_v22  ;;  %v10958_v18 = vand.u32 4294901760, %v8290_v31  ;;  %v10959_v48 = vand.u32 4294901760, %v8294_v56 }
 0x122   :  { %10943 = vst [vmem:[#allocation25_spill] sm:$0xff] %v8906_v38  ;;  %v8914_v42 = vpack.c.bf16 %v10947_v63, %v10945_v49  ;;  %v3276_v49 = vsub.f32 %v8284_v26, %v10957_v11  ;;  %v2526_v63 = vand.u32 4294901760, %v2525_v44  ;;  %v10960_v5 = vand.u32 4294901760, %v8298_v2 }
 0x123   :  { %v8926_v55 = vpack.c.bf16 %v10955_v60, %v10953_v53  ;;  %v3288_v59 = vsub.f32 %v8290_v31, %v10958_v18  ;;  %v2543_v34 = vsub.f32 %v8294_v56, %v10959_v48  ;;  %v10961_v36 = vand.u32 4294901760, %v8300_v25  ;;  %6822 = vmatpush1.bf16.msra.mxu1 %v8874_v9 }
 0x124   :  { %10948 = vst [vmem:[#allocation27_spill] sm:$0xff] %v8914_v42  ;;  %v2555_v61 = vsub.f32 %v8298_v2, %v10960_v5  ;;  %v10962_v44 = vand.u32 4294901760, %v8310_v40  ;;  %v10963_v53 = vand.u32 4294901760, %v8312_v7  ;;  %v10964_v60 = vand.u32 4294901760, %v8325_v33  ;;  %6824 = vmatprep.subr.bf16.mxu1 %v8894_v6  ;;  %6970 = vmatpush1.bf16.msra.mxu0 %v8914_v42 }
 0x125   :  { %10956 = vst [vmem:[#allocation30_spill] sm:$0xff] %v8926_v55  ;;  %v3294_v57 = vsub.f32 %v8300_v25, %v10961_v36  ;;  %v10965_v18 = vand.u32 4294901760, %v8330_v29  ;;  %v10966_v5 = vand.u32 4294901760, %v8501_v20  ;;  %v10967_v36 = vld [vmem:[#allocation77_spill] sm:$0xff]  ;;  %v10970_v30 = vand.u32 4294901760, %v8519_v12  ;;  %6972 = vmatprep.subr.bf16.mxu0 %v8926_v55 }
 0x126   :  { %v3306_v22 = vsub.f32 %v8310_v40, %v10962_v44  ;;  %v2549_v51 = vsub.f32 %v8312_v7, %v10963_v53  ;;  %v2561_v11 = vsub.f32 %v8325_v33, %v10964_v60  ;;  %v10968_v44 = vand.u32 4294901760, %v10967_v36 }
 0x127   :  { %v3300_v48 = vsub.f32 %v8330_v29, %v10965_v18  ;;  %v10971_v4 = vand.u32 4294901760, %v8539_v46  ;;  %v3277_v53 = vand.u32 4294901760, %v3276_v49  ;;  %v10973_v7 = vand.u32 4294901760, %v8342_v41  ;;  %6826 = vmatpush1.bf16.msra.mxu1 %v8906_v38 }
 0x128   :  { %v8963_v52 = vpack.c.bf16 %v10968_v44, %v10966_v5  ;;  %v6831_v33 = vpack.c.bf16 %v2532_v8, %v2520_v47  ;;  %v6975_v40 = vpack.c.bf16 %v3283_v0, %v3271_v23  ;;  %v6833_v18 = vpack.c.bf16 %v2538_v27, %v2526_v63  ;;  %6828 = vmatprep.subr.bf16.mxu1 %v8920_v17 }
 0x129   :  { %v8969_v10 = vpack.c.bf16 %v10971_v4, %v10970_v30  ;;  %v3312_v60 = vsub.f32 %v8342_v41, %v10973_v7  ;;  %v3289_v29 = vand.u32 4294901760, %v3288_v59  ;;  %v2544_v20 = vand.u32 4294901760, %v2543_v34 }
 0x12a   :  { %10969 = vst [vmem:[#allocation32_spill] sm:$0xff] %v8963_v52  ;;  %v2556_v5 = vand.u32 4294901760, %v2555_v61  ;;  %v3295_v12 = vand.u32 4294901760, %v3294_v57  ;;  %v3307_v36 = vand.u32 4294901760, %v3306_v22  ;;  %v2550_v46 = vand.u32 4294901760, %v2549_v51 }
 0x12b   :  { %10972 = vst [vmem:[#allocation35_spill] sm:$0xff] %v8969_v10  ;;  %v2562_v4 = vand.u32 4294901760, %v2561_v11  ;;  %v3301_v30 = vand.u32 4294901760, %v3300_v48  ;;  %v10974_v7 = vand.u32 4294901760, %v8347_v43  ;;  %v3313_v47 = vand.u32 4294901760, %v3312_v60  ;;  %6830 = vmatpush1.bf16.msra.mxu1 %v8963_v52  ;;  %6974 = vmatpush1.bf16.msra.mxu0 %v8969_v10  ;;  %v10993_v10 = vld [vmem:[#allocation73_spill] sm:$0xff] }
 0x12c   :  { %v10975_v8 = vand.u32 4294901760, %v8356_v16  ;;  %v10976_v49 = vand.u32 4294901760, %v8368_v35  ;;  %v10977_v27 = vand.u32 4294901760, %v8373_v28  ;;  %v6977_v34 = vpack.c.bf16 %v3289_v29, %v3277_v53  ;;  %6832 = vmatprep.subr.bf16.mxu1 %v6831_v33  ;;  %6976 = vmatprep.subr.bf16.mxu0 %v6975_v40  ;;  %v10998_v33 = vld [vmem:[#allocation21_spill] sm:$0xff] }
 0x12d   :  { %v2567_v23 = vsub.f32 %v8347_v43, %v10974_v7  ;;  %v10978_v61 = vand.u32 4294901760, %v8388_v24  ;;  %v10979_v22 = vand.u32 4294901760, %v8393_v19  ;;  %v10980_v11 = vand.u32 4294901760, %v8398_v21 }
 0x12e   :  { %v2579_v0 = vsub.f32 %v8356_v16, %v10975_v8  ;;  %v3318_v63 = vsub.f32 %v8368_v35, %v10976_v49  ;;  %v3330_v59 = vsub.f32 %v8373_v28, %v10977_v27  ;;  %v6835_v44 = vpack.c.bf16 %v2556_v5, %v2544_v20  ;;  %2510 = vmatmul.mubr.f32.vlgmr.msra.gmra.mrb[4].mxu1 %v10998_v33 }
 0x12f   :  { %v2573_v57 = vsub.f32 %v8388_v24, %v10978_v61  ;;  %v2585_v51 = vsub.f32 %v8393_v19, %v10979_v22  ;;  %v3324_v48 = vsub.f32 %v8398_v21, %v10980_v11  ;;  %v6979_v60 = vpack.c.bf16 %v3307_v36, %v3295_v12  ;;  %3261 = vmatmul.mubr.f32.vlgmr.msra.gmra.mrb[4].mxu0 %v10998_v33 }
 0x130   :  { %v10981_v29 = vand.u32 4294901760, %v8410_v39  ;;  %v6837_v7 = vpack.c.bf16 %v2562_v4, %v2550_v46  ;;  %v2568_v8 = vand.u32 4294901760, %v2567_v23  ;;  %v10982_v49 = vand.u32 4294901760, %v8415_v32  ;;  %v10985_v23 = vld [vmem:[#allocation40_spill] sm:$0xff]  ;;  %6834 = vmatpush1.bf16.msra.mxu1 %v6833_v18  ;;  %6978 = vmatpush1.bf16.msra.mxu0 %v6977_v34 }
 0x131   :  { %v10983_v61 = vand.u32 4294901760, %v8424_v14  ;;  %v6981_v20 = vpack.c.bf16 %v3313_v47, %v3301_v30  ;;  %v2580_v5 = vand.u32 4294901760, %v2579_v0  ;;  %v3319_v12 = vand.u32 4294901760, %v3318_v63  ;;  %v10987_v30 = vld [vmem:[#allocation68_spill] sm:$0xff]  ;;  %v10989_v63 = vld [vmem:[#allocation69_spill] sm:$0xff]  ;;  %6836 = vmatprep.subr.bf16.mxu1 %v6835_v44  ;;  %6980 = vmatprep.subr.bf16.mxu0 %v6979_v60 }
 0x132   :  { %v3336_v53 = vsub.f32 %v8410_v39, %v10981_v29  ;;  %v2591_v27 = vsub.f32 %v8415_v32, %v10982_v49  ;;  %v3331_v36 = vand.u32 4294901760, %v3330_v59  ;;  %v2574_v11 = vand.u32 4294901760, %v2573_v57  ;;  %2700 = vmatprep.mubr.f32.mxu1 %v10508_v62  ;;  %3451 = vmatprep.mubr.f32.mxu0 %v10508_v62 }
 0x133   :  { %v2603_v22 = vsub.f32 %v8424_v14, %v10983_v61  ;;  %v2586_v29 = vand.u32 4294901760, %v2585_v51  ;;  %v3325_v42 = vand.u32 4294901760, %v3324_v48  ;;  %v10984_v17 = vand.u32 4294901760, %v8436_v3  ;;  %v10991_v48 = vld [vmem:[#allocation70_spill] sm:$0xff] }
 0x134   :  { %v3337_v4 = vand.u32 4294901760, %v3336_v53  ;;  %v10986_v49 = vand.u32 4294901760, %v10985_v23  ;;  %v10988_v47 = vand.u32 4294901760, %v10987_v30  ;;  %v10990_v59 = vand.u32 4294901760, %v10989_v63  ;;  %6838 = vmatpush1.bf16.msra.mxu1 %v6837_v7  ;;  %6982 = vmatpush1.bf16.msra.mxu0 %v6981_v20 }
 0x135   :  { %v3342_v46 = vsub.f32 %v8436_v3, %v10984_v17  ;;  %v2592_v17 = vand.u32 4294901760, %v2591_v27  ;;  %v2604_v51 = vand.u32 4294901760, %v2603_v22  ;;  %v10992_v52 = vand.u32 4294901760, %v10991_v48 }
 0x136   :  { %v3354_v61 = vsub.f32 %v10985_v23, %v10986_v49  ;;  %v2597_v0 = vsub.f32 %v10987_v30, %v10988_v47  ;;  %v2609_v57 = vsub.f32 %v10989_v63, %v10990_v59  ;;  %v10994_v55 = vand.u32 4294901760, %v10993_v10 }
 0x137   :  { %v3348_v53 = vsub.f32 %v10991_v48, %v10992_v52  ;;  %v6839_v38 = vpack.c.bf16 %v2580_v5, %v2568_v8  ;;  %v6983_v1 = vpack.c.bf16 %v3331_v36, %v3319_v12  ;;  %v10995_v47 = vand.u32 4294901760, %v8483_v45 }
 0x138   :  { %v3360_v49 = vsub.f32 %v10993_v10, %v10994_v55  ;;  %v10997_v59 = vand.u32 4294901760, %v10996_v15  ;;  %v6841_v27 = vpack.c.bf16 %v2586_v29, %v2574_v11  ;;  %v10999_v52 = vand.u32 4294901760, %v8508_v50 }
 0x139   :  { %v2615_v6 = vsub.f32 %v8483_v45, %v10995_v47  ;;  %v11000_v55 = vand.u32 4294901760, %v8513_v37  ;;  %v3343_v5 = vand.u32 4294901760, %v3342_v46  ;;  %v3355_v12 = vand.u32 4294901760, %v3354_v61  ;;  %6840 = vmatprep.subr.bf16.mxu1 %v6839_v38  ;;  %6984 = vmatprep.subr.bf16.mxu0 %v6983_v1  ;;  %v11014_v1 = vld [vmem:[#allocation83_spill] sm:$0xff] }
 0x13a   :  { %v2627_v40 = vsub.f32 %v10996_v15, %v10997_v59  ;;  %v3366_v22 = vsub.f32 %v8508_v50, %v10999_v52  ;;  %v2598_v36 = vand.u32 4294901760, %v2597_v0  ;;  %v2610_v47 = vand.u32 4294901760, %v2609_v57  ;;  %v11006_v57 = vld [vmem:[#allocation79_spill] sm:$0xff]  ;;  %6842 = vmatpush1.bf16.msra.mxu1 %v6841_v27 }
 0x13b   :  { %v3378_v8 = vsub.f32 %v8513_v37, %v11000_v55  ;;  %v6985_v59 = vpack.c.bf16 %v3337_v4, %v3325_v42  ;;  %v6843_v9 = vpack.c.bf16 %v2604_v51, %v2592_v17  ;;  %v3349_v33 = vand.u32 4294901760, %v3348_v53  ;;  %v11008_v53 = vld [vmem:[#allocation80_spill] sm:$0xff] }
 0x13c   :  { %v3361_v11 = vand.u32 4294901760, %v3360_v49  ;;  %v2616_v29 = vand.u32 4294901760, %v2615_v6  ;;  %v2628_v15 = vand.u32 4294901760, %v2627_v40  ;;  %v11001_v52 = vand.u32 4294901760, %v8526_v54  ;;  %v11004_v6 = vld [vmem:[#allocation78_spill] sm:$0xff] }
 0x13d   :  { %v11002_v55 = vand.u32 4294901760, %v8531_v13  ;;  %v3367_v34 = vand.u32 4294901760, %v3366_v22  ;;  %v3379_v44 = vand.u32 4294901760, %v3378_v8  ;;  %v11003_v42 = vand.u32 4294901760, %v8536_v58  ;;  %v11010_v22 = vld [vmem:[#allocation81_spill] sm:$0xff]  ;;  %6986 = vmatpush1.bf16.msra.mxu0 %v6985_v59  ;;  %6844 = vmatprep.subr.bf16.mxu1 %v6843_v9 }
 0x13e   :  { %v2621_v50 = vsub.f32 %v8526_v54, %v11001_v52  ;;  %v11005_v46 = vand.u32 4294901760, %v11004_v6  ;;  %v6987_v61 = vpack.c.bf16 %v3355_v12, %v3343_v5  ;;  %v6845_v0 = vpack.c.bf16 %v2610_v47, %v2598_v36 }
 0x13f   :  { %v2633_v18 = vsub.f32 %v8531_v13, %v11002_v55  ;;  %v3372_v60 = vsub.f32 %v8536_v58, %v11003_v42  ;;  %v11007_v17 = vand.u32 4294901760, %v11006_v57  ;;  %v11009_v49 = vand.u32 4294901760, %v11008_v53  ;;  %v11012_v55 = vld [vmem:[#allocation82_spill] sm:$0xff] }
 0x140   :  { %v3384_v4 = vsub.f32 %v11004_v6, %v11005_v46  ;;  %v11011_v8 = vand.u32 4294901760, %v11010_v22  ;;  %v11013_v42 = vand.u32 4294901760, %v11012_v55  ;;  %v6989_v20 = vpack.c.bf16 %v3361_v11, %v3349_v33  ;;  %6988 = vmatprep.subr.bf16.mxu0 %v6987_v61  ;;  %6846 = vmatpush1.bf16.msra.mxu1 %v6845_v0  ;;  %v11025_v0 = vld [vmem:[#allocation34_spill] sm:$0xff] }
 0x141   :  { %v2639_v51 = vsub.f32 %v11006_v57, %v11007_v17  ;;  %v2651_v40 = vsub.f32 %v11008_v53, %v11009_v49  ;;  %v6847_v5 = vpack.c.bf16 %v2628_v15, %v2616_v29  ;;  %v2622_v12 = vand.u32 4294901760, %v2621_v50  ;;  %v11016_v49 = vld [vmem:[#allocation84_spill] sm:$0xff]  ;;  %v11020_v15 = vld [vmem:[#allocation63_spill] sm:$0xff] }
 0x142   :  { %v3390_v52 = vsub.f32 %v11010_v22, %v11011_v8  ;;  %v3402_v7 = vsub.f32 %v11012_v55, %v11013_v42  ;;  %v2634_v36 = vand.u32 4294901760, %v2633_v18  ;;  %v6991_v47 = vpack.c.bf16 %v3379_v44, %v3367_v34  ;;  %v11018_v22 = vld [vmem:[#allocation85_spill] sm:$0xff]  ;;  %6990 = vmatpush1.bf16.msra.mxu0 %v6989_v20 }
 0x143   :  { %v3373_v46 = vand.u32 4294901760, %v3372_v60  ;;  %v3385_v38 = vand.u32 4294901760, %v3384_v4  ;;  %v11015_v17 = vand.u32 4294901760, %v11014_v1  ;;  %v11017_v53 = vand.u32 4294901760, %v11016_v49  ;;  %6848 = vmatprep.subr.bf16.mxu1 %v6847_v5 }
 0x144   :  { %v11019_v6 = vand.u32 4294901760, %v11018_v22  ;;  %v11021_v50 = vand.u32 4294901760, %v11020_v15  ;;  %v2640_v29 = vand.u32 4294901760, %v2639_v51  ;;  %v2652_v18 = vand.u32 4294901760, %v2651_v40  ;;  %6992 = vmatprep.subr.bf16.mxu0 %v6991_v47  ;;  %v11022_v51 = vld [vmem:[#allocation17_spill] sm:$0xff]  ;;  %v11023_v40 = vld [vmem:[#allocation16_spill] sm:$0xff] }
 0x145   :  { %v2645_v57 = vsub.f32 %v11014_v1, %v11015_v17  ;;  %v2657_v8 = vsub.f32 %v11016_v49, %v11017_v53  ;;  %v3391_v34 = vand.u32 4294901760, %v3390_v52  ;;  %v3403_v44 = vand.u32 4294901760, %v3402_v7  ;;  %v11024_v7 = vld [vmem:[#allocation28_spill] sm:$0xff] }
 0x146   :  { %v3396_v33 = vsub.f32 %v11018_v22, %v11019_v6  ;;  %v3408_v11 = vsub.f32 %v11020_v15, %v11021_v50  ;;  %v6849_v27 = vpack.c.bf16 %v2634_v36, %v2622_v12  ;;  %v6993_v59 = vpack.c.bf16 %v3385_v38, %v3373_v46  ;;  %v11027_v12 = vld [vmem:[#allocation42_spill] sm:$0xff]  ;;  %v11028_v46 = vld [vmem:[#allocation33_spill] sm:$0xff] }
 0x147   :  { %v2646_v60 = vand.u32 4294901760, %v2645_v57  ;;  %v2658_v4 = vand.u32 4294901760, %v2657_v8  ;;  %v6851_v6 = vpack.c.bf16 %v2652_v18, %v2640_v29  ;;  %v6995_v17 = vpack.c.bf16 %v3403_v44, %v3391_v34  ;;  %v11026_v57 = vld [vmem:[#allocation37_spill] sm:$0xff]  ;;  %v11029_v8 = vld [vmem:[#allocation15_spill] sm:$0xff]  ;;  %v11031_v50 = vld [vmem:[#allocation54_spill] sm:$0xff] }
 0x148   :  { %v3397_v53 = vand.u32 4294901760, %v3396_v33  ;;  %v3409_v42 = vand.u32 4294901760, %v3408_v11  ;;  %6850 = vmatpush1.bf16.msra.mxu1 %v6849_v27  ;;  %6994 = vmatpush1.bf16.msra.mxu0 %v6993_v59  ;;  %v6855_v52 = vpack.c.bf16 %v11023_v40, %v11022_v51  ;;  %v6999_v20 = vpack.c.bf16 %v11025_v0, %v11024_v7  ;;  %v11030_v33 = vld [vmem:[#allocation39_spill] sm:$0xff]  ;;  %v11032_v29 = vld [vmem:[#allocation56_spill] sm:$0xff]  ;;  %v11046_v0 = vld [vmem:[#allocation53_spill] sm:$0xff] }
 0x149   :  { %v6853_v9 = vpack.c.bf16 %v2658_v4, %v2646_v60  ;;  %6852 = vmatprep.subr.bf16.mxu1 %v6851_v6  ;;  %6996 = vmatprep.subr.bf16.mxu0 %v6995_v17  ;;  %v6857_v5 = vpack.c.bf16 %v11027_v12, %v11026_v57  ;;  %v7001_v36 = vpack.c.bf16 %v8290_v31, %v8284_v26  ;;  %v11041_v27 = vld [vmem:[#allocation19_spill] sm:$0xff]  ;;  %v11044_v17 = vld [vmem:[#allocation57_spill] sm:$0xff]  ;;  %v11048_v57 = vld [vmem:[#allocation14_spill] sm:$0xff] }
 0x14a   :  { %v6997_v61 = vpack.c.bf16 %v3409_v42, %v3397_v53  ;;  %v6859_v47 = vpack.c.bf16 %v8298_v2, %v8294_v56  ;;  %v7003_v38 = vpack.c.bf16 %v11028_v46, %v8300_v25  ;;  %v6861_v11 = vpack.c.bf16 %v11031_v50, %v11030_v33  ;;  %v11042_v53 = vld [vmem:[#allocation36_spill] sm:$0xff]  ;;  %v11049_v12 = vld [vmem:[#allocation51_spill] sm:$0xff] }
 0x14b   :  { %v7005_v26 = vpack.c.bf16 %v8342_v41, %v11032_v29  ;;  %v6863_v31 = vpack.c.bf16 %v8356_v16, %v8347_v43  ;;  %v7007_v56 = vpack.c.bf16 %v8373_v28, %v8368_v35  ;;  %v6865_v2 = vpack.c.bf16 %v8393_v19, %v8388_v24  ;;  %v11033_v24 = vld [vmem:[#allocation74_spill] sm:$0xff]  ;;  %v11034_v16 = vld [vmem:[#allocation76_spill] sm:$0xff] }
 0x14c   :  { %6854 = vmatpush1.bf16.msra.mxu1 %v6853_v9  ;;  %6998 = vmatpush1.bf16.msra.mxu0 %v6997_v61  ;;  %v7009_v25 = vpack.c.bf16 %v8410_v39, %v8398_v21  ;;  %v6867_v41 = vpack.c.bf16 %v8424_v14, %v8415_v32  ;;  %v7011_v28 = vpack.c.bf16 %v10985_v23, %v8436_v3  ;;  %v11035_v39 = vld [vmem:[#allocation78_spill] sm:$0xff]  ;;  %v11036_v14 = vld [vmem:[#allocation79_spill] sm:$0xff]  ;;  %v11043_v42 = vld [vmem:[#allocation48_spill] sm:$0xff] }
 0x14d   :  { %6856 = vmatprep.subr.bf16.mxu1 %v6855_v52  ;;  %7000 = vmatprep.subr.bf16.mxu0 %v6999_v20  ;;  %v6869_v43 = vpack.c.bf16 %v10989_v63, %v10987_v30  ;;  %v7013_v35 = vpack.c.bf16 %v10993_v10, %v10991_v48  ;;  %v6871_v21 = vpack.c.bf16 %v11033_v24, %v8483_v45  ;;  %v11037_v10 = vld [vmem:[#allocation80_spill] sm:$0xff]  ;;  %v11038_v30 = vld [vmem:[#allocation81_spill] sm:$0xff]  ;;  %v11045_v9 = vld [vmem:[#allocation31_spill] sm:$0xff] }
 0x14e   :  { %v7015_v19 = vpack.c.bf16 %v8513_v37, %v11034_v16  ;;  %v6873_v3 = vpack.c.bf16 %v8531_v13, %v8526_v54  ;;  %v7017_v32 = vpack.c.bf16 %v11035_v39, %v8536_v58  ;;  %v6875_v23 = vpack.c.bf16 %v11037_v10, %v11036_v14  ;;  %v571_v54 = vpop.f32.mrb[0].mxu1  ;;  %v909_v58 = vpop.f32.mrb[0].mxu0  ;;  %v11047_v20 = vld [vmem:[#allocation11_spill] sm:$0xff]  ;;  %v11050_v50 = vld [vmem:[#allocation12_spill] sm:$0xff] }
 0x14f   :  { %2702 = vmatmul.mubr.f32.vlgmr.msra.gmra.mrb[4].mxu1 %v11029_v8  ;;  %3453 = vmatmul.mubr.f32.vlgmr.msra.gmra.mrb[4].mxu0 %v11029_v8  ;;  %v7019_v63 = vpack.c.bf16 %v11012_v55, %v11038_v30  ;;  %v6877_v45 = vpack.c.bf16 %v11016_v49, %v11014_v1  ;;  %v7021_v37 = vpack.c.bf16 %v11020_v15, %v11018_v22  ;;  %v573_v48 = vpop.f32.mrb[1].mxu1  ;;  %v911_v18 = vpop.f32.mrb[1].mxu0  ;;  %v11039_v1 = vld [vmem:[#allocation18_spill] sm:$0xff]  ;;  %v7340_v30 = vmov 1326507024  }
 0x150   :  { %6858 = vmatpush1.bf16.msra.mxu1 %v6857_v5  ;;  %7002 = vmatpush1.bf16.msra.mxu0 %v7001_v36  ;;  %v9136_v13 = vadd.f32 %v909_v58, %v571_v54  ;;  %v9138_v34 = vadd.f32 %v911_v18, %v573_v48  ;;  %v11040_v49 = vld [vmem:[#allocation26_spill] sm:$0xff] }
 0x151   :  { %6860 = vmatprep.subr.bf16.mxu1 %v6859_v47  ;;  %7004 = vmatprep.subr.bf16.mxu0 %v7003_v38 }
 0x152   :  { %2820 = vmatprep.mubr.f32.mxu1 %v10508_v62  ;;  %3571 = vmatprep.mubr.f32.mxu0 %v10508_v62  ;;  %v4129_v55 = vand.u32 2147483647, %v9136_v13  ;;  %v4132_v44 = vand.u32 2139095040, %v9136_v13  ;;  %v4236_v22 = vand.u32 2139095040, %v9138_v34  ;;  %v4233_v60 = vand.u32 2147483647, %v9138_v34 }
 0x154   :  { %6862 = vmatpush1.bf16.msra.mxu1 %v6861_v11  ;;  %7006 = vmatpush1.bf16.msra.mxu0 %v7005_v26  ;;  %v4133_v15 = vshrl.u32 %v4132_v44, 23  ;;  %v4136_v59 = vand.u32 8388607, %v4129_v55  ;;  %v4237_v4 = vshrl.u32 %v4236_v22, 23  ;;  %v9158_v52 = vand.u32 8388607, %v4233_v60 }
 0x155   :  { %6864 = vmatprep.subr.bf16.mxu1 %v6863_v31  ;;  %7008 = vmatprep.subr.bf16.mxu0 %v7007_v56  ;;  %v11051_v11 = vld [vmem:[#allocation41_spill] sm:$0xff]  ;;  %v7335_v26 = vmov 683565275   ;;  %v11056_v44 = vld [vmem:[#allocation23_spill] sm:$0xff]  ;;  %v11057_v22 = vld [vmem:[#allocation24_spill] sm:$0xff] }
 0x156   :  { %v6295_v6 = vadd.s32 4294967169, %v4133_v15  ;;  %v6299_v61 = vadd.s32 4294967169, %v4237_v4  ;;  %v4137_v40 = vor.u32 8388608, %v4136_v59  ;;  %v4241_v33 = vor.u32 8388608, %v9158_v52 }
 0x158   :  { %6866 = vmatpush1.bf16.msra.mxu1 %v6865_v2  ;;  %7010 = vmatpush1.bf16.msra.mxu0 %v7009_v25  ;;  %v4139_v51 = vadd.s32 1, %v6295_v6  ;;  %v4243_v7 = vadd.s32 1, %v6299_v61  ;;  %v9164_v38 = vshll.u32 %v4137_v40, 8  ;;  %v11052_v25 = vld [vmem:[#allocation61_spill] sm:$0xff] }
 0x159   :  { %6868 = vmatprep.subr.bf16.mxu1 %v6867_v41  ;;  %7012 = vmatprep.subr.bf16.mxu0 %v7011_v28  ;;  %v11053_v41 = vld [vmem:[#allocation62_spill] sm:$0xff]  ;;  %v7336_v28 = vmov 2475754826  }
 0x15a   :  { %vm4140_vm1 = vcmp.gt.s32.totalorder %v4139_v51, 0  ;;  %vm4244_vm2 = vcmp.gt.s32.totalorder %v4243_v7, 0 }
 0x15b   :  { %v4141_v5 = vsel %vm4140_vm1, %v4139_v51, 0  ;;  %v4245_v46 = vsel %vm4244_vm2, %v4243_v7, 0  ;;  %vm4131_vm2 = vcmp.lt.s32.totalorder %v9136_v13, 0 }
 0x15c   :  { %6870 = vmatpush1.bf16.msra.mxu1 %v6869_v43  ;;  %7014 = vmatpush1.bf16.msra.mxu0 %v7013_v35  ;;  %v4142_v36 = vshrl.u32 %v4141_v5, 5  ;;  %v4143_v47 = vand.u32 31, %v4141_v5  ;;  %v9170_v56 = vshrl.u32 %v4245_v46, 5  ;;  %v9172_v2 = vand.u32 31, %v4245_v46  ;;  %v11059_v46 = vld [vmem:[#allocation27_spill] sm:$0xff] }
 0x15d   :  { %6872 = vmatprep.subr.bf16.mxu1 %v6871_v21  ;;  %7016 = vmatprep.subr.bf16.mxu0 %v7015_v19  ;;  %v7337_v35 = vmov 2131351028   ;;  %v7338_v21 = vmov 2102212464   ;;  %v7339_v19 = vmov 920167782  }
 0x15e   :  { %v4144_v29 = vsub.s32 32, %v4143_v47  ;;  %v4146_v31 = vshll.u32 %v7335_v26, %v4143_v47  ;;  %v4149_v43 = vshll.u32 %v7336_v28, %v4143_v47  ;;  %v4152_v24 = vshll.u32 %v7337_v35, %v4143_v47 }
 0x15f   :  { %v4155_v16 = vshll.u32 %v7338_v21, %v4143_v47  ;;  %vm4161_vm3 = vcmp.lt.s32.totalorder %v4142_v36, 1  ;;  %vm4162_vm4 = vcmp.lt.s32.totalorder %v4142_v36, 2  ;;  %v4248_v18 = vsub.s32 32, %v9172_v2 }
 0x160   :  { %6874 = vmatpush1.bf16.msra.mxu1 %v6873_v3  ;;  %7018 = vmatpush1.bf16.msra.mxu0 %v7017_v32  ;;  %v4158_v3 = vshll.u32 %v7339_v19, %v4143_v47  ;;  %v4147_v39 = vshrl.u32 %v7336_v28, %v4144_v29  ;;  %v4150_v32 = vshrl.u32 %v7337_v35, %v4144_v29  ;;  %vm4163_vm5 = vcmp.lt.s32.totalorder %v4142_v36, 3  ;;  %v11058_v47 = vld [vmem:[#allocation25_spill] sm:$0xff] }
 0x161   :  { %6876 = vmatprep.subr.bf16.mxu1 %v6875_v23  ;;  %7020 = vmatprep.subr.bf16.mxu0 %v7019_v63  ;;  %v4153_v14 = vshrl.u32 %v7338_v21, %v4144_v29  ;;  %v4145_v10 = vshrl.u32 %v7335_v26, %v4144_v29  ;;  %v4156_v23 = vshrl.u32 %v7339_v19, %v4144_v29  ;;  %vm4164_vm6 = vcmp.lt.s32.totalorder %v4142_v36, 4 }
 0x162   :  { %v4159_v63 = vshrl.u32 %v7340_v30, %v4144_v29  ;;  %v4148_v54 = vor.u32 %v4147_v39, %v4146_v31  ;;  %v4151_v58 = vor.u32 %v4150_v32, %v4149_v43  ;;  %v4250_v5 = vshll.u32 %v7335_v26, %v9172_v2 }
 0x163   :  { %v4154_v48 = vor.u32 %v4153_v14, %v4152_v24  ;;  %v4157_v15 = vor.u32 %v4156_v23, %v4155_v16  ;;  %v4251_v43 = vshrl.u32 %v7336_v28, %v4248_v18  ;;  %v4253_v24 = vshll.u32 %v7336_v28, %v9172_v2  ;;  %v11060_v16 = vld [vmem:[#allocation29_spill] sm:$0xff] }
 0x164   :  { %6878 = vmatpush1.bf16.msra.mxu1 %v6877_v45  ;;  %7022 = vmatpush1.bf16.msra.mxu0 %v7021_v37  ;;  %v11054_v45 = vld [vmem:[#allocation65_spill] sm:$0xff]  ;;  %v11055_v37 = vld [vmem:[#allocation22_spill] sm:$0xff]  ;;  %v4165_v59 = vsel %vm4161_vm3, %v4145_v10, %v4148_v54  ;;  %v4169_v6 = vsel %vm4161_vm3, %v4148_v54, %v4151_v58  ;;  %v4254_v14 = vshrl.u32 %v7337_v35, %v4248_v18  ;;  %vm4265_vm8 = vcmp.lt.s32.totalorder %v9170_v56, 1 }
 0x165   :  { %6880 = vmatprep.subr.bf16.mxu1 %v11039_v1  ;;  %7024 = vmatprep.subr.bf16.mxu0 %v11040_v49  ;;  %v4166_v4 = vsel %vm4164_vm6, %v4154_v48, 2102212464  ;;  %v4173_v61 = vsel %vm4161_vm3, %v4151_v58, %v4154_v48  ;;  %v4170_v40 = vsel %vm4164_vm6, %v4157_v15, 920167782  ;;  %v11061_v10 = vld [vmem:[#allocation30_spill] sm:$0xff]  ;;  %v4257_v36 = vshrl.u32 %v7338_v21, %v4248_v18 }
 0x166   :  { %v4167_v51 = vsel %vm4163_vm5, %v4151_v58, %v4166_v4  ;;  %v4171_v29 = vsel %vm4163_vm5, %v4154_v48, %v4170_v40  ;;  %v4252_v48 = vor.u32 %v4251_v43, %v4250_v5  ;;  %v4249_v4 = vshrl.u32 %v7335_v26, %v4248_v18  ;;  %v11063_v40 = vld [vmem:[#allocation35_spill] sm:$0xff]  ;;  %v11064_v43 = vld [vmem:[#allocation86_spill] sm:$0xff] }
 0x167   :  { %2823 = vmatmul.mubr.f32.vlgmr.msra.gmra.mrb[4].mxu1 %v11041_v27  ;;  %3574 = vmatmul.mubr.f32.vlgmr.msra.gmra.mrb[4].mxu0 %v11041_v27  ;;  %v4160_v27 = vor.u32 %v4159_v63, %v4158_v3  ;;  %v4168_v3 = vsel %vm4162_vm4, %v4165_v59, %v4167_v51  ;;  %v4172_v39 = vsel %vm4162_vm4, %v4169_v6, %v4171_v29  ;;  %v11062_v59 = vld [vmem:[#allocation32_spill] sm:$0xff]  ;;  %vm4267_vm9 = vcmp.lt.s32.totalorder %v9170_v56, 3 }
 0x168   :  { %6882 = vmatpush1.bf16.msra.mxu1 %v11042_v53  ;;  %7026 = vmatpush1.bf16.msra.mxu0 %v11043_v42  ;;  %v9212_v54 = vmul.u32.u64.low %v9164_v38, %v4172_v39  ;;  %v9213_v58 = vmul.u32.u64.high %v9164_v38, %v4172_v39, %v9212_v54  ;;  %v4259_v6 = vshll.u32 %v7338_v21, %v9172_v2  ;;  %v4263_v51 = vshrl.u32 %v7340_v30, %v4248_v18 }
 0x169   :  { %6884 = vmatprep.subr.bf16.mxu1 %v11044_v17  ;;  %7028 = vmatprep.subr.bf16.mxu0 %v11045_v9  ;;  %v4174_v7 = vsel %vm4164_vm6, %v4160_v27, 1326507024  ;;  %v4256_v27 = vshll.u32 %v7337_v35, %v9172_v2  ;;  %v4262_v29 = vshll.u32 %v7339_v19, %v9172_v2  ;;  %vm4268_vm10 = vcmp.lt.s32.totalorder %v9170_v56, 4 }
 0x16a   :  { %2917 = vmatprep.mubr.f32.mxu1 %v10508_v62  ;;  %3668 = vmatprep.mubr.f32.mxu0 %v10508_v62  ;;  %v4175_v31 = vsel %vm4163_vm5, %v4157_v15, %v4174_v7  ;;  %v4255_v15 = vor.u32 %v4254_v14, %v4253_v24  ;;  %v4184_v7 = vmul.u32 %v9164_v38, %v4168_v3  ;;  %v11065_v24 = vld [vmem:[#allocation52_spill] sm:$0xff]  ;;  %vm4266_vm11 = vcmp.lt.s32.totalorder %v9170_v56, 2 }
 0x16b   :  { %v4176_v32 = vsel %vm4162_vm4, %v4173_v61, %v4175_v31  ;;  %v4260_v61 = vshrl.u32 %v7339_v19, %v4248_v18  ;;  %v4258_v5 = vor.u32 %v4257_v36, %v4256_v27  ;;  %v4281_v31 = vshll.u32 %v4241_v33, 8  ;;  %v11067_v33 = vld [vmem:[#allocation55_spill] sm:$0xff]  ;;  %v11069_v36 = vld [vmem:[#allocation58_spill] sm:$0xff] }
 0x16c   :  { %6886 = vmatpush1.bf16.msra.mxu1 %v11046_v0  ;;  %7030 = vmatpush1.bf16.msra.mxu0 %v11047_v20  ;;  %v9208_v23 = vmul.u32.u64.low %v9164_v38, %v4176_v32  ;;  %v9209_v63 = vmul.u32.u64.high %v9164_v38, %v4176_v32, %v9208_v23  ;;  %v4187_v18 = vadd.s32 1, %v9213_v58  ;;  %v11066_v38 = vld [vmem:[#allocation20_spill] sm:$0xff]  ;;  %v4264_v3 = vor.u32 %v4263_v51, %v4262_v29  ;;  %v11068_v27 = vld [vmem:[#allocation87_spill] sm:$0xff] }
 0x16d   :  { %6888 = vmatprep.subr.bf16.mxu1 %v11048_v57  ;;  %7032 = vmatprep.subr.bf16.mxu0 %v11049_v12  ;;  %v4261_v39 = vor.u32 %v4260_v61, %v4259_v6  ;;  %v4273_v52 = vsel %vm4265_vm8, %v4252_v48, %v4255_v15  ;;  %v4270_v32 = vsel %vm4268_vm10, %v4258_v5, 2102212464  ;;  %v4277_v23 = vsel %vm4265_vm8, %v4255_v15, %v4258_v5  ;;  %v11070_v29 = vld [vmem:[#allocation60_spill] sm:$0xff] }
 0x16e   :  { %vm4186_vm7 = vc.u32 %v9209_v63, %v9212_v54  ;;  %v4278_v51 = vsel %vm4268_vm10, %v4264_v3, 1326507024  ;;  %vm4130_vm3 = vcmp.le.f32.partialorder %v4129_v55, 0.7853982 }
 0x16f   :  { %v4188_v2 = vsel %vm4186_vm7, %v4187_v18, %v9213_v58  ;;  %v4274_v14 = vsel %vm4268_vm10, %v4261_v39, 920167782  ;;  %v4269_v58 = vsel %vm4265_vm8, %v4249_v4, %v4252_v48  ;;  %v11071_v48 = vld [vmem:[#allocation88_spill] sm:$0xff]  ;;  %v3918_v4 = vlaneseq }
 0x170   :  { %6890 = vmatpush1.bf16.msra.mxu1 %v11050_v50  ;;  %7034 = vmatpush1.bf16.msra.mxu0 %v11051_v11  ;;  %v4189_v6 = vadd.s32 %v4188_v2, %v4184_v7  ;;  %v4275_v61 = vsel %vm4267_vm9, %v4258_v5, %v4274_v14  ;;  %v4279_v7 = vsel %vm4267_vm9, %v4261_v39, %v4278_v51  ;;  %v11073_v2 = vld [vmem:[#allocation90_spill] sm:$0xff]  ;;  %v11074_v14 = vld [vmem:[#allocation91_spill] sm:$0xff]  ;;  %vm4235_vm7 = vcmp.lt.s32.totalorder %v9138_v34, 0 }
 0x171   :  { %6892 = vmatprep.subr.bf16.mxu1 %v11052_v25  ;;  %7036 = vmatprep.subr.bf16.mxu0 %v11053_v41  ;;  %v4280_v18 = vsel %vm4266_vm11, %v4277_v23, %v4279_v7  ;;  %vm4234_vm8 = vcmp.le.f32.partialorder %v4233_v60, 0.7853982 }
 0x172   :  { %v4190_v5 = vadd.s32 536870912, %v4189_v6 }
 0x174   :  { %6894 = vmatpush1.bf16.msra.mxu1 %v11054_v45  ;;  %7038 = vmatpush1.bf16.msra.mxu0 %v11055_v37  ;;  %v9275_v39 = vshrl.u32 %v4190_v5, 30 }
 0x175   :  { %6896 = vmatprep.subr.bf16.mxu1 %v11056_v44  ;;  %7040 = vmatprep.subr.bf16.mxu0 %v11057_v22 }
 0x176   :  { %v4192_v23 = vshll.u32 %v9275_v39, 30 }
 0x178   :  { %6898 = vmatpush1.bf16.msra.mxu1 %v11058_v47  ;;  %7042 = vmatpush1.bf16.msra.mxu0 %v11059_v46  ;;  %v4193_v56 = vsub.s32 %v4189_v6, %v4192_v23 }
 0x179   :  { %6900 = vmatprep.subr.bf16.mxu1 %v11060_v16  ;;  %7044 = vmatprep.subr.bf16.mxu0 %v11061_v10 }
 0x17a   :  { %v4195_v5 = vsub.s32 0, %v4193_v56 }
 0x17c   :  { %6902 = vmatpush1.bf16.msra.mxu1 %v11062_v59  ;;  %7046 = vmatpush1.bf16.msra.mxu0 %v11063_v40 }
 0x17d   :  { %6904 = vmatprep.subr.bf16.mxu1 %v11064_v43  ;;  %7048 = vmatprep.subr.bf16.mxu0 %v11065_v24  ;;  %v4271_v43 = vsel %vm4267_vm9, %v4255_v15, %v4270_v32  ;;  %v4276_v24 = vsel %vm4266_vm11, %v4273_v52, %v4275_v61  ;;  %v11072_v52 = vld [vmem:[#allocation89_spill] sm:$0xff]  ;;  %v9283_v61 = vand.u32 127, %v3918_v4 }
 0x17e   :  { %v4272_v32 = vsel %vm4266_vm11, %v4269_v58, %v4271_v43  ;;  %v11078_v43 = vld [vmem:[#allocation95_spill] sm:$0xff] }
 0x17f   :  { %2921 = vmatmul.mubr.f32.vlgmr.msra.gmra.mrb[4].mxu1 %v11066_v38  ;;  %3672 = vmatmul.mubr.f32.vlgmr.msra.gmra.mrb[4].mxu0 %v11066_v38  ;;  %v9265_v38 = vmul.u32.u64.low %v4281_v31, %v4276_v24  ;;  %v9266_v3 = vmul.u32.u64.high %v4281_v31, %v4276_v24, %v9265_v38  ;;  %v4288_v51 = vmul.u32 %v4281_v31, %v4272_v32  ;;  %v11077_v24 = vld [vmem:[#allocation94_spill] sm:$0xff]  ;;  %v11082_v32 = vld [vmem:[#allocation47_spill] sm:$0xff]  ;;  %v9303_v23 = vadd.s32 128, %v9283_v61 }
 0x180   :  { %6906 = vmatpush1.bf16.msra.mxu1 %v11067_v33  ;;  %7050 = vmatpush1.bf16.msra.mxu0 %v11068_v27  ;;  %v9270_v15 = vmul.u32.u64.low %v4281_v31, %v4280_v18  ;;  %v9271_v33 = vmul.u32.u64.high %v4281_v31, %v4280_v18, %v9270_v15  ;;  %v11079_v18 = vld [vmem:[#allocation66_spill] sm:$0xff] }
 0x181   :  { %6908 = vmatprep.subr.bf16.mxu1 %v11069_v36  ;;  %7052 = vmatprep.subr.bf16.mxu0 %v11070_v29  ;;  %v4291_v27 = vadd.s32 1, %v9266_v3  ;;  %v11075_v36 = vld [vmem:[#allocation92_spill] sm:$0xff]  ;;  %v11076_v29 = vld [vmem:[#allocation93_spill] sm:$0xff] }
 0x182   :  { %3063 = vmatprep.mubr.f32.mxu1 %v10508_v62  ;;  %3814 = vmatprep.mubr.f32.mxu0 %v10508_v62  ;;  %vm4290_vm12 = vc.u32 %v9271_v33, %v9265_v38  ;;  %v11080_v15 = vld [vmem:[#allocation96_spill] sm:$0xff] }
 0x183   :  { %v4292_v58 = vsel %vm4290_vm12, %v4291_v27, %v9266_v3 }
 0x184   :  { %6910 = vmatpush1.bf16.msra.mxu1 %v11071_v48  ;;  %7054 = vmatpush1.bf16.msra.mxu0 %v11072_v52  ;;  %v4293_v7 = vadd.s32 %v4292_v58, %v4288_v51  ;;  %v9293_v48 = vmul.u32.u64.low 3524075730, %v9283_v61  ;;  %v9294_v4 = vmul.u32.u64.high 3524075730, %v9283_v61, %v9293_v48  ;;  %v11081_v52 = vld [vmem:[#allocation45_spill] sm:$0xff]  ;;  %v11085_v51 = vld [vmem:[#allocation64_spill] sm:$0xff] }
 0x185   :  { %6912 = vmatprep.subr.bf16.mxu1 %v11073_v2  ;;  %7056 = vmatprep.subr.bf16.mxu0 %v11074_v14  ;;  %v6296_v2 = vmin.u32 %v4195_v5, %v4193_v56  ;;  %v11083_v14 = vld [vmem:[#allocation59_spill] sm:$0xff] }
 0x186   :  { %v4294_v31 = vadd.s32 536870912, %v4293_v7  ;;  %vm3935_vm13 = vc.u32 %v9293_v48, 3524075730 }
 0x187   :  { %v4197_v3 = vclz %v6296_v2  ;;  %v11088_v2 = vld [vmem:[#allocation50_spill] sm:$0xff] }
 0x188   :  { %6914 = vmatpush1.bf16.msra.mxu1 %v11075_v36  ;;  %7058 = vmatpush1.bf16.msra.mxu0 %v11076_v29  ;;  %v9299_v6 = vshrl.u32 %v4294_v31, 30  ;;  %v11084_v36 = vld [vmem:[#allocation13_spill] sm:$0xff] }
 0x189   :  { %6916 = vmatprep.subr.bf16.mxu1 %v11077_v24  ;;  %7060 = vmatprep.subr.bf16.mxu0 %v11078_v43  ;;  %v6297_v29 = vadd.s32 4294967294, %v4197_v3  ;;  %v11086_v24 = vld [vmem:[#allocation67_spill] sm:$0xff]  ;;  %v7341_v43 = vmov 0  }
 0x18a   :  { %v4296_v27 = vshll.u32 %v9299_v6, 30  ;;  %v3936_v5 = vsel %vm3935_vm13, 1, %v7341_v43 }
 0x18b   :  { %vm6298_vm14 = vcmp.lt.s32.totalorder %v6297_v29, 0 }
 0x18c   :  { %6918 = vmatpush1.bf16.msra.mxu1 %v11079_v18  ;;  %7062 = vmatpush1.bf16.msra.mxu0 %v11080_v15  ;;  %v4297_v58 = vsub.s32 %v4293_v7, %v4296_v27  ;;  %v11087_v18 = vld [vmem:[#allocation44_spill] sm:$0xff]  ;;  %v4200_v48 = vsel %vm6298_vm14, 0, %v6297_v29  ;;  %v9312_v31 = vmul.u32.u64.low 3524075730, %v9303_v23  ;;  %v9313_v15 = vmul.u32.u64.high 3524075730, %v9303_v23, %v9312_v31 }
 0x18d   :  { %6920 = vmatprep.subr.bf16.mxu1 %v11081_v52  ;;  %7064 = vmatprep.subr.bf16.mxu0 %v11082_v32  ;;  %v4185_v32 = vadd.s32 %v9212_v54, %v9209_v63  ;;  %v4201_v7 = vsub.s32 32, %v4200_v48  ;;  %v4205_v3 = vsub.s32 4294967266, %v4200_v48 }
 0x18e   :  { %v4299_v52 = vsub.s32 0, %v4297_v58  ;;  %vm3949_vm15 = vc.u32 %v9312_v31, 3524075730 }
 0x18f   :  { %v4206_v29 = vadd.s32 127, %v4205_v3 }
 0x190   :  { %6922 = vmatpush1.bf16.msra.mxu1 %v11083_v14  ;;  %7066 = vmatpush1.bf16.msra.mxu0 %v11084_v36  ;;  %v3937_v14 = vadd.s32 %v9294_v4, %v3936_v5  ;;  %v6300_v27 = vmin.u32 %v4299_v52, %v4297_v58  ;;  %v4202_v36 = vshll.u32 %v4193_v56, %v4200_v48 }
 0x191   :  { %6924 = vmatprep.subr.bf16.mxu1 %v11085_v51  ;;  %7068 = vmatprep.subr.bf16.mxu0 %v11086_v24  ;;  %v4203_v51 = vshrl.u32 %v4185_v32, %v4201_v7  ;;  %v4207_v54 = vshll.u32 %v4206_v29, 23  ;;  %v4289_v5 = vadd.s32 %v9265_v38, %v9271_v33  ;;  %v4319_v7 = vsub.s32 4, %v9299_v6 }
 0x193   :  { %v4204_v63 = vor.u32 %v4203_v51, %v4202_v36  ;;  %v4208_v4 = vor.u32 4788187, %v4207_v54 }
 0x194   :  { %6926 = vmatpush1.bf16.msra.mxu1 %v11087_v18  ;;  %7070 = vmatpush1.bf16.msra.mxu0 %v11088_v2 }
 0x195   :  { %6928 = vmatprep.subr.bf16.mxu1 %v11039_v1  ;;  %7072 = vmatprep.subr.bf16.mxu0 %v11040_v49  ;;  %v4301_v1 = vclz %v6300_v27  ;;  %v3938_v49 = vshrl.u32 %v3937_v14, 5 }
 0x197   :  { %3065 = vmatmul.mubr.f32.vlgmr.msra.gmra.mrb[4].mxu1 %v11029_v8  ;;  %3816 = vmatmul.mubr.f32.vlgmr.msra.gmra.mrb[4].mxu0 %v11029_v8  ;;  %v6301_v56 = vadd.s32 4294967294, %v4301_v1 }
 0x198   :  { %6930 = vmatpush1.bf16.msra.mxu1 %v11042_v53  ;;  %7074 = vmatpush1.bf16.msra.mxu0 %v11043_v42  ;;  %v3950_v53 = vsel %vm3949_vm15, 1, %v7341_v43  ;;  %v4209_v42 = vand.u32 2147483647, %v4208_v4 }
 0x199   :  { %6932 = vmatprep.subr.bf16.mxu1 %v11044_v17  ;;  %7076 = vmatprep.subr.bf16.mxu0 %v11045_v9  ;;  %vm6302_vm1 = vcmp.lt.s32.totalorder %v6301_v56, 0  ;;  %v4211_v17 = vcvt.s32.f32 %v4204_v63  ;;  %v3939_v9 = vmul.u32 39, %v3938_v49  ;;  %v3951_v31 = vadd.s32 %v9313_v15, %v3950_v53 }
 0x19a   :  { %3159 = vmatprep.mubr.f32.mxu1 %v10508_v62  ;;  %3910 = vmatprep.mubr.f32.mxu0 %v10508_v62  ;;  %v4304_v24 = vsel %vm6302_vm1, 0, %v6301_v56 }
 0x19b   :  { %v4305_v62 = vsub.s32 32, %v4304_v24  ;;  %v4309_v18 = vsub.s32 4294967266, %v4304_v24  ;;  %v4212_v48 = vmul.f32 %v4211_v17, %v4209_v42  ;;  %v3940_v38 = vsub.s32 %v9283_v61, %v3939_v9 }
 0x19c   :  { %6934 = vmatpush1.bf16.msra.mxu1 %v11046_v0  ;;  %7078 = vmatpush1.bf16.msra.mxu0 %v11047_v20  ;;  %v4215_v0 = vsub.s32 4, %v9275_v39  ;;  %v4306_v20 = vshll.u32 %v4297_v58, %v4304_v24  ;;  %v3952_v15 = vshrl.u32 %v3951_v31, 5 }
 0x19d   :  { %6936 = vmatprep.subr.bf16.mxu1 %v11048_v57  ;;  %7080 = vmatprep.subr.bf16.mxu0 %v11049_v12  ;;  %v4307_v57 = vshrl.u32 %v4289_v5, %v4305_v62  ;;  %v4310_v52 = vadd.s32 127, %v4309_v18  ;;  %v4213_v12 = vxor.u32 2147483648, %v4212_v48  ;;  %vm4069_vm4 = vcmp.ne.s32.totalorder %v3940_v38, 0 }
 0x19e   :  { %v4216_v58 = vsel %vm4131_vm2, %v4215_v0, %v9275_v39  ;;  %vm4079_vm5 = vcmp.lt.s32.totalorder %v3940_v38, 0  ;;  %v3953_v39 = vmul.u32 39, %v3952_v15 }
 0x19f   :  { %v4308_v33 = vor.u32 %v4307_v57, %v4306_v20  ;;  %v4311_v2 = vshll.u32 %v4310_v52, 23  ;;  %vm4089_vm6 = vmand %vm4079_vm5, %vm4069_vm4  ;;  %vm4221_vm4 = vweird.f32 %v9136_v13 }
 0x1a0   :  { %6938 = vmatpush1.bf16.msra.mxu1 %v11050_v50  ;;  %7082 = vmatpush1.bf16.msra.mxu0 %v11051_v11  ;;  %v4214_v50 = vsel %vm4131_vm2, %v4213_v12, %v4212_v48  ;;  %v3954_v3 = vsub.s32 %v9303_v23, %v3953_v39 }
 0x1a1   :  { %6940 = vmatprep.subr.bf16.mxu1 %v11052_v25  ;;  %7084 = vmatprep.subr.bf16.mxu0 %v11053_v41  ;;  %v4217_v11 = vsel %vm4130_vm3, %v9136_v13, %v4214_v50  ;;  %v4312_v25 = vor.u32 4788187, %v4311_v2  ;;  %v4218_v41 = vsel %vm4130_vm3, 0, %v4216_v58  ;;  %v4315_v55 = vcvt.s32.f32 %v4308_v33 }
 0x1a2   :  { %7218 = vcosq.f32 %v4217_v11  ;;  %v5272_v27 = vand.u32 3, %v4218_v41  ;;  %vm4070_vm9 = vcmp.ne.s32.totalorder %v3954_v3, 0  ;;  %vm4080_vm11 = vcmp.lt.s32.totalorder %v3954_v3, 0 }
 0x1a3   :  { %7220 = vsinq.f32 %v4217_v11  ;;  %v4313_v32 = vand.u32 2147483647, %v4312_v25  ;;  %vm4090_vm5 = vmand %vm4080_vm11, %vm4070_vm9  ;;  %v3921_v50 = vadd.s32 256, %v9283_v61  ;;  %v9381_v25 = vadd.s32 512, %v9283_v61 }
 0x1a4   :  { %6942 = vmatpush1.bf16.msra.mxu1 %v11054_v45  ;;  %7086 = vmatpush1.bf16.msra.mxu0 %v11055_v37  ;;  %v4099_v37 = vadd.s32 39, %v3940_v38  ;;  %vm5274_vm13 = vcmp.eq.s32.totalorder %v5272_v27, 0  ;;  %vm5277_vm14 = vcmp.eq.s32.totalorder %v5272_v27, 2  ;;  %vm5273_vm2 = vcmp.lt.s32.totalorder %v5272_v27, 2 }
 0x1a5   :  { %6944 = vmatprep.subr.bf16.mxu1 %v11056_v44  ;;  %7088 = vmatprep.subr.bf16.mxu0 %v11057_v22  ;;  %v4316_v45 = vmul.f32 %v4315_v55, %v4313_v32  ;;  %v4222_v44 = vadd.s32 3, %v4218_v41  ;;  %v9376_v58 = vmul.u32.u64.low 3524075730, %v3921_v50  ;;  %v9377_v15 = vmul.u32.u64.high 3524075730, %v3921_v50, %v9376_v58 }
 0x1a6   :  { %v9385_v32 = vmul.u32.u64.low 3524075730, %v9381_v25  ;;  %v9386_v55 = vmul.u32.u64.high 3524075730, %v9381_v25, %v9385_v32 }
 0x1a7   :  { %v4317_v22 = vxor.u32 2147483648, %v4316_v45  ;;  %v4223_v14 = vand.u32 3, %v4222_v44 }
 0x1a8   :  { %6946 = vmatpush1.bf16.msra.mxu1 %v11058_v47  ;;  %7090 = vmatpush1.bf16.msra.mxu0 %v11059_v46  ;;  %v4320_v46 = vsel %vm4235_vm7, %v4319_v7, %v9299_v6  ;;  %v4100_v6 = vadd.s32 39, %v3954_v3 }
 0x1a9   :  { %6948 = vmatprep.subr.bf16.mxu1 %v11060_v16  ;;  %7092 = vmatprep.subr.bf16.mxu0 %v11061_v10  ;;  %v4318_v47 = vsel %vm4235_vm7, %v4317_v22, %v4316_v45  ;;  %v4109_v16 = vsel %vm4089_vm6, %v4099_v37, %v3940_v38  ;;  %v4322_v36 = vsel %vm4234_vm8, 0, %v4320_v46  ;;  %vm4228_vm12 = vcmp.eq.s32.totalorder %v4223_v14, 2 }
 0x1aa   :  { %v4321_v10 = vsel %vm4234_vm8, %v9138_v34, %v4318_v47  ;;  %vm5169_vm10 = vcmp.lt.s32.totalorder %v4109_v16, 36  ;;  %vm4225_vm15 = vcmp.eq.s32.totalorder %v4223_v14, 0  ;;  %v4326_v1 = vadd.s32 3, %v4322_v36 }
 0x1ab   :  { %7222 = vcosq.f32 %v4321_v10  ;;  %vm4224_vm1 = vcmp.lt.s32.totalorder %v4223_v14, 2  ;;  %vm4119_vm3 = vcmp.lt.s32.totalorder %v4109_v16, 18  ;;  %v5375_v17 = vand.u32 3, %v4322_v36 }
 0x1ac   :  { %6950 = vmatpush1.bf16.msra.mxu1 %v11062_v59  ;;  %7094 = vmatpush1.bf16.msra.mxu0 %v11063_v40  ;;  %v7219_v23 = vpop.eup %7218  ;;  %7224 = vsinq.f32 %v4321_v10  ;;  %v4327_v42 = vand.u32 3, %v4326_v1  ;;  %v4110_v9 = vsel %vm4090_vm5, %v4100_v6, %v3954_v3 }
 0x1ad   :  { %v7221_v60 = vpop.eup %7220  ;;  %v4229_v59 = vxor.u32 2147483648, %v7219_v23  ;;  %vm5170_vm7 = vcmp.lt.s32.totalorder %v4110_v9, 36  ;;  %vm5380_vm8 = vcmp.eq.s32.totalorder %v5375_v17, 2  ;;  %vm5377_vm9 = vcmp.eq.s32.totalorder %v5375_v17, 0 }
 0x1ae   :  { %v4226_v40 = vxor.u32 2147483648, %v7221_v60  ;;  %vm4332_vm6 = vcmp.eq.s32.totalorder %v4327_v42, 2  ;;  %vm4328_vm11 = vcmp.lt.s32.totalorder %v4327_v42, 2 }
 0x1af   :  { %3161 = vmatmul.mubr.f32.vlgmr.msra.gmra.mrb[4].mxu1 %v11029_v8  ;;  %3912 = vmatmul.mubr.f32.vlgmr.msra.gmra.mrb[4].mxu0 %v11029_v8  ;;  %v4230_v51 = vsel %vm4228_vm12, %v4229_v59, %v7221_v60  ;;  %v5279_v29 = vsel %vm5277_vm14, %v4229_v59, %v7221_v60  ;;  %vm4329_vm12 = vcmp.eq.s32.totalorder %v4327_v42, 0  ;;  %vm4325_vm14 = vweird.f32 %v9138_v34 }
 0x1b0   :  { %v4227_v63 = vsel %vm4225_vm15, %v7219_v23, %v4226_v40  ;;  %v5276_v54 = vsel %vm5274_vm13, %v7219_v23, %v4226_v40  ;;  %vm5376_vm13 = vcmp.lt.s32.totalorder %v5375_v17, 2  ;;  %vm3963_vm15 = vc.u32 %v9376_v58, 3524075730 }
 0x1b1   :  { %v4231_v8 = vsel %vm4224_vm1, %v4227_v63, %v4230_v51  ;;  %v5280_v49 = vsel %vm5273_vm2, %v5276_v54, %v5279_v29  ;;  %v3964_v11 = vsel %vm3963_vm15, 1, %v7341_v43  ;;  %vm3991_vm1 = vc.u32 %v9385_v32, 3524075730 }
 0x1b2   :  { %v4232_v56 = vsel %vm4221_vm4, nan, %v4231_v8  ;;  %v5281_v4 = vsel %vm4221_vm4, nan, %v5280_v49  ;;  %v3965_v41 = vadd.s32 %v9377_v15, %v3964_v11  ;;  %v9406_v59 = vadd.s32 384, %v9283_v61 }
 0x1b3   :  { %v6229_v53 = vsel %vm5169_vm10, %v5281_v4, %v9136_v13  ;;  %vm4120_vm10 = vcmp.lt.s32.totalorder %v4110_v9, 18  ;;  %v3992_v51 = vsel %vm3991_vm1, 1, %v7341_v43 }
 0x1b4   :  { %v6259_v24 = vsel %vm4119_vm3, %v4232_v56, %v6229_v53  ;;  %v3966_v45 = vshrl.u32 %v3965_v41, 5  ;;  %v9412_v56 = vmul.u32.u64.low 3524075730, %v9406_v59  ;;  %v9413_v4 = vmul.u32.u64.high 3524075730, %v9406_v59, %v9412_v56 }
 0x1b5   :  { %v7223_v5 = vpop.eup %7222  ;;  %6269 = vst [vmem:[#allocation7] sm:$0xff] %v6259_v24  ;;  %v9417_v17 = vadd.s32 %v9386_v55, %v3992_v51 }
 0x1b6   :  { %v7225_v62 = vpop.eup %7224  ;;  %v4333_v18 = vxor.u32 2147483648, %v7223_v5  ;;  %v3967_v23 = vmul.u32 39, %v3966_v45  ;;  %vm3977_vm1 = vc.u32 %v9412_v56, 3524075730 }
 0x1b7   :  { %v4330_v48 = vxor.u32 2147483648, %v7225_v62 }
 0x1b8   :  { %v4334_v0 = vsel %vm4332_vm6, %v4333_v18, %v7225_v62  ;;  %v5382_v31 = vsel %vm5380_vm8, %v4333_v18, %v7225_v62  ;;  %v9409_v8 = vsub.s32 %v3921_v50, %v3967_v23 }
 0x1b9   :  { %v4331_v20 = vsel %vm4329_vm12, %v7223_v5, %v4330_v48  ;;  %v5379_v13 = vsel %vm5377_vm9, %v7223_v5, %v4330_v48 }
 0x1ba   :  { %v4335_v57 = vsel %vm4328_vm11, %v4331_v20, %v4334_v0  ;;  %v5383_v52 = vsel %vm5376_vm13, %v5379_v13, %v5382_v31  ;;  %vm4081_vm15 = vcmp.lt.s32.totalorder %v9409_v8, 0 }
 0x1bb   :  { %v4336_v12 = vsel %vm4325_vm14, nan, %v4335_v57  ;;  %v5384_v38 = vsel %vm4325_vm14, nan, %v5383_v52  ;;  %vm4071_vm14 = vcmp.ne.s32.totalorder %v9409_v8, 0 }
 0x1bc   :  { %v6230_v33 = vsel %vm5170_vm7, %v5384_v38, %v9138_v34 }
 0x1bd   :  { %v6260_v2 = vsel %vm4120_vm10, %v4336_v12, %v6230_v33 }
 0x1be   :  { %6270 = vst [vmem:[#allocation7 + $0x8] sm:$0xff] %v6260_v2 }
 0x1e3   :  { %v9388_v34 = vpop.f32.mrb[2].mxu1 }
 0x1e4   :  { %v4337_v7 = vand.u32 2147483647, %v9388_v34  ;;  %v4340_v37 = vand.u32 2139095040, %v9388_v34  ;;  %v9394_v44 = vpop.f32.mrb[3].mxu1 }
 0x1e5   :  { %v9390_v39 = vpop.f32.mrb[2].mxu0  ;;  %v4444_v10 = vand.u32 2139095040, %v9394_v44  ;;  %v4441_v62 = vand.u32 2147483647, %v9394_v44 }
 0x1e6   :  { %v9396_v22 = vpop.f32.mrb[3].mxu0  ;;  %v4545_v3 = vand.u32 2147483647, %v9390_v39  ;;  %v4548_v47 = vand.u32 2139095040, %v9390_v39  ;;  %v4341_v46 = vshrl.u32 %v4340_v37, 23 }
 0x1e7   :  { %v4344_v16 = vand.u32 8388607, %v4337_v7  ;;  %v4445_v6 = vshrl.u32 %v4444_v10, 23 }
 0x1e8   :  { %v4549_v14 = vshrl.u32 %v4548_v47, 23  ;;  %v4552_v27 = vand.u32 8388607, %v4545_v3  ;;  %v6303_v36 = vadd.s32 4294967169, %v4341_v46 }
 0x1e9   :  { %v4345_v29 = vor.u32 8388608, %v4344_v16  ;;  %v6307_v54 = vadd.s32 4294967169, %v4445_v6 }
 0x1ea   :  { %v6311_v60 = vadd.s32 4294967169, %v4549_v14  ;;  %v4347_v40 = vadd.s32 1, %v6303_v36  ;;  %v4553_v1 = vor.u32 8388608, %v4552_v27 }
 0x1eb   :  { %v9419_v9 = vshll.u32 %v4345_v29, 8  ;;  %v9424_v18 = vadd.s32 1, %v6307_v54 }
 0x1ec   :  { %v4555_v63 = vadd.s32 1, %v6311_v60  ;;  %vm4348_vm2 = vcmp.gt.s32.totalorder %v4347_v40, 0  ;;  %v9421_v5 = vshll.u32 %v4553_v1, 8 }
 0x1ed   :  { %v4349_v49 = vsel %vm4348_vm2, %v4347_v40, 0  ;;  %vm4452_vm8 = vcmp.gt.s32.totalorder %v9424_v18, 0 }
 0x1ee   :  { %vm4556_vm3 = vcmp.gt.s32.totalorder %v4555_v63, 0  ;;  %v4350_v53 = vshrl.u32 %v4349_v49, 5  ;;  %v4351_v42 = vand.u32 31, %v4349_v49 }
 0x1ef   :  { %v4557_v24 = vsel %vm4556_vm3, %v4555_v63, 0  ;;  %vm4091_vm3 = vmand %vm4081_vm15, %vm4071_vm14 }
 0x1f0   :  { %v4352_v48 = vsub.s32 32, %v4351_v42  ;;  %v4354_v0 = vshll.u32 %v7335_v26, %v4351_v42  ;;  %v9427_v31 = vshrl.u32 %v4557_v24, 5  ;;  %v4559_v20 = vand.u32 31, %v4557_v24 }
 0x1f1   :  { %v4357_v13 = vshll.u32 %v7336_v28, %v4351_v42  ;;  %v4360_v57 = vshll.u32 %v7337_v35, %v4351_v42  ;;  %v4363_v52 = vshll.u32 %v7338_v21, %v4351_v42  ;;  %v4366_v12 = vshll.u32 %v7339_v19, %v4351_v42 }
 0x1f2   :  { %v4355_v38 = vshrl.u32 %v7336_v28, %v4352_v48  ;;  %v4358_v33 = vshrl.u32 %v7337_v35, %v4352_v48  ;;  %v4361_v2 = vshrl.u32 %v7338_v21, %v4352_v48  ;;  %vm4369_vm4 = vcmp.lt.s32.totalorder %v4350_v53, 1 }
 0x1f3   :  { %v4353_v50 = vshrl.u32 %v7335_v26, %v4352_v48  ;;  %v4364_v58 = vshrl.u32 %v7339_v19, %v4352_v48  ;;  %v4367_v15 = vshrl.u32 %v7340_v30, %v4352_v48  ;;  %vm4370_vm5 = vcmp.lt.s32.totalorder %v4350_v53, 2 }
 0x1f4   :  { %v4356_v11 = vor.u32 %v4355_v38, %v4354_v0  ;;  %v4359_v41 = vor.u32 %v4358_v33, %v4357_v13  ;;  %v4362_v32 = vor.u32 %v4361_v2, %v4360_v57  ;;  %v4560_v55 = vsub.s32 32, %v4559_v20 }
 0x1f5   :  { %v4365_v45 = vor.u32 %v4364_v58, %v4363_v52  ;;  %v4368_v37 = vor.u32 %v4367_v15, %v4366_v12  ;;  %vm4371_vm6 = vcmp.lt.s32.totalorder %v4350_v53, 3  ;;  %vm4372_vm7 = vcmp.lt.s32.totalorder %v4350_v53, 4 }
 0x1f6   :  { %v4373_v47 = vsel %vm4369_vm4, %v4353_v50, %v4356_v11  ;;  %v4374_v46 = vsel %vm4372_vm7, %v4362_v32, 2102212464  ;;  %v4377_v16 = vsel %vm4369_vm4, %v4356_v11, %v4359_v41  ;;  %v4381_v14 = vsel %vm4369_vm4, %v4359_v41, %v4362_v32 }
 0x1f7   :  { %v4375_v27 = vsel %vm4371_vm6, %v4359_v41, %v4374_v46  ;;  %v4378_v10 = vsel %vm4372_vm7, %v4365_v45, 920167782  ;;  %v4382_v23 = vsel %vm4372_vm7, %v4368_v37, 1326507024  ;;  %v4562_v36 = vshll.u32 %v7335_v26, %v4559_v20 }
 0x1f8   :  { %v4379_v60 = vsel %vm4371_vm6, %v4362_v32, %v4378_v10  ;;  %v4383_v6 = vsel %vm4371_vm6, %v4365_v45, %v4382_v23  ;;  %v4563_v40 = vshrl.u32 %v7336_v28, %v4560_v55  ;;  %v4565_v51 = vshll.u32 %v7336_v28, %v4559_v20 }
 0x1f9   :  { %v4376_v29 = vsel %vm4370_vm5, %v4373_v47, %v4375_v27  ;;  %v4380_v1 = vsel %vm4370_vm5, %v4377_v16, %v4379_v60  ;;  %v4384_v63 = vsel %vm4370_vm5, %v4381_v14, %v4383_v6  ;;  %v4566_v54 = vshrl.u32 %v7337_v35, %v4560_v55 }
 0x1fa   :  { %v9451_v49 = vmul.u32.u64.low %v9419_v9, %v4384_v63  ;;  %v9452_v42 = vmul.u32.u64.high %v9419_v9, %v4384_v63, %v9451_v49  ;;  %v9455_v24 = vmul.u32.u64.low %v9419_v9, %v4380_v1  ;;  %v9456_v48 = vmul.u32.u64.high %v9419_v9, %v4380_v1, %v9455_v24 }
 0x1fb   :  { %v4564_v0 = vor.u32 %v4563_v40, %v4562_v36  ;;  %v4567_v13 = vor.u32 %v4566_v54, %v4565_v51  ;;  %v4568_v57 = vshll.u32 %v7337_v35, %v4559_v20  ;;  %v4569_v52 = vshrl.u32 %v7338_v21, %v4560_v55 }
 0x1fc   :  { %v4561_v53 = vshrl.u32 %v7335_v26, %v4560_v55  ;;  %v4571_v12 = vshll.u32 %v7338_v21, %v4559_v20  ;;  %v4572_v38 = vshrl.u32 %v7339_v19, %v4560_v55  ;;  %v4575_v33 = vshrl.u32 %v7340_v30, %v4560_v55 }
 0x1fd   :  { %v4392_v2 = vmul.u32 %v9419_v9, %v4376_v29  ;;  %v4570_v50 = vor.u32 %v4569_v52, %v4568_v57  ;;  %v4574_v58 = vshll.u32 %v7339_v19, %v4559_v20  ;;  %vm4577_vm12 = vcmp.lt.s32.totalorder %v9427_v31, 1 }
 0x1fe   :  { %vm4394_vm9 = vc.u32 %v9452_v42, %v9455_v24  ;;  %v4395_v15 = vadd.s32 1, %v9456_v48  ;;  %v4573_v11 = vor.u32 %v4572_v38, %v4571_v12  ;;  %vm4578_vm11 = vcmp.lt.s32.totalorder %v9427_v31, 2 }
 0x1ff   :  { %v4576_v41 = vor.u32 %v4575_v33, %v4574_v58  ;;  %vm4579_vm13 = vcmp.lt.s32.totalorder %v9427_v31, 3  ;;  %vm4580_vm10 = vcmp.lt.s32.totalorder %v9427_v31, 4  ;;  %v4585_v32 = vsel %vm4577_vm12, %v4564_v0, %v4567_v13 }
 0x200   :  { %v4396_v9 = vsel %vm4394_vm9, %v4395_v15, %v9456_v48  ;;  %v4582_v55 = vsel %vm4580_vm10, %v4570_v50, 2102212464  ;;  %v4586_v20 = vsel %vm4580_vm10, %v4573_v11, 920167782  ;;  %v4589_v45 = vsel %vm4577_vm12, %v4567_v13, %v4570_v50 }
 0x201   :  { %v4397_v37 = vadd.s32 %v4396_v9, %v4392_v2  ;;  %v4581_v47 = vsel %vm4577_vm12, %v4561_v53, %v4564_v0  ;;  %v4587_v46 = vsel %vm4579_vm13, %v4570_v50, %v4586_v20  ;;  %v4590_v16 = vsel %vm4580_vm10, %v4576_v41, 1326507024 }
 0x202   :  { %v4583_v14 = vsel %vm4579_vm13, %v4567_v13, %v4582_v55  ;;  %v4588_v27 = vsel %vm4578_vm11, %v4585_v32, %v4587_v46  ;;  %v4591_v10 = vsel %vm4579_vm13, %v4573_v11, %v4590_v16  ;;  %v4453_v23 = vsel %vm4452_vm8, %v9424_v18, 0 }
 0x203   :  { %v4398_v36 = vadd.s32 536870912, %v4397_v37  ;;  %v4592_v60 = vsel %vm4578_vm11, %v4589_v45, %v4591_v10  ;;  %v9483_v6 = vmul.u32.u64.low %v9421_v5, %v4588_v27  ;;  %v9484_v40 = vmul.u32.u64.high %v9421_v5, %v4588_v27, %v9483_v6 }
 0x204   :  { %v3994_v51 = vshrl.u32 %v9417_v17, 5  ;;  %v9489_v29 = vmul.u32.u64.low %v9421_v5, %v4592_v60  ;;  %v9490_v1 = vmul.u32.u64.high %v9421_v5, %v4592_v60, %v9489_v29  ;;  %v4584_v18 = vsel %vm4578_vm11, %v4581_v47, %v4583_v14 }
 0x205   :  { %v9493_v63 = vshrl.u32 %v4398_v36, 30  ;;  %v4448_v54 = vand.u32 8388607, %v4441_v62  ;;  %v4455_v49 = vand.u32 31, %v4453_v23  ;;  %v4652_v17 = vand.u32 2139095040, %v9396_v22 }
 0x206   :  { %v4603_v0 = vadd.s32 1, %v9484_v40  ;;  %v4101_v13 = vadd.s32 39, %v9409_v8  ;;  %v3995_v57 = vmul.u32 39, %v3994_v51  ;;  %v4600_v31 = vmul.u32 %v9421_v5, %v4584_v18 }
 0x207   :  { %v4400_v48 = vshll.u32 %v9493_v63, 30  ;;  %vm4602_vm2 = vc.u32 %v9490_v1, %v9483_v6  ;;  %v3978_v53 = vsel %vm3977_vm1, 1, %v7341_v43  ;;  %v4449_v12 = vor.u32 8388608, %v4448_v54 }
 0x208   :  { %v4604_v56 = vsel %vm4602_vm2, %v4603_v0, %v9484_v40  ;;  %v4456_v33 = vsub.s32 32, %v4455_v49  ;;  %v4653_v2 = vshrl.u32 %v4652_v17, 23  ;;  %v9515_v58 = vshrl.u32 %v4453_v23, 5 }
 0x209   :  { %v9510_v52 = vsub.s32 %v4397_v37, %v4400_v48  ;;  %v4605_v38 = vadd.s32 %v4604_v56, %v4600_v31  ;;  %v9518_v5 = vsel %vm4091_vm3, %v4101_v13, %v9409_v8  ;;  %v9521_v15 = vsub.s32 %v9381_v25, %v3995_v57 }
 0x20a   :  { %v9524_v41 = vadd.s32 %v9413_v4, %v3978_v53  ;;  %vm4339_vm4 = vcmp.lt.s32.totalorder %v9388_v34, 0  ;;  %v9528_v9 = vshll.u32 %v4449_v12, 8  ;;  %v4649_v55 = vand.u32 2147483647, %v9396_v22 }
 0x20b   :  { %v4403_v50 = vsub.s32 0, %v9510_v52  ;;  %v4606_v11 = vadd.s32 536870912, %v4605_v38  ;;  %v4393_v20 = vadd.s32 %v9455_v24, %v9452_v42  ;;  %v4465_v25 = vshrl.u32 %v7338_v21, %v4456_v33 }
 0x20c   :  { %v6315_v45 = vadd.s32 4294967169, %v4653_v2  ;;  %vm9538_vm5 = vcmp.le.f32.partialorder %v4337_v7, 0.7853982  ;;  %v4459_v47 = vshrl.u32 %v7336_v28, %v4456_v33  ;;  %v4462_v46 = vshrl.u32 %v7337_v35, %v4456_v33 }
 0x20d   :  { %v6304_v32 = vmin.u32 %v4403_v50, %v9510_v52  ;;  %v9533_v8 = vshrl.u32 %v4606_v11, 30  ;;  %vm4473_vm6 = vcmp.lt.s32.totalorder %v9515_v58, 1  ;;  %v4423_v42 = vsub.s32 4, %v9493_v63 }
 0x20e   :  { %v4464_v16 = vshll.u32 %v7337_v35, %v4455_v49  ;;  %v4468_v14 = vshrl.u32 %v7339_v19, %v4456_v33  ;;  %vm4475_vm7 = vcmp.lt.s32.totalorder %v9515_v58, 3  ;;  %v4458_v27 = vshll.u32 %v7335_v26, %v4455_v49 }
 0x20f   :  { %v4405_v37 = vclz %v6304_v32  ;;  %v4608_v24 = vshll.u32 %v9533_v8, 30  ;;  %v4461_v10 = vshll.u32 %v7336_v28, %v4455_v49  ;;  %v4467_v23 = vshll.u32 %v7338_v21, %v4455_v49 }
 0x210   :  { %vm4474_vm8 = vcmp.lt.s32.totalorder %v9515_v58, 2  ;;  %v4466_v60 = vor.u32 %v4465_v25, %v4464_v16  ;;  %v4471_v40 = vshrl.u32 %v7340_v30, %v4456_v33  ;;  %vm4476_vm12 = vcmp.lt.s32.totalorder %v9515_v58, 4 }
 0x211   :  { %v6305_v7 = vadd.s32 4294967294, %v4405_v37  ;;  %v9554_v36 = vsub.s32 %v4605_v38, %v4608_v24  ;;  %v4460_v51 = vor.u32 %v4459_v47, %v4458_v27  ;;  %v4463_v29 = vor.u32 %v4462_v46, %v4461_v10 }
 0x212   :  { %v4469_v18 = vor.u32 %v4468_v14, %v4467_v23  ;;  %v4601_v17 = vadd.s32 %v9483_v6, %v9490_v1  ;;  %v4470_v0 = vshll.u32 %v7339_v19, %v4455_v49  ;;  %v4424_v31 = vsel %vm4339_vm4, %v4423_v42, %v9493_v63 }
 0x213   :  { %vm6306_vm9 = vcmp.lt.s32.totalorder %v6305_v7, 0  ;;  %v4611_v48 = vsub.s32 0, %v9554_v36  ;;  %v4457_v56 = vshrl.u32 %v7335_v26, %v4456_v33  ;;  %vm4547_vm11 = vcmp.lt.s32.totalorder %v9390_v39, 0 }
 0x214   :  { %v4408_v54 = vsel %vm6306_vm9, 0, %v6305_v7  ;;  %v4472_v38 = vor.u32 %v4471_v40, %v4470_v0  ;;  %v4478_v6 = vsel %vm4476_vm12, %v4466_v60, 2102212464  ;;  %v4481_v2 = vsel %vm4473_vm6, %v4460_v51, %v4463_v29 }
 0x215   :  { %v4409_v13 = vsub.s32 32, %v4408_v54  ;;  %v4413_v57 = vsub.s32 4294967266, %v4408_v54  ;;  %v4410_v53 = vshll.u32 %v9510_v52, %v4408_v54  ;;  %v6312_v12 = vmin.u32 %v4611_v48, %v9554_v36 }
 0x216   :  { %v4482_v63 = vsel %vm4476_vm12, %v4469_v18, 920167782  ;;  %v4426_v33 = vsel %vm9538_vm5, 0, %v4424_v31  ;;  %v4631_v50 = vsub.s32 4, %v9533_v8  ;;  %v4477_v11 = vsel %vm4473_vm6, %v4457_v56, %v4460_v51 }
 0x217   :  { %v4411_v1 = vshrl.u32 %v4393_v20, %v4409_v13  ;;  %v4414_v49 = vadd.s32 127, %v4413_v57  ;;  %v4613_v52 = vclz %v6312_v12  ;;  %vm4073_vm13 = vcmp.ne.s32.totalorder %v9521_v15, 0 }
 0x218   :  { %vm4083_vm10 = vcmp.lt.s32.totalorder %v9521_v15, 0  ;;  %v4483_v20 = vsel %vm4475_vm7, %v4466_v60, %v4482_v63  ;;  %v4485_v37 = vsel %vm4473_vm6, %v4463_v29, %v4466_v60  ;;  %v4479_v46 = vsel %vm4475_vm7, %v4463_v29, %v4478_v6 }
 0x219   :  { %v4412_v32 = vor.u32 %v4411_v1, %v4410_v53  ;;  %v4415_v25 = vshll.u32 %v4414_v49, 23  ;;  %v6313_v47 = vadd.s32 4294967294, %v4613_v52  ;;  %v4484_v42 = vsel %vm4474_vm8, %v4481_v2, %v4483_v20  ;;  %vm4093_vm3 = vmand %vm4083_vm10, %vm4073_vm13 }
 0x21a   :  { %v4486_v24 = vsel %vm4476_vm12, %v4472_v38, 1326507024  ;;  %v4659_v27 = vadd.s32 1, %v6315_v45  ;;  %v9597_v23 = vmul.u32.u64.low %v9528_v9, %v4484_v42  ;;  %v9598_v60 = vmul.u32.u64.high %v9528_v9, %v4484_v42, %v9597_v23 }
 0x21b   :  { %v4416_v16 = vor.u32 4788187, %v4415_v25  ;;  %v4419_v14 = vcvt.s32.f32 %v4412_v32  ;;  %v4487_v7 = vsel %vm4475_vm7, %v4469_v18, %v4486_v24  ;;  %vm6314_vm14 = vcmp.lt.s32.totalorder %v6313_v47, 0 }
 0x21c   :  { %v4488_v10 = vsel %vm4474_vm8, %v4485_v37, %v4487_v7  ;;  %v4616_v51 = vsel %vm6314_vm14, 0, %v6313_v47  ;;  %v4480_v45 = vsel %vm4474_vm8, %v4477_v11, %v4479_v46  ;;  %vm4660_vm15 = vcmp.gt.s32.totalorder %v4659_v27, 0 }
 0x21d   :  { %v4417_v40 = vand.u32 2147483647, %v4416_v16  ;;  %v9602_v29 = vmul.u32.u64.low %v9528_v9, %v4488_v10  ;;  %v9603_v54 = vmul.u32.u64.high %v9528_v9, %v4488_v10, %v9602_v29  ;;  %v4617_v48 = vsub.s32 32, %v4616_v51 }
 0x21e   :  { %v4621_v0 = vsub.s32 4294967266, %v4616_v51  ;;  %v4430_v13 = vadd.s32 3, %v4426_v33  ;;  %v4632_v57 = vsel %vm4547_vm11, %v4631_v50, %v9533_v8  ;;  %v4661_v31 = vsel %vm4660_vm15, %v4659_v27, 0 }
 0x21f   :  { %v4420_v18 = vmul.f32 %v4419_v14, %v4417_v40  ;;  %v4618_v56 = vshll.u32 %v9554_v36, %v4616_v51  ;;  %v4619_v53 = vshrl.u32 %v4601_v17, %v4617_v48  ;;  %v4499_v38 = vadd.s32 1, %v9598_v60 }
 0x220   :  { %v4622_v12 = vadd.s32 127, %v4621_v0  ;;  %v4496_v1 = vmul.u32 %v9528_v9, %v4480_v45  ;;  %vm4498_vm1 = vc.u32 %v9603_v54, %v9597_v23  ;;  %v4663_v58 = vand.u32 31, %v4661_v31 }
 0x221   :  { %v4421_v6 = vxor.u32 2147483648, %v4420_v18  ;;  %v4103_v49 = vadd.s32 39, %v9521_v15  ;;  %v4620_v2 = vor.u32 %v4619_v53, %v4618_v56  ;;  %v4500_v8 = vsel %vm4498_vm1, %v4499_v38, %v9598_v60 }
 0x222   :  { %v4623_v63 = vshll.u32 %v4622_v12, 23  ;;  %vm9621_vm2 = vcmp.le.f32.partialorder %v4545_v3, 0.7853982  ;;  %v4501_v9 = vadd.s32 %v4500_v8, %v4496_v1  ;;  %v4656_v52 = vand.u32 8388607, %v4649_v55 }
 0x223   :  { %v4422_v36 = vsel %vm4339_vm4, %v4421_v6, %v4420_v18  ;;  %v4634_v3 = vsel %vm9621_vm2, 0, %v4632_v57  ;;  %v4664_v32 = vsub.s32 32, %v4663_v58  ;;  %v9636_v25 = vand.u32 3, %v4430_v13 }
 0x224   :  { %v4425_v50 = vsel %vm9538_vm5, %v9388_v34, %v4422_v36  ;;  %v4624_v11 = vor.u32 4788187, %v4623_v63  ;;  %v9638_v20 = vand.u32 3, %v4426_v33  ;;  %v4502_v37 = vadd.s32 536870912, %v4501_v9 }
 0x225   :  { %7226 = vcosq.f32 %v4425_v50  ;;  %v4627_v4 = vcvt.s32.f32 %v4620_v2  ;;  %v3980_v46 = vshrl.u32 %v9524_v41, 5  ;;  %v9642_v42 = vsel %vm4093_vm3, %v4103_v49, %v9521_v15 }
 0x226   :  { %7228 = vsinq.f32 %v4425_v50  ;;  %v4625_v47 = vand.u32 2147483647, %v4624_v11  ;;  %v4638_v24 = vadd.s32 3, %v4634_v3  ;;  %v9644_v16 = vshrl.u32 %v4502_v37, 30 }
 0x227   :  { %v4657_v14 = vor.u32 8388608, %v4656_v52  ;;  %v4667_v27 = vshrl.u32 %v7336_v28, %v4664_v32  ;;  %v4670_v10 = vshrl.u32 %v7337_v35, %v4664_v32  ;;  %v4676_v33 = vshrl.u32 %v7339_v19, %v4664_v32 }
 0x228   :  { %v4628_v7 = vmul.f32 %v4627_v4, %v4625_v47  ;;  %vm4436_vm4 = vcmp.eq.s32.totalorder %v9636_v25, 2  ;;  %vm5483_vm5 = vcmp.eq.s32.totalorder %v9638_v20, 2  ;;  %v9651_v60 = vand.u32 3, %v4634_v3 }
 0x229   :  { %v4504_v15 = vshll.u32 %v9644_v16, 30  ;;  %v9654_v40 = vshrl.u32 %v4661_v31, 5  ;;  %v4675_v51 = vshll.u32 %v7338_v21, %v4663_v58  ;;  %vm4433_vm6 = vcmp.eq.s32.totalorder %v9636_v25, 0 }
 0x22a   :  { %vm5480_vm7 = vcmp.eq.s32.totalorder %v9638_v20, 0  ;;  %v4629_v29 = vxor.u32 2147483648, %v4628_v7  ;;  %v4666_v48 = vshll.u32 %v7335_v26, %v4663_v58  ;;  %v4669_v0 = vshll.u32 %v7336_v28, %v4663_v58 }
 0x22b   :  { %v4673_v45 = vshrl.u32 %v7338_v21, %v4664_v32  ;;  %vm4432_vm8 = vcmp.lt.s32.totalorder %v9636_v25, 2  ;;  %vm5171_vm12 = vcmp.lt.s32.totalorder %v9518_v5, 36  ;;  %vm5479_vm9 = vcmp.lt.s32.totalorder %v9638_v20, 2 }
 0x22c   :  { %v9665_v18 = vand.u32 3, %v4638_v24  ;;  %v9667_v13 = vsub.s32 %v4501_v9, %v4504_v15  ;;  %v4672_v57 = vshll.u32 %v7337_v35, %v4663_v58  ;;  %v4677_v31 = vor.u32 %v4676_v33, %v4675_v51 }
 0x22d   :  { %vm4121_vm13 = vcmp.lt.s32.totalorder %v9518_v5, 18  ;;  %vm4429_vm10 = vweird.f32 %v9388_v34  ;;  %v4630_v56 = vsel %vm4547_vm11, %v4629_v29, %v4628_v7  ;;  %v4668_v53 = vor.u32 %v4667_v27, %v4666_v48 }
 0x22e   :  { %v4671_v12 = vor.u32 %v4670_v10, %v4669_v0  ;;  %v4679_v38 = vshrl.u32 %v7340_v30, %v4664_v32  ;;  %v4633_v6 = vsel %vm9621_vm2, %v9390_v39, %v4630_v56  ;;  %v4497_v1 = vadd.s32 %v9597_v23, %v9603_v54 }
 0x22f   :  { %v4507_v49 = vsub.s32 0, %v9667_v13  ;;  %v9681_v2 = vshll.u32 %v4657_v14, 8  ;;  %7230 = vcosq.f32 %v4633_v6  ;;  %v4674_v63 = vor.u32 %v4673_v45, %v4672_v57  ;;  %v7227_v36 = vpop.eup %7226 }
 0x230   :  { %v4678_v8 = vshll.u32 %v7339_v19, %v4663_v58  ;;  %vm4684_vm11 = vcmp.lt.s32.totalorder %v9654_v40, 4  ;;  %7232 = vsinq.f32 %v4633_v6  ;;  %vm4681_vm14 = vcmp.lt.s32.totalorder %v9654_v40, 1  ;;  %v7229_v23 = vpop.eup %7228 }
 0x231   :  { %v6308_v9 = vmin.u32 %v4507_v49, %v9667_v13  ;;  %v4690_v17 = vsel %vm4684_vm11, %v4677_v31, 920167782  ;;  %v4437_v54 = vxor.u32 2147483648, %v7227_v36  ;;  %v4665_v52 = vshrl.u32 %v7335_v26, %v4664_v32 }
 0x232   :  { %v4680_v50 = vor.u32 %v4679_v38, %v4678_v8  ;;  %v4689_v11 = vsel %vm4681_vm14, %v4668_v53, %v4671_v12  ;;  %v4434_v58 = vxor.u32 2147483648, %v7229_v23  ;;  %vm4682_vm15 = vcmp.lt.s32.totalorder %v9654_v40, 2 }
 0x233   :  { %v4509_v3 = vclz %v6308_v9  ;;  %vm4683_vm1 = vcmp.lt.s32.totalorder %v9654_v40, 3  ;;  %v4438_v37 = vsel %vm4436_vm4, %v4437_v54, %v7229_v23  ;;  %v5485_v47 = vsel %vm5483_vm5, %v4437_v54, %v7229_v23 }
 0x234   :  { %v4686_v4 = vsel %vm4684_vm11, %v4674_v63, 2102212464  ;;  %v4691_v32 = vsel %vm4683_vm1, %v4674_v63, %v4690_v17  ;;  %v4435_v24 = vsel %vm4433_vm6, %v7227_v36, %v4434_v58  ;;  %v5482_v14 = vsel %vm5480_vm7, %v7227_v36, %v4434_v58 }
 0x235   :  { %vm5686_vm2 = vcmp.eq.s32.totalorder %v9651_v60, 0  ;;  %v6309_v7 = vadd.s32 4294967294, %v4509_v3  ;;  %v4692_v27 = vsel %vm4682_vm15, %v4689_v11, %v4691_v32  ;;  %v4439_v10 = vsel %vm4432_vm8, %v4435_v24, %v4438_v37 }
 0x236   :  { %v5486_v33 = vsel %vm5479_vm9, %v5482_v14, %v5485_v47  ;;  %vm5173_vm3 = vcmp.lt.s32.totalorder %v9642_v42, 36  ;;  %vm5685_vm4 = vcmp.lt.s32.totalorder %v9651_v60, 2  ;;  %v4693_v15 = vsel %vm4681_vm14, %v4671_v12, %v4674_v63 }
 0x237   :  { %v4694_v51 = vsel %vm4684_vm11, %v4680_v50, 1326507024  ;;  %v4440_v29 = vsel %vm4429_vm10, nan, %v4439_v10  ;;  %v5487_v25 = vsel %vm4429_vm10, nan, %v5486_v33  ;;  %vm4123_vm5 = vcmp.lt.s32.totalorder %v9642_v42, 18 }
 0x238   :  { %vm4637_vm6 = vweird.f32 %v9390_v39  ;;  %vm6310_vm7 = vcmp.lt.s32.totalorder %v6309_v7, 0  ;;  %v4695_v20 = vsel %vm4683_vm1, %v4677_v31, %v4694_v51  ;;  %v6231_v48 = vsel %vm5171_vm12, %v5487_v25, %v9388_v34 }
 0x239   :  { %v4512_v0 = vsel %vm6310_vm7, 0, %v6309_v7  ;;  %v4685_v45 = vsel %vm4681_vm14, %v4665_v52, %v4668_v53  ;;  %v4696_v57 = vsel %vm4682_vm15, %v4693_v15, %v4695_v20  ;;  %v6261_v56 = vsel %vm4121_vm13, %v4440_v29, %v6231_v48  ;;  %v7231_v31 = vpop.eup %7230 }
 0x23a   :  { %v4513_v38 = vsub.s32 32, %v4512_v0  ;;  %v4517_v6 = vsub.s32 4294967266, %v4512_v0  ;;  %v4687_v49 = vsel %vm4683_vm1, %v4671_v12, %v4686_v4  ;;  %6271 = vst [vmem:[#allocation7 + $0x10] sm:$0xff] %v6261_v56  ;;  %v7233_v36 = vpop.eup %7232  ;;  %v4645_v9 = vxor.u32 2147483648, %v7231_v31 }
 0x23b   :  { %v9739_v63 = vmul.u32.u64.low %v9681_v2, %v4696_v57  ;;  %v9740_v34 = vmul.u32.u64.high %v9681_v2, %v4696_v57, %v9739_v63  ;;  %v9743_v8 = vmul.u32.u64.low %v9681_v2, %v4692_v27  ;;  %v9744_v53 = vmul.u32.u64.high %v9681_v2, %v4692_v27, %v9743_v8 }
 0x23c   :  { %v4514_v5 = vshll.u32 %v9667_v13, %v4512_v0  ;;  %v4515_v17 = vshrl.u32 %v4497_v1, %v4513_v38  ;;  %v4518_v23 = vadd.s32 127, %v4517_v6  ;;  %vm4641_vm8 = vcmp.eq.s32.totalorder %v9665_v18, 0 }
 0x23d   :  { %v4642_v12 = vxor.u32 2147483648, %v7233_v36  ;;  %vm4644_vm12 = vcmp.eq.s32.totalorder %v9665_v18, 2  ;;  %vm5689_vm9 = vcmp.eq.s32.totalorder %v9651_v60, 2  ;;  %vm4640_vm13 = vcmp.lt.s32.totalorder %v9665_v18, 2 }
 0x23e   :  { %v4646_v54 = vsel %vm4644_vm12, %v4645_v9, %v7233_v36  ;;  %v5691_v52 = vsel %vm5689_vm9, %v4645_v9, %v7233_v36  ;;  %v4516_v50 = vor.u32 %v4515_v17, %v4514_v5  ;;  %v4519_v11 = vshll.u32 %v4518_v23, 23 }
 0x23f   :  { %v4643_v58 = vsel %vm4641_vm8, %v7231_v31, %v4642_v12  ;;  %v5688_v3 = vsel %vm5686_vm2, %v7231_v31, %v4642_v12  ;;  %v4688_v13 = vsel %vm4682_vm15, %v4685_v45, %v4687_v49  ;;  %vm4706_vm10 = vc.u32 %v9740_v34, %v9743_v8 }
 0x240   :  { %v4647_v1 = vsel %vm4640_vm13, %v4643_v58, %v4646_v54  ;;  %v5692_v37 = vsel %vm5685_vm4, %v5688_v3, %v5691_v52  ;;  %v4520_v47 = vor.u32 4788187, %v4519_v11  ;;  %v4707_v32 = vadd.s32 1, %v9744_v53 }
 0x241   :  { %v4648_v4 = vsel %vm4637_vm6, nan, %v4647_v1  ;;  %v5693_v18 = vsel %vm4637_vm6, nan, %v5692_v37  ;;  %v4523_v14 = vcvt.s32.f32 %v4516_v50  ;;  %v4704_v60 = vmul.u32 %v9681_v2, %v4688_v13 }
 0x242   :  { %v6233_v40 = vsel %vm5173_vm3, %v5693_v18, %v9390_v39  ;;  %v4521_v24 = vand.u32 2147483647, %v4520_v47  ;;  %v3981_v27 = vmul.u32 39, %v3980_v46  ;;  %v4708_v10 = vsel %vm4706_vm10, %v4707_v32, %v9744_v53 }
 0x243   :  { %v6263_v7 = vsel %vm4123_vm5, %v4648_v4, %v6233_v40  ;;  %v4527_v15 = vsub.s32 4, %v9644_v16  ;;  %v4709_v51 = vadd.s32 %v4708_v10, %v4704_v60  ;;  %vm4443_vm11 = vcmp.lt.s32.totalorder %v9394_v44, 0 }
 0x244   :  { %6273 = vst [vmem:[#allocation7 + $0x20] sm:$0xff] %v6263_v7  ;;  %v4524_v33 = vmul.f32 %v4523_v14, %v4521_v24  ;;  %v3982_v39 = vsub.s32 %v9406_v59, %v3981_v27  ;;  %vm4442_vm14 = vcmp.le.f32.partialorder %v4441_v62, 0.7853982  ;;  %v9784_v20 = vadd.s32 640, %v9283_v61 }
 0x245   :  { %v4710_v25 = vadd.s32 536870912, %v4709_v51  ;;  %v4528_v41 = vsel %vm4443_vm11, %v4527_v15, %v9644_v16  ;;  %v4705_v58 = vadd.s32 %v9743_v8, %v9740_v34 }
 0x246   :  { %v4525_v29 = vxor.u32 2147483648, %v4524_v33  ;;  %vm4072_vm15 = vcmp.ne.s32.totalorder %v3982_v39, 0  ;;  %vm4082_vm1 = vcmp.lt.s32.totalorder %v3982_v39, 0  ;;  %v4530_v59 = vsel %vm4442_vm14, 0, %v4528_v41 }
 0x247   :  { %v9780_v46 = vshrl.u32 %v4710_v25, 30  ;;  %v4102_v45 = vadd.s32 39, %v3982_v39  ;;  %v9788_v62 = vmul.u32.u64.low 3524075730, %v9784_v20  ;;  %v9789_v57 = vmul.u32.u64.high 3524075730, %v9784_v20, %v9788_v62  ;;  %vm4092_vm2 = vmand %vm4082_vm1, %vm4072_vm15 }
 0x248   :  { %v4526_v42 = vsel %vm4443_vm11, %v4525_v29, %v4524_v33  ;;  %v4534_v16 = vadd.s32 3, %v4530_v59  ;;  %v5581_v49 = vand.u32 3, %v4530_v59  ;;  %vm4533_vm11 = vweird.f32 %v9394_v44 }
 0x249   :  { %v4529_v2 = vsel %vm4442_vm14, %v9394_v44, %v4526_v42  ;;  %v4712_v48 = vshll.u32 %v9780_v46, 30  ;;  %v4112_v6 = vsel %vm4092_vm2, %v4102_v45, %v3982_v39  ;;  %vm4005_vm3 = vc.u32 %v9788_v62, 3524075730 }
 0x24a   :  { %7234 = vcosq.f32 %v4529_v2  ;;  %v4535_v31 = vand.u32 3, %v4534_v16  ;;  %vm4122_vm4 = vcmp.lt.s32.totalorder %v4112_v6, 18  ;;  %vm5172_vm5 = vcmp.lt.s32.totalorder %v4112_v6, 36 }
 0x24b   :  { %7236 = vsinq.f32 %v4529_v2  ;;  %v4713_v0 = vsub.s32 %v4709_v51, %v4712_v48  ;;  %v4006_v36 = vsel %vm4005_vm3, 1, %v7341_v43  ;;  %vm5582_vm6 = vcmp.lt.s32.totalorder %v5581_v49, 2 }
 0x24c   :  { %vm5583_vm7 = vcmp.eq.s32.totalorder %v5581_v49, 0  ;;  %vm5586_vm8 = vcmp.eq.s32.totalorder %v5581_v49, 2  ;;  %vm4536_vm12 = vcmp.lt.s32.totalorder %v4535_v31, 2  ;;  %vm4540_vm9 = vcmp.eq.s32.totalorder %v4535_v31, 2 }
 0x24d   :  { %v4715_v56 = vsub.s32 0, %v4713_v0  ;;  %vm4537_vm10 = vcmp.eq.s32.totalorder %v4535_v31, 0  ;;  %v4007_v18 = vadd.s32 %v9789_v57, %v4006_v36  ;;  %v4735_v29 = vsub.s32 4, %v9780_v46 }
 0x24e   :  { %vm4651_vm14 = vcmp.lt.s32.totalorder %v9396_v22, 0  ;;  %vm4650_vm15 = vcmp.le.f32.partialorder %v4649_v55, 0.7853982  ;;  %v9808_v2 = vadd.s32 768, %v9283_v61  ;;  %v9815_v55 = vadd.s32 1024, %v9283_v61 }
 0x24f   :  { %v6316_v38 = vmin.u32 %v4715_v56, %v4713_v0  ;;  %v4008_v7 = vshrl.u32 %v4007_v18, 5  ;;  %v4736_v42 = vsel %vm4651_vm14, %v4735_v29, %v9780_v46 }
 0x250   :  { %v4738_v48 = vsel %vm4650_vm15, 0, %v4736_v42  ;;  %v9818_v16 = vmul.u32.u64.low 3524075730, %v9815_v55  ;;  %v9819_v56 = vmul.u32.u64.high 3524075730, %v9815_v55, %v9818_v16 }
 0x251   :  { %v4717_v63 = vclz %v6316_v38  ;;  %v4009_v15 = vmul.u32 39, %v4008_v7  ;;  %v5787_v62 = vand.u32 3, %v4738_v48 }
 0x253   :  { %v6317_v9 = vadd.s32 4294967294, %v4717_v63  ;;  %v4010_v39 = vsub.s32 %v9784_v20, %v4009_v15  ;;  %v4742_v20 = vadd.s32 3, %v4738_v48 }
 0x254   :  { %v7235_v53 = vpop.eup %7234 }
 0x255   :  { %v7237_v5 = vpop.eup %7236  ;;  %v4541_v17 = vxor.u32 2147483648, %v7235_v53  ;;  %vm6318_vm13 = vcmp.lt.s32.totalorder %v6317_v9, 0  ;;  %vm4074_vm1 = vcmp.ne.s32.totalorder %v4010_v39, 0  ;;  %vm4084_vm2 = vcmp.lt.s32.totalorder %v4010_v39, 0 }
 0x256   :  { %v4538_v23 = vxor.u32 2147483648, %v7237_v5  ;;  %v4720_v52 = vsel %vm6318_vm13, 0, %v6317_v9  ;;  %v4104_v59 = vadd.s32 39, %v4010_v39  ;;  %vm4094_vm3 = vmand %vm4084_vm2, %vm4074_vm1  ;;  %v4743_v57 = vand.u32 3, %v4742_v20 }
 0x257   :  { %v4542_v12 = vsel %vm4540_vm9, %v4541_v17, %v7237_v5  ;;  %v5588_v54 = vsel %vm5586_vm8, %v4541_v17, %v7237_v5  ;;  %v4721_v3 = vsub.s32 32, %v4720_v52  ;;  %v4725_v37 = vsub.s32 4294967266, %v4720_v52 }
 0x258   :  { %v4539_v50 = vsel %vm4537_vm10, %v7235_v53, %v4538_v23  ;;  %v5585_v11 = vsel %vm5583_vm7, %v7235_v53, %v4538_v23  ;;  %v4722_v24 = vshll.u32 %v4713_v0, %v4720_v52  ;;  %v4114_v46 = vsel %vm4094_vm3, %v4104_v59, %v4010_v39 }
 0x259   :  { %v4543_v13 = vsel %vm4536_vm12, %v4539_v50, %v4542_v12  ;;  %v5589_v1 = vsel %vm5582_vm6, %v5585_v11, %v5588_v54  ;;  %v4723_v32 = vshrl.u32 %v4705_v58, %v4721_v3  ;;  %v4726_v14 = vadd.s32 127, %v4725_v37 }
 0x25a   :  { %v4544_v47 = vsel %vm4533_vm11, nan, %v4543_v13  ;;  %v5590_v4 = vsel %vm4533_vm11, nan, %v5589_v1  ;;  %v9811_v0 = vmul.u32.u64.low 3524075730, %v9808_v2  ;;  %v9812_v45 = vmul.u32.u64.high 3524075730, %v9808_v2, %v9811_v0 }
 0x25b   :  { %v6232_v40 = vsel %vm5172_vm5, %v5590_v4, %v9394_v44  ;;  %v4724_v34 = vor.u32 %v4723_v32, %v4722_v24  ;;  %v4727_v8 = vshll.u32 %v4726_v14, 23  ;;  %vm4124_vm5 = vcmp.lt.s32.totalorder %v4114_v46, 18 }
 0x25c   :  { %v6262_v60 = vsel %vm4122_vm4, %v4544_v47, %v6232_v40  ;;  %vm4019_vm4 = vc.u32 %v9811_v0, 3524075730  ;;  %vm5174_vm6 = vcmp.lt.s32.totalorder %v4114_v46, 36  ;;  %vm5788_vm7 = vcmp.lt.s32.totalorder %v5787_v62, 2 }
 0x25d   :  { %6272 = vst [vmem:[#allocation7 + $0x18] sm:$0xff] %v6262_v60  ;;  %v4728_v27 = vor.u32 4788187, %v4727_v8  ;;  %v4731_v33 = vcvt.s32.f32 %v4724_v34  ;;  %v4020_v31 = vsel %vm4019_vm4, 1, %v7341_v43  ;;  %vm4748_vm8 = vcmp.eq.s32.totalorder %v4743_v57, 2 }
 0x25e   :  { %vm5789_vm12 = vcmp.eq.s32.totalorder %v5787_v62, 0  ;;  %vm5792_vm9 = vcmp.eq.s32.totalorder %v5787_v62, 2  ;;  %vm4745_vm13 = vcmp.eq.s32.totalorder %v4743_v57, 0  ;;  %vm4047_vm10 = vc.u32 %v9818_v16, 3524075730 }
 0x25f   :  { %v4729_v10 = vand.u32 2147483647, %v4728_v27  ;;  %vm4744_vm11 = vcmp.lt.s32.totalorder %v4743_v57, 2  ;;  %v4021_v1 = vadd.s32 %v9812_v45, %v4020_v31  ;;  %v4048_v4 = vsel %vm4047_vm10, 1, %v7341_v43 }
 0x261   :  { %v4732_v51 = vmul.f32 %v4731_v33, %v4729_v10  ;;  %v4022_v34 = vshrl.u32 %v4021_v1, 5  ;;  %v9851_v10 = vadd.s32 896, %v9283_v61 }
 0x263   :  { %v4733_v25 = vxor.u32 2147483648, %v4732_v51  ;;  %v9857_v59 = vmul.u32.u64.low 3524075730, %v9851_v10  ;;  %v9858_v20 = vmul.u32.u64.high 3524075730, %v9851_v10, %v9857_v59 }
 0x265   :  { %v4734_v44 = vsel %vm4651_vm14, %v4733_v25, %v4732_v51  ;;  %vm4741_vm14 = vweird.f32 %v9396_v22  ;;  %v9853_v25 = vmul.u32 39, %v4022_v34  ;;  %vm4033_vm10 = vc.u32 %v9857_v59, 3524075730 }
 0x266   :  { %v4737_v41 = vsel %vm4650_vm15, %v9396_v22, %v4734_v44 }
 0x267   :  { %7238 = vcosq.f32 %v4737_v41 }
 0x268   :  { %7240 = vsinq.f32 %v4737_v41 }
 0x271   :  { %v7239_v38 = vpop.eup %7238 }
 0x272   :  { %v7241_v6 = vpop.eup %7240  ;;  %v4749_v49 = vxor.u32 2147483648, %v7239_v38 }
 0x273   :  { %v4746_v63 = vxor.u32 2147483648, %v7241_v6 }
 0x274   :  { %v4750_v53 = vsel %vm4748_vm8, %v4749_v49, %v7241_v6  ;;  %v5794_v36 = vsel %vm5792_vm9, %v4749_v49, %v7241_v6 }
 0x275   :  { %v4747_v5 = vsel %vm4745_vm13, %v7239_v38, %v4746_v63  ;;  %v5791_v17 = vsel %vm5789_vm12, %v7239_v38, %v4746_v63 }
 0x276   :  { %v4751_v52 = vsel %vm4744_vm11, %v4747_v5, %v4750_v53  ;;  %v5795_v50 = vsel %vm5788_vm7, %v5791_v17, %v5794_v36 }
 0x277   :  { %v4752_v3 = vsel %vm4741_vm14, nan, %v4751_v52  ;;  %v5796_v13 = vsel %vm4741_vm14, nan, %v5795_v50 }
 0x278   :  { %v6234_v37 = vsel %vm5174_vm6, %v5796_v13, %v9396_v22  ;;  %v9847_v22 = vadd.s32 %v9819_v56, %v4048_v4 }
 0x279   :  { %v6264_v32 = vsel %vm4124_vm5, %v4752_v3, %v6234_v37 }
 0x27a   :  { %6274 = vst [vmem:[#allocation7 + $0x28] sm:$0xff] %v6264_v32  ;;  %v4050_v44 = vshrl.u32 %v9847_v22, 5 }
 0x282   :  { %v9822_v9 = vpop.f32.mrb[4].mxu1  ;;  %v9825_v12 = vpop.f32.mrb[4].mxu0 }
 0x283   :  { %v4753_v23 = vand.u32 2147483647, %v9822_v9  ;;  %v9827_v54 = vpop.f32.mrb[5].mxu1  ;;  %v4756_v11 = vand.u32 2139095040, %v9822_v9  ;;  %v9832_v58 = vpop.f32.mrb[5].mxu0  ;;  %v4964_v24 = vand.u32 2139095040, %v9825_v12 }
 0x284   :  { %v4961_v18 = vand.u32 2147483647, %v9825_v12  ;;  %v4860_v7 = vand.u32 2139095040, %v9827_v54  ;;  %v4857_v46 = vand.u32 2147483647, %v9827_v54 }
 0x285   :  { %v4757_v47 = vshrl.u32 %v4756_v11, 23  ;;  %v4760_v40 = vand.u32 8388607, %v4753_v23  ;;  %v4965_v8 = vshrl.u32 %v4964_v24, 23 }
 0x286   :  { %v4968_v60 = vand.u32 8388607, %v4961_v18  ;;  %v4861_v29 = vshrl.u32 %v4860_v7, 23 }
 0x287   :  { %v6319_v14 = vadd.s32 4294967169, %v4757_v47  ;;  %v4761_v33 = vor.u32 8388608, %v4760_v40  ;;  %v6327_v15 = vadd.s32 4294967169, %v4965_v8 }
 0x288   :  { %v4969_v51 = vor.u32 8388608, %v4968_v60  ;;  %v6323_v62 = vadd.s32 4294967169, %v4861_v29 }
 0x289   :  { %v4763_v27 = vadd.s32 1, %v6319_v14  ;;  %v4971_v42 = vadd.s32 1, %v6327_v15  ;;  %v9861_v0 = vshll.u32 %v4761_v33, 8 }
 0x28a   :  { %v9863_v45 = vshll.u32 %v4969_v51, 8  ;;  %v4867_v33 = vadd.s32 1, %v6323_v62 }
 0x28b   :  { %vm4764_vm15 = vcmp.gt.s32.totalorder %v4763_v27, 0  ;;  %vm4972_vm1 = vcmp.gt.s32.totalorder %v4971_v42, 0 }
 0x28c   :  { %v4765_v39 = vsel %vm4764_vm15, %v4763_v27, 0  ;;  %v4973_v3 = vsel %vm4972_vm1, %v4971_v42, 0  ;;  %vm4868_vm13 = vcmp.gt.s32.totalorder %v4867_v33, 0 }
 0x28d   :  { %v4766_v41 = vshrl.u32 %v4765_v39, 5  ;;  %v4767_v48 = vand.u32 31, %v4765_v39  ;;  %v4975_v37 = vand.u32 31, %v4973_v3  ;;  %v4974_v29 = vshrl.u32 %v4973_v3, 5 }
 0x28f   :  { %v4768_v57 = vsub.s32 32, %v4767_v48  ;;  %v4770_v16 = vshll.u32 %v7335_v26, %v4767_v48  ;;  %v4773_v56 = vshll.u32 %v7336_v28, %v4767_v48  ;;  %v4776_v38 = vshll.u32 %v7337_v35, %v4767_v48 }
 0x290   :  { %v4779_v6 = vshll.u32 %v7338_v21, %v4767_v48  ;;  %v4782_v49 = vshll.u32 %v7339_v19, %v4767_v48  ;;  %vm4785_vm2 = vcmp.lt.s32.totalorder %v4766_v41, 1  ;;  %vm4786_vm3 = vcmp.lt.s32.totalorder %v4766_v41, 2 }
 0x291   :  { %v4771_v31 = vshrl.u32 %v7336_v28, %v4768_v57  ;;  %v4774_v63 = vshrl.u32 %v7337_v35, %v4768_v57  ;;  %v4777_v53 = vshrl.u32 %v7338_v21, %v4768_v57  ;;  %v4769_v36 = vshrl.u32 %v7335_v26, %v4768_v57 }
 0x292   :  { %v4780_v5 = vshrl.u32 %v7339_v19, %v4768_v57  ;;  %v4783_v17 = vshrl.u32 %v7340_v30, %v4768_v57  ;;  %vm4787_vm4 = vcmp.lt.s32.totalorder %v4766_v41, 3  ;;  %vm4788_vm5 = vcmp.lt.s32.totalorder %v4766_v41, 4 }
 0x293   :  { %v4772_v52 = vor.u32 %v4771_v31, %v4770_v16  ;;  %v4775_v50 = vor.u32 %v4774_v63, %v4773_v56  ;;  %v4778_v11 = vor.u32 %v4777_v53, %v4776_v38  ;;  %v4976_v34 = vsub.s32 32, %v4975_v37 }
 0x294   :  { %v4781_v13 = vor.u32 %v4780_v5, %v4779_v6  ;;  %v4784_v1 = vor.u32 %v4783_v17, %v4782_v49  ;;  %v4978_v39 = vshll.u32 %v7335_v26, %v4975_v37  ;;  %v4981_v38 = vshll.u32 %v7336_v28, %v4975_v37 }
 0x295   :  { %v4789_v47 = vsel %vm4785_vm2, %v4769_v36, %v4772_v52  ;;  %v4790_v4 = vsel %vm4788_vm5, %v4778_v11, 2102212464  ;;  %v4793_v32 = vsel %vm4785_vm2, %v4772_v52, %v4775_v50  ;;  %v4797_v40 = vsel %vm4785_vm2, %v4775_v50, %v4778_v11 }
 0x296   :  { %v4791_v24 = vsel %vm4787_vm4, %v4775_v50, %v4790_v4  ;;  %v4794_v14 = vsel %vm4788_vm5, %v4781_v13, 920167782  ;;  %v4798_v60 = vsel %vm4788_vm5, %v4784_v1, 1326507024  ;;  %v4979_v62 = vshrl.u32 %v7336_v28, %v4976_v34 }
 0x297   :  { %v4792_v8 = vsel %vm4786_vm3, %v4789_v47, %v4791_v24  ;;  %v4795_v7 = vsel %vm4787_vm4, %v4778_v11, %v4794_v14  ;;  %v4799_v27 = vsel %vm4787_vm4, %v4781_v13, %v4798_v60  ;;  %v4982_v41 = vshrl.u32 %v7337_v35, %v4976_v34 }
 0x298   :  { %v4796_v15 = vsel %vm4786_vm3, %v4793_v32, %v4795_v7  ;;  %v4800_v51 = vsel %vm4786_vm3, %v4797_v40, %v4799_v27  ;;  %v4808_v56 = vmul.u32 %v9861_v0, %v4792_v8  ;;  %v4984_v6 = vshll.u32 %v7337_v35, %v4975_v37 }
 0x299   :  { %v9889_v42 = vmul.u32.u64.low %v9861_v0, %v4800_v51  ;;  %v9890_v48 = vmul.u32.u64.high %v9861_v0, %v4800_v51, %v9889_v42  ;;  %v9893_v57 = vmul.u32.u64.low %v9861_v0, %v4796_v15  ;;  %v9894_v16 = vmul.u32.u64.high %v9861_v0, %v4796_v15, %v9893_v57 }
 0x29a   :  { %v4985_v49 = vshrl.u32 %v7338_v21, %v4976_v34  ;;  %v4987_v31 = vshll.u32 %v7338_v21, %v4975_v37  ;;  %v4988_v63 = vshrl.u32 %v7339_v19, %v4976_v34  ;;  %v4980_v53 = vor.u32 %v4979_v62, %v4978_v39 }
 0x29b   :  { %v4983_v36 = vor.u32 %v4982_v41, %v4981_v38  ;;  %v4990_v5 = vshll.u32 %v7339_v19, %v4975_v37  ;;  %v4991_v0 = vshrl.u32 %v7340_v30, %v4976_v34  ;;  %vm4810_vm6 = vc.u32 %v9890_v48, %v9893_v57 }
 0x29c   :  { %v4811_v17 = vadd.s32 1, %v9894_v16  ;;  %v4977_v52 = vshrl.u32 %v7335_v26, %v4976_v34  ;;  %v4986_v50 = vor.u32 %v4985_v49, %v4984_v6  ;;  %v4989_v11 = vor.u32 %v4988_v63, %v4987_v31 }
 0x29d   :  { %v4992_v3 = vor.u32 %v4991_v0, %v4990_v5  ;;  %vm4993_vm7 = vcmp.lt.s32.totalorder %v4974_v29, 1  ;;  %vm4994_vm8 = vcmp.lt.s32.totalorder %v4974_v29, 2  ;;  %vm4995_vm12 = vcmp.lt.s32.totalorder %v4974_v29, 3 }
 0x29e   :  { %v4812_v13 = vsel %vm4810_vm6, %v4811_v17, %v9894_v16  ;;  %vm4996_vm9 = vcmp.lt.s32.totalorder %v4974_v29, 4  ;;  %v5001_v1 = vsel %vm4993_vm7, %v4980_v53, %v4983_v36  ;;  %v5005_v32 = vsel %vm4993_vm7, %v4983_v36, %v4986_v50 }
 0x29f   :  { %v4813_v37 = vadd.s32 %v4812_v13, %v4808_v56  ;;  %v4998_v47 = vsel %vm4996_vm9, %v4986_v50, 2102212464  ;;  %v5002_v4 = vsel %vm4996_vm9, %v4989_v11, 920167782  ;;  %v4997_v40 = vsel %vm4993_vm7, %v4977_v52, %v4980_v53 }
 0x2a0   :  { %v5003_v24 = vsel %vm4995_vm12, %v4986_v50, %v5002_v4  ;;  %v5006_v14 = vsel %vm4996_vm9, %v4992_v3, 1326507024  ;;  %v4999_v34 = vsel %vm4995_vm12, %v4983_v36, %v4998_v47  ;;  %v4024_v27 = vsub.s32 %v9808_v2, %v9853_v25 }
 0x2a1   :  { %v4814_v60 = vadd.s32 536870912, %v4813_v37  ;;  %v5004_v8 = vsel %vm4994_vm8, %v5001_v1, %v5003_v24  ;;  %v5007_v7 = vsel %vm4995_vm12, %v4989_v11, %v5006_v14  ;;  %v4869_v62 = vsel %vm4868_vm13, %v4867_v33, 0 }
 0x2a2   :  { %v5008_v15 = vsel %vm4994_vm8, %v5005_v32, %v5007_v7  ;;  %v9917_v51 = vmul.u32.u64.low %v9863_v45, %v5004_v8  ;;  %v9918_v39 = vmul.u32.u64.high %v9863_v45, %v5004_v8, %v9917_v51  ;;  %v4051_v38 = vmul.u32 39, %v4050_v44 }
 0x2a3   :  { %v4815_v42 = vshrl.u32 %v4814_v60, 30  ;;  %v9922_v16 = vmul.u32.u64.low %v9863_v45, %v5008_v15  ;;  %v9923_v56 = vmul.u32.u64.high %v9863_v45, %v5008_v15, %v9922_v16  ;;  %v5000_v41 = vsel %vm4994_vm8, %v4997_v40, %v4999_v34 }
 0x2a4   :  { %v4864_v2 = vand.u32 8388607, %v4857_v46  ;;  %v4871_v25 = vand.u32 31, %v4869_v62  ;;  %vm4075_vm11 = vcmp.ne.s32.totalorder %v4024_v27, 0  ;;  %vm4085_vm14 = vcmp.lt.s32.totalorder %v4024_v27, 0 }
 0x2a5   :  { %v4816_v6 = vshll.u32 %v4815_v42, 30  ;;  %v5019_v49 = vadd.s32 1, %v9918_v39  ;;  %v5016_v63 = vmul.u32 %v9863_v45, %v5000_v41  ;;  %vm5018_vm15 = vc.u32 %v9923_v56, %v9917_v51  ;;  %vm4095_vm1 = vmand %vm4085_vm14, %vm4075_vm11 }
 0x2a6   :  { %v4105_v22 = vadd.s32 39, %v4024_v27  ;;  %v9936_v44 = vsub.s32 %v9815_v55, %v4051_v38  ;;  %v4034_v33 = vsel %vm4033_vm10, 1, %v7341_v43  ;;  %v4865_v36 = vor.u32 8388608, %v4864_v2 }
 0x2a7   :  { %v4817_v31 = vsub.s32 %v4813_v37, %v4816_v6  ;;  %v5020_v59 = vsel %vm5018_vm15, %v5019_v49, %v9918_v39  ;;  %v4872_v5 = vsub.s32 32, %v4871_v25  ;;  %v9946_v50 = vadd.s32 %v9858_v20, %v4034_v33 }
 0x2a8   :  { %v5021_v53 = vadd.s32 %v5020_v59, %v5016_v63  ;;  %v9940_v17 = vsel %vm4095_vm1, %v4105_v22, %v4024_v27  ;;  %v9943_v45 = vadd.s32 39, %v9936_v44  ;;  %vm4755_vm2 = vcmp.lt.s32.totalorder %v9822_v9, 0 }
 0x2a9   :  { %v4819_v29 = vsub.s32 0, %v4817_v31  ;;  %v4875_v11 = vshrl.u32 %v7336_v28, %v4872_v5  ;;  %v9950_v3 = vshll.u32 %v4865_v36, 8  ;;  %v4809_v13 = vadd.s32 %v9893_v57, %v9890_v48 }
 0x2aa   :  { %v5022_v52 = vadd.s32 536870912, %v5021_v53  ;;  %v9956_v37 = vshrl.u32 %v4869_v62, 5  ;;  %v4881_v47 = vshrl.u32 %v7338_v21, %v4872_v5  ;;  %v4874_v20 = vshll.u32 %v7335_v26, %v4871_v25 }
 0x2ab   :  { %v6320_v0 = vmin.u32 %v4819_v29, %v4817_v31  ;;  %v4878_v32 = vshrl.u32 %v7337_v35, %v4872_v5  ;;  %v4884_v40 = vshrl.u32 %v7339_v19, %v4872_v5  ;;  %v4839_v24 = vsub.s32 4, %v4815_v42 }
 0x2ac   :  { %v9954_v1 = vshrl.u32 %v5022_v52, 30  ;;  %v4880_v60 = vshll.u32 %v7337_v35, %v4871_v25  ;;  %v5068_v48 = vand.u32 2139095040, %v9832_v58  ;;  %v4876_v57 = vor.u32 %v4875_v11, %v4874_v20 }
 0x2ad   :  { %v4821_v55 = vclz %v6320_v0  ;;  %v4877_v34 = vshll.u32 %v7336_v28, %v4871_v25  ;;  %v4883_v8 = vshll.u32 %v7338_v21, %v4871_v25  ;;  %v4887_v39 = vshrl.u32 %v7340_v30, %v4872_v5 }
 0x2ae   :  { %v5024_v14 = vshll.u32 %v9954_v1, 30  ;;  %v4882_v15 = vor.u32 %v4881_v47, %v4880_v60  ;;  %v4840_v6 = vsel %vm4755_vm2, %v4839_v24, %v4815_v42  ;;  %v4873_v49 = vshrl.u32 %v7335_v26, %v4872_v5 }
 0x2af   :  { %v6321_v4 = vadd.s32 4294967294, %v4821_v55  ;;  %v4879_v38 = vor.u32 %v4878_v32, %v4877_v34  ;;  %v4885_v41 = vor.u32 %v4884_v40, %v4883_v8  ;;  %v4886_v63 = vshll.u32 %v7339_v19, %v4871_v25 }
 0x2b0   :  { %v9967_v27 = vsub.s32 %v5021_v53, %v5024_v14  ;;  %vm4892_vm4 = vcmp.lt.s32.totalorder %v9956_v37, 4  ;;  %vm4889_vm5 = vcmp.lt.s32.totalorder %v9956_v37, 1  ;;  %vm9982_vm6 = vcmp.le.f32.partialorder %v4753_v23, 0.7853982 }
 0x2b1   :  { %vm6322_vm3 = vcmp.lt.s32.totalorder %v6321_v4, 0  ;;  %v4888_v53 = vor.u32 %v4887_v39, %v4886_v63  ;;  %v4894_v36 = vsel %vm4892_vm4, %v4882_v15, 2102212464  ;;  %v4897_v5 = vsel %vm4889_vm5, %v4876_v57, %v4879_v38 }
 0x2b2   :  { %v4824_v7 = vsel %vm6322_vm3, 0, %v6321_v4  ;;  %v5027_v2 = vsub.s32 0, %v9967_v27  ;;  %v4898_v0 = vsel %vm4892_vm4, %v4885_v41, 920167782  ;;  %vm4963_vm7 = vcmp.lt.s32.totalorder %v9825_v12, 0 }
 0x2b3   :  { %v4825_v16 = vsub.s32 32, %v4824_v7  ;;  %v4829_v62 = vsub.s32 4294967266, %v4824_v7  ;;  %v4826_v22 = vshll.u32 %v4817_v31, %v4824_v7  ;;  %vm4890_vm8 = vcmp.lt.s32.totalorder %v9956_v37, 2 }
 0x2b4   :  { %v6328_v29 = vmin.u32 %v5027_v2, %v9967_v27  ;;  %vm4891_vm12 = vcmp.lt.s32.totalorder %v9956_v37, 3  ;;  %v4893_v55 = vsel %vm4889_vm5, %v4873_v49, %v4876_v57  ;;  %v4901_v47 = vsel %vm4889_vm5, %v4879_v38, %v4882_v15 }
 0x2b5   :  { %v4827_v59 = vshrl.u32 %v4809_v13, %v4825_v16  ;;  %v4830_v33 = vadd.s32 127, %v4829_v62  ;;  %v4895_v13 = vsel %vm4891_vm12, %v4879_v38, %v4894_v36  ;;  %v4899_v23 = vsel %vm4891_vm12, %v4882_v15, %v4898_v0 }
 0x2b6   :  { %v5029_v52 = vclz %v6328_v29  ;;  %v4900_v32 = vsel %vm4890_vm8, %v4897_v5, %v4899_v23  ;;  %v4902_v40 = vsel %vm4892_vm4, %v4888_v53, 1326507024  ;;  %vm4077_vm9 = vcmp.ne.s32.totalorder %v9936_v44, 0 }
 0x2b7   :  { %v4828_v25 = vor.u32 %v4827_v59, %v4826_v22  ;;  %v4831_v31 = vshll.u32 %v4830_v33, 23  ;;  %vm4087_vm13 = vcmp.lt.s32.totalorder %v9936_v44, 0  ;;  %v4903_v14 = vsel %vm4891_vm12, %v4885_v41, %v4902_v40 }
 0x2b8   :  { %v6329_v20 = vadd.s32 4294967294, %v5029_v52  ;;  %v9998_v60 = vmul.u32.u64.low %v9950_v3, %v4900_v32  ;;  %v9999_v57 = vmul.u32.u64.high %v9950_v3, %v4900_v32, %v9998_v60  ;;  %v5047_v34 = vsub.s32 4, %v9954_v1  ;;  %vm4097_vm1 = vmand %vm4087_vm13, %vm4077_vm9 }
 0x2b9   :  { %v4832_v11 = vor.u32 4788187, %v4831_v31  ;;  %v4835_v4 = vcvt.s32.f32 %v4828_v25  ;;  %v4904_v8 = vsel %vm4890_vm8, %v4901_v47, %v4903_v14  ;;  %v5069_v7 = vshrl.u32 %v5068_v48, 23 }
 0x2ba   :  { %vm6330_vm10 = vcmp.lt.s32.totalorder %v6329_v20, 0  ;;  %v10006_v16 = vmul.u32.u64.low %v9950_v3, %v4904_v8  ;;  %v10007_v62 = vmul.u32.u64.high %v9950_v3, %v4904_v8, %v10006_v16  ;;  %v5017_v38 = vadd.s32 %v9917_v51, %v9923_v56 }
 0x2bb   :  { %v4833_v24 = vand.u32 2147483647, %v4832_v11  ;;  %v5032_v39 = vsel %vm6330_vm10, 0, %v6329_v20  ;;  %v4896_v49 = vsel %vm4890_vm8, %v4893_v55, %v4895_v13  ;;  %v4915_v22 = vadd.s32 1, %v9999_v57 }
 0x2bc   :  { %v5033_v41 = vsub.s32 32, %v5032_v39  ;;  %v5037_v2 = vsub.s32 4294967266, %v5032_v39  ;;  %v5065_v59 = vand.u32 2147483647, %v9832_v58  ;;  %v6331_v48 = vadd.s32 4294967169, %v5069_v7 }
 0x2bd   :  { %v4836_v15 = vmul.f32 %v4835_v4, %v4833_v24  ;;  %v4842_v33 = vsel %vm9982_vm6, 0, %v4840_v6  ;;  %v5034_v29 = vshll.u32 %v9967_v27, %v5032_v39  ;;  %v5048_v56 = vsel %vm4963_vm7, %v5047_v34, %v9954_v1 }
 0x2be   :  { %v5035_v53 = vshrl.u32 %v5017_v38, %v5033_v41  ;;  %v5038_v36 = vadd.s32 127, %v5037_v2  ;;  %v4912_v37 = vmul.u32 %v9950_v3, %v4896_v49  ;;  %vm4914_vm11 = vc.u32 %v10007_v62, %v9998_v60 }
 0x2bf   :  { %v4837_v63 = vxor.u32 2147483648, %v4836_v15  ;;  %v4916_v31 = vsel %vm4914_vm11, %v4915_v22, %v9999_v57  ;;  %v4846_v5 = vadd.s32 3, %v4842_v33  ;;  %v5075_v52 = vadd.s32 1, %v6331_v48 }
 0x2c0   :  { %v5036_v25 = vor.u32 %v5035_v53, %v5034_v29  ;;  %v5039_v27 = vshll.u32 %v5038_v36, 23  ;;  %v4917_v0 = vadd.s32 %v4916_v31, %v4912_v37  ;;  %vm10032_vm14 = vcmp.le.f32.partialorder %v4961_v18, 0.7853982 }
 0x2c1   :  { %v4838_v51 = vsel %vm4755_vm2, %v4837_v63, %v4836_v15  ;;  %v4036_v55 = vshrl.u32 %v9946_v50, 5  ;;  %v5890_v42 = vand.u32 3, %v4842_v33  ;;  %v5050_v11 = vsel %vm10032_vm14, 0, %v5048_v56 }
 0x2c2   :  { %v4841_v6 = vsel %vm9982_vm6, %v9822_v9, %v4838_v51  ;;  %v5040_v1 = vor.u32 4788187, %v5039_v27  ;;  %v4918_v13 = vadd.s32 536870912, %v4917_v0  ;;  %vm5076_vm15 = vcmp.gt.s32.totalorder %v5075_v52, 0 }
 0x2c3   :  { %7242 = vcosq.f32 %v4841_v6  ;;  %v5043_v47 = vcvt.s32.f32 %v5036_v25  ;;  %v5072_v18 = vand.u32 8388607, %v5065_v59  ;;  %v5077_v4 = vsel %vm5076_vm15, %v5075_v52, 0 }
 0x2c4   :  { %7244 = vsinq.f32 %v4841_v6  ;;  %v5041_v23 = vand.u32 2147483647, %v5040_v1  ;;  %v4847_v20 = vand.u32 3, %v4846_v5  ;;  %v10045_v32 = vshrl.u32 %v4918_v13, 30 }
 0x2c5   :  { %v10047_v40 = vand.u32 31, %v5077_v4  ;;  %vm5175_vm2 = vcmp.lt.s32.totalorder %v9940_v17, 36  ;;  %v10052_v24 = vsel %vm4097_vm1, %v9943_v45, %v9936_v44  ;;  %v5054_v14 = vadd.s32 3, %v5050_v11 }
 0x2c6   :  { %v5044_v50 = vmul.f32 %v5043_v47, %v5041_v23  ;;  %v10054_v57 = vmul.u32 39, %v4036_v55  ;;  %v4920_v34 = vshll.u32 %v10045_v32, 30  ;;  %vm4125_vm3 = vcmp.lt.s32.totalorder %v9940_v17, 18 }
 0x2c7   :  { %vm4845_vm4 = vweird.f32 %v9822_v9  ;;  %vm5891_vm5 = vcmp.lt.s32.totalorder %v5890_v42, 2  ;;  %vm5892_vm6 = vcmp.eq.s32.totalorder %v5890_v42, 0  ;;  %v5073_v7 = vor.u32 8388608, %v5072_v18 }
 0x2c8   :  { %v5045_v8 = vxor.u32 2147483648, %v5044_v50  ;;  %vm4848_vm8 = vcmp.lt.s32.totalorder %v4847_v20, 2  ;;  %vm4849_vm12 = vcmp.eq.s32.totalorder %v4847_v20, 0  ;;  %vm5895_vm9 = vcmp.eq.s32.totalorder %v5890_v42, 2 }
 0x2c9   :  { %v10059_v15 = vsub.s32 %v4917_v0, %v4920_v34  ;;  %vm4852_vm13 = vcmp.eq.s32.totalorder %v4847_v20, 2  ;;  %v10063_v45 = vand.u32 3, %v5050_v11  ;;  %v5080_v39 = vsub.s32 32, %v10047_v40 }
 0x2ca   :  { %v5046_v44 = vsel %vm4963_vm7, %v5045_v8, %v5044_v50  ;;  %v10069_v41 = vand.u32 3, %v5054_v14  ;;  %v4913_v2 = vadd.s32 %v9998_v60, %v10007_v62  ;;  %v10074_v48 = vshrl.u32 %v5077_v4, 5 }
 0x2cb   :  { %v5049_v38 = vsel %vm10032_vm14, %v9825_v12, %v5046_v44  ;;  %v4923_v49 = vsub.s32 0, %v10059_v15  ;;  %v10076_v33 = vshll.u32 %v5073_v7, 8  ;;  %v5082_v36 = vshll.u32 %v7335_v26, %v10047_v40 }
 0x2cc   :  { %7246 = vcosq.f32 %v5049_v38  ;;  %v5083_v62 = vshrl.u32 %v7336_v28, %v5080_v39  ;;  %v5085_v56 = vshll.u32 %v7336_v28, %v10047_v40  ;;  %v5088_v27 = vshll.u32 %v7337_v35, %v10047_v40 }
 0x2cd   :  { %v7243_v16 = vpop.eup %7242  ;;  %7248 = vsinq.f32 %v5049_v38  ;;  %v6324_v53 = vmin.u32 %v4923_v49, %v10059_v15  ;;  %vm5060_vm7 = vcmp.eq.s32.totalorder %v10069_v41, 2  ;;  %vm6101_vm10 = vcmp.eq.s32.totalorder %v10063_v45, 2 }
 0x2ce   :  { %v7245_v63 = vpop.eup %7244  ;;  %v4853_v22 = vxor.u32 2147483648, %v7243_v16  ;;  %v5086_v0 = vshrl.u32 %v7337_v35, %v5080_v39  ;;  %v5089_v28 = vshrl.u32 %v7338_v21, %v5080_v39  ;;  %vm5057_vm11 = vcmp.eq.s32.totalorder %v10069_v41, 0 }
 0x2cf   :  { %v4850_v29 = vxor.u32 2147483648, %v7245_v63  ;;  %v4925_v25 = vclz %v6324_v53  ;;  %vm6098_vm14 = vcmp.eq.s32.totalorder %v10063_v45, 0  ;;  %v5091_v55 = vshll.u32 %v7338_v21, %v10047_v40 }
 0x2d0   :  { %v4854_v51 = vsel %vm4852_vm13, %v4853_v22, %v7245_v63  ;;  %v5897_v60 = vsel %vm5895_vm9, %v4853_v22, %v7245_v63  ;;  %vm5056_vm15 = vcmp.lt.s32.totalorder %v10069_v41, 2  ;;  %vm5177_vm1 = vcmp.lt.s32.totalorder %v10052_v24, 36 }
 0x2d1   :  { %v4851_v37 = vsel %vm4849_vm12, %v7243_v16, %v4850_v29  ;;  %v5894_v6 = vsel %vm5892_vm6, %v7243_v16, %v4850_v29  ;;  %v6325_v1 = vadd.s32 4294967294, %v4925_v25  ;;  %v5081_v42 = vshrl.u32 %v7335_v26, %v5080_v39 }
 0x2d2   :  { %v4855_v31 = vsel %vm4848_vm8, %v4851_v37, %v4854_v51  ;;  %v5898_v5 = vsel %vm5891_vm5, %v5894_v6, %v5897_v60  ;;  %vm6097_vm5 = vcmp.lt.s32.totalorder %v10063_v45, 2  ;;  %v5084_v11 = vor.u32 %v5083_v62, %v5082_v36 }
 0x2d3   :  { %v4856_v52 = vsel %vm4845_vm4, nan, %v4855_v31  ;;  %v5899_v3 = vsel %vm4845_vm4, nan, %v5898_v5  ;;  %v5092_v13 = vshrl.u32 %v7339_v19, %v5080_v39  ;;  %vm4127_vm4 = vcmp.lt.s32.totalorder %v10052_v24, 18 }
 0x2d4   :  { %v6235_v35 = vsel %vm5175_vm2, %v5899_v3, %v9822_v9  ;;  %vm5053_vm6 = vweird.f32 %v9825_v12  ;;  %vm6326_vm8 = vcmp.lt.s32.totalorder %v6325_v1, 0  ;;  %v5094_v21 = vshll.u32 %v7339_v19, %v10047_v40 }
 0x2d5   :  { %v6265_v23 = vsel %vm4125_vm3, %v4856_v52, %v6235_v35  ;;  %v5095_v9 = vshrl.u32 %v7340_v30, %v5080_v39  ;;  %v4928_v47 = vsel %vm6326_vm8, 0, %v6325_v1  ;;  %v5087_v18 = vor.u32 %v5086_v0, %v5085_v56 }
 0x2d6   :  { %6275 = vst [vmem:[#allocation7 + $0x30] sm:$0xff] %v6265_v23  ;;  %v5090_v26 = vor.u32 %v5089_v28, %v5088_v27  ;;  %v5093_v4 = vor.u32 %v5092_v13, %v5091_v55  ;;  %v4929_v20 = vsub.s32 32, %v4928_v47  ;;  %v4933_v50 = vsub.s32 4294967266, %v4928_v47  ;;  %v7247_v17 = vpop.eup %7246 }
 0x2d7   :  { %v5096_v14 = vor.u32 %v5095_v9, %v5094_v21  ;;  %vm5097_vm2 = vcmp.lt.s32.totalorder %v10074_v48, 1  ;;  %v4930_v34 = vshll.u32 %v10059_v15, %v4928_v47  ;;  %vm5098_vm3 = vcmp.lt.s32.totalorder %v10074_v48, 2  ;;  %v7249_v19 = vpop.eup %7248 }
 0x2d8   :  { %vm5099_vm12 = vcmp.lt.s32.totalorder %v10074_v48, 3  ;;  %vm5100_vm9 = vcmp.lt.s32.totalorder %v10074_v48, 4  ;;  %v5061_v30 = vxor.u32 2147483648, %v7247_v17  ;;  %v4931_v40 = vshrl.u32 %v4913_v2, %v4929_v20 }
 0x2d9   :  { %v4934_v8 = vadd.s32 127, %v4933_v50  ;;  %v5101_v7 = vsel %vm5097_vm2, %v5081_v42, %v5084_v11  ;;  %v5058_v44 = vxor.u32 2147483648, %v7249_v19  ;;  %v5105_v39 = vsel %vm5097_vm2, %v5084_v11, %v5087_v18 }
 0x2da   :  { %v5106_v15 = vsel %vm5100_vm9, %v5093_v4, 920167782  ;;  %v5110_v16 = vsel %vm5100_vm9, %v5096_v14, 1326507024  ;;  %v5062_v38 = vsel %vm5060_vm7, %v5061_v30, %v7249_v19  ;;  %v6103_v2 = vsel %vm6101_vm10, %v5061_v30, %v7249_v19 }
 0x2db   :  { %v4932_v49 = vor.u32 %v4931_v40, %v4930_v34  ;;  %v4935_v63 = vshll.u32 %v4934_v8, 23  ;;  %v5059_v22 = vsel %vm5057_vm11, %v7247_v17, %v5058_v44  ;;  %v6100_v29 = vsel %vm6098_vm14, %v7247_v17, %v5058_v44 }
 0x2dc   :  { %v5107_v53 = vsel %vm5099_vm12, %v5090_v26, %v5106_v15  ;;  %v5109_v36 = vsel %vm5097_vm2, %v5087_v18, %v5090_v26  ;;  %v5063_v51 = vsel %vm5056_vm15, %v5059_v22, %v5062_v38  ;;  %v6104_v60 = vsel %vm6097_vm5, %v6100_v29, %v6103_v2 }
 0x2dd   :  { %v4936_v62 = vor.u32 4788187, %v4935_v63  ;;  %v5102_v56 = vsel %vm5100_vm9, %v5090_v26, 2102212464  ;;  %v5064_v37 = vsel %vm5053_vm6, nan, %v5063_v51  ;;  %v6105_v6 = vsel %vm5053_vm6, nan, %v6104_v60 }
 0x2de   :  { %v5108_v25 = vsel %vm5098_vm3, %v5105_v39, %v5107_v53  ;;  %v5111_v41 = vsel %vm5099_vm12, %v5093_v4, %v5110_v16  ;;  %v6237_v45 = vsel %vm5177_vm1, %v6105_v6, %v9825_v12  ;;  %v4939_v31 = vcvt.s32.f32 %v4932_v49 }
 0x2df   :  { %v4937_v27 = vand.u32 2147483647, %v4936_v62  ;;  %v5112_v5 = vsel %vm5098_vm3, %v5109_v36, %v5111_v41  ;;  %v6267_v0 = vsel %vm4127_vm4, %v5064_v37, %v6237_v45  ;;  %v5103_v28 = vsel %vm5099_vm12, %v5087_v18, %v5102_v56 }
 0x2e0   :  { %v10168_v52 = vmul.u32.u64.low %v10076_v33, %v5112_v5  ;;  %v10169_v3 = vmul.u32.u64.high %v10076_v33, %v5112_v5, %v10168_v52  ;;  %6277 = vst [vmem:[#allocation7 + $0x40] sm:$0xff] %v6267_v0  ;;  %v4943_v55 = vsub.s32 4, %v10045_v32  ;;  %v4038_v24 = vsub.s32 %v9851_v10, %v10054_v57 }
 0x2e1   :  { %v4940_v1 = vmul.f32 %v4939_v31, %v4937_v27  ;;  %v10173_v12 = vmul.u32.u64.low %v10076_v33, %v5108_v25  ;;  %v10174_v35 = vmul.u32.u64.high %v10076_v33, %v5108_v25, %v10173_v12  ;;  %v5104_v11 = vsel %vm5098_vm3, %v5101_v7, %v5103_v28 }
 0x2e2   :  { %vm4859_vm13 = vcmp.lt.s32.totalorder %v9827_v54, 0  ;;  %vm4858_vm10 = vcmp.le.f32.partialorder %v4857_v46, 0.7853982  ;;  %v5120_v10 = vmul.u32 %v10076_v33, %v5104_v11  ;;  %vm4076_vm11 = vcmp.ne.s32.totalorder %v4038_v24, 0 }
 0x2e3   :  { %v4941_v42 = vxor.u32 2147483648, %v4940_v1  ;;  %vm5122_vm7 = vc.u32 %v10169_v3, %v10173_v12  ;;  %v4944_v23 = vsel %vm4859_vm13, %v4943_v55, %v10045_v32  ;;  %v5123_v21 = vadd.s32 1, %v10174_v35 }
 0x2e4   :  { %vm4086_vm14 = vcmp.lt.s32.totalorder %v4038_v24, 0  ;;  %v4946_v48 = vsel %vm4858_vm10, 0, %v4944_v23  ;;  %v4106_v18 = vadd.s32 39, %v4038_v24  ;;  %v3928_v20 = vadd.s32 1152, %v9283_v61 }
 0x2e5   :  { %v4942_v13 = vsel %vm4859_vm13, %v4941_v42, %v4940_v1  ;;  %v5124_v57 = vsel %vm5122_vm7, %v5123_v21, %v10174_v35  ;;  %vm4096_vm15 = vmand %vm4086_vm14, %vm4076_vm11  ;;  %v4950_v46 = vadd.s32 3, %v4946_v48  ;;  %v5993_v17 = vand.u32 3, %v4946_v48 }
 0x2e6   :  { %v4945_v9 = vsel %vm4858_vm10, %v9827_v54, %v4942_v13  ;;  %v5125_v47 = vadd.s32 %v5124_v57, %v5120_v10  ;;  %v4116_v32 = vsel %vm4096_vm15, %v4106_v18, %v4038_v24  ;;  %vm4949_vm9 = vweird.f32 %v9827_v54 }
 0x2e7   :  { %7250 = vcosq.f32 %v4945_v9  ;;  %v4951_v14 = vand.u32 3, %v4950_v46  ;;  %vm4126_vm1 = vcmp.lt.s32.totalorder %v4116_v32, 18  ;;  %vm5176_vm5 = vcmp.lt.s32.totalorder %v4116_v32, 36 }
 0x2e8   :  { %7252 = vsinq.f32 %v4945_v9  ;;  %v5126_v26 = vadd.s32 536870912, %v5125_v47  ;;  %v10192_v40 = vmul.u32.u64.low 3524075730, %v3928_v20  ;;  %v10193_v8 = vmul.u32.u64.high 3524075730, %v3928_v20, %v10192_v40 }
 0x2e9   :  { %vm4956_vm4 = vcmp.eq.s32.totalorder %v4951_v14, 2  ;;  %vm5995_vm6 = vcmp.eq.s32.totalorder %v5993_v17, 0  ;;  %vm5998_vm8 = vcmp.eq.s32.totalorder %v5993_v17, 2  ;;  %vm4953_vm2 = vcmp.eq.s32.totalorder %v4951_v14, 0 }
 0x2ea   :  { %v5127_v4 = vshrl.u32 %v5126_v26, 30  ;;  %vm4952_vm3 = vcmp.lt.s32.totalorder %v4951_v14, 2  ;;  %vm5994_vm12 = vcmp.lt.s32.totalorder %v5993_v17, 2  ;;  %vm4061_vm13 = vc.u32 %v10192_v40, 3524075730 }
 0x2eb   :  { %v4062_v62 = vsel %vm4061_vm13, 1, %v7341_v43  ;;  %v5121_v56 = vadd.s32 %v10173_v12, %v10169_v3  ;;  %vm5067_vm10 = vcmp.lt.s32.totalorder %v9832_v58, 0  ;;  %vm5066_vm11 = vcmp.le.f32.partialorder %v5065_v59, 0.7853982 }
 0x2ec   :  { %v5128_v50 = vshll.u32 %v5127_v4, 30  ;;  %v4063_v27 = vadd.s32 %v10193_v8, %v4062_v62  ;;  %v5151_v55 = vsub.s32 4, %v5127_v4  ;;  %vm5157_vm13 = vweird.f32 %v9832_v58 }
 0x2ee   :  { %v5129_v33 = vsub.s32 %v5125_v47, %v5128_v50  ;;  %v4064_v0 = vshrl.u32 %v4063_v27, 5  ;;  %v5152_v12 = vsel %vm5067_vm10, %v5151_v55, %v5127_v4 }
 0x2ef   :  { %v5154_v11 = vsel %vm5066_vm11, 0, %v5152_v12 }
 0x2f0   :  { %v5131_v7 = vsub.s32 0, %v5129_v33  ;;  %v4065_v35 = vmul.u32 39, %v4064_v0  ;;  %v5158_v13 = vadd.s32 3, %v5154_v11  ;;  %v6199_v9 = vand.u32 3, %v5154_v11 }
 0x2f1   :  { %v7251_v34 = vpop.eup %7250 }
 0x2f2   :  { %v7253_v19 = vpop.eup %7252  ;;  %v4957_v30 = vxor.u32 2147483648, %v7251_v34  ;;  %v6332_v15 = vmin.u32 %v5131_v7, %v5129_v33  ;;  %v4066_v24 = vsub.s32 %v3928_v20, %v4065_v35  ;;  %v5159_v21 = vand.u32 3, %v5158_v13 }
 0x2f3   :  { %v4954_v44 = vxor.u32 2147483648, %v7253_v19 }
 0x2f4   :  { %v4958_v39 = vsel %vm4956_vm4, %v4957_v30, %v7253_v19  ;;  %v6000_v61 = vsel %vm5998_vm8, %v4957_v30, %v7253_v19  ;;  %v5133_v63 = vclz %v6332_v15  ;;  %vm4078_vm14 = vcmp.ne.s32.totalorder %v4066_v24, 0 }
 0x2f5   :  { %v4955_v16 = vsel %vm4953_vm2, %v7251_v34, %v4954_v44  ;;  %v5997_v38 = vsel %vm5995_vm6, %v7251_v34, %v4954_v44  ;;  %vm4088_vm15 = vcmp.lt.s32.totalorder %v4066_v24, 0  ;;  %v4108_v23 = vadd.s32 39, %v4066_v24 }
 0x2f6   :  { %v4959_v2 = vsel %vm4952_vm3, %v4955_v16, %v4958_v39  ;;  %v6001_v49 = vsel %vm5994_vm12, %v5997_v38, %v6000_v61  ;;  %v6333_v36 = vadd.s32 4294967294, %v5133_v63  ;;  %vm6204_vm6 = vcmp.eq.s32.totalorder %v6199_v9, 2 }
 0x2f7   :  { %v4960_v22 = vsel %vm4949_vm9, nan, %v4959_v2  ;;  %v6002_v29 = vsel %vm4949_vm9, nan, %v6001_v49  ;;  %vm5161_vm8 = vcmp.eq.s32.totalorder %v5159_v21, 0  ;;  %vm6201_vm2 = vcmp.eq.s32.totalorder %v6199_v9, 0 }
 0x2f8   :  { %v6236_v53 = vsel %vm5176_vm5, %v6002_v29, %v9827_v54  ;;  %vm6334_vm7 = vcmp.lt.s32.totalorder %v6333_v36, 0  ;;  %vm5164_vm5 = vcmp.eq.s32.totalorder %v5159_v21, 2  ;;  %vm5160_vm3 = vcmp.lt.s32.totalorder %v5159_v21, 2 }
 0x2f9   :  { %v6266_v51 = vsel %vm4126_vm1, %v4960_v22, %v6236_v53  ;;  %v5136_v60 = vsel %vm6334_vm7, 0, %v6333_v36  ;;  %vm4098_vm1 = vmand %vm4088_vm15, %vm4078_vm14  ;;  %vm6200_vm12 = vcmp.lt.s32.totalorder %v6199_v9, 2 }
 0x2fa   :  { %6276 = vst [vmem:[#allocation7 + $0x38] sm:$0xff] %v6266_v51  ;;  %v5137_v37 = vsub.s32 32, %v5136_v60  ;;  %v5141_v6 = vsub.s32 4294967266, %v5136_v60  ;;  %v5138_v25 = vshll.u32 %v5129_v33, %v5136_v60  ;;  %v4118_v10 = vsel %vm4098_vm1, %v4108_v23, %v4066_v24 }
 0x2fb   :  { %vm5178_vm4 = vcmp.lt.s32.totalorder %v4118_v10, 36  ;;  %vm4128_vm9 = vcmp.lt.s32.totalorder %v4118_v10, 18 }
 0x2fc   :  { %v5139_v41 = vshrl.u32 %v5121_v56, %v5137_v37  ;;  %v5142_v45 = vadd.s32 127, %v5141_v6 }
 0x2fe   :  { %v5140_v54 = vor.u32 %v5139_v41, %v5138_v25  ;;  %v5143_v31 = vshll.u32 %v5142_v45, 23 }
 0x300   :  { %v5144_v5 = vor.u32 4788187, %v5143_v31  ;;  %v5147_v52 = vcvt.s32.f32 %v5140_v54 }
 0x302   :  { %v5145_v28 = vand.u32 2147483647, %v5144_v5 }
 0x304   :  { %v5148_v1 = vmul.f32 %v5147_v52, %v5145_v28 }
 0x306   :  { %v5149_v43 = vxor.u32 2147483648, %v5148_v1 }
 0x308   :  { %v5150_v3 = vsel %vm5067_vm10, %v5149_v43, %v5148_v1 }
 0x309   :  { %v5153_v42 = vsel %vm5066_vm11, %v9832_v58, %v5150_v3 }
 0x30a   :  { %7254 = vcosq.f32 %v5153_v42 }
 0x30b   :  { %7256 = vsinq.f32 %v5153_v42 }
 0x314   :  { %v7255_v57 = vpop.eup %7254 }
 0x315   :  { %v7257_v48 = vpop.eup %7256  ;;  %v5165_v47 = vxor.u32 2147483648, %v7255_v57 }
 0x316   :  { %v5162_v59 = vxor.u32 2147483648, %v7257_v48 }
 0x317   :  { %v5166_v18 = vsel %vm5164_vm5, %v5165_v47, %v7257_v48  ;;  %v6206_v26 = vsel %vm6204_vm6, %v5165_v47, %v7257_v48 }
 0x318   :  { %v5163_v46 = vsel %vm5161_vm8, %v7255_v57, %v5162_v59  ;;  %v6203_v4 = vsel %vm6201_vm2, %v7255_v57, %v5162_v59 }
 0x319   :  { %v5167_v32 = vsel %vm5160_vm3, %v5163_v46, %v5166_v18  ;;  %v6207_v20 = vsel %vm6200_vm12, %v6203_v4, %v6206_v26 }
 0x31a   :  { %v5168_v50 = vsel %vm5157_vm13, nan, %v5167_v32  ;;  %v6208_v14 = vsel %vm5157_vm13, nan, %v6207_v20 }
 0x31b   :  { %v6238_v17 = vsel %vm5178_vm4, %v6208_v14, %v9832_v58 }
 0x31c   :  { %v6268_v33 = vsel %vm4128_vm9, %v5168_v50, %v6238_v17 }
 0x31d   :  { %6278 = vst.msk [vmem:[#allocation7 + $0x48] sm:$0xff] %vm159_vm0, %v6268_v33 }
 0x31e   :  { %7313 = shalt.err (!%p7310_p6)
}
 0x31f   :  { %s7314_s10 = scalar_lea.hbm %s10225_s2, 1280 }
 0x320   :  { %p7315_p7 = scmp.ne.s32.totalorder %s10225_s2, %s7314_s10  ;;  %p7318_p8 = scmp.lt.u32.totalorder %s7314_s10, %s10225_s2 }
 0x322   :  { %p7320_p9 = pnand %p7318_p8, %p7315_p7 }
 0x324   :  { %7323 = shalt.err (!%p7320_p9)
}
 0x325   :  { %6288 = dma.vmem_to_hbm [thread:$0]  %s6286_s6, 1280, %s10225_s2, [#allocation4]  }
 0x326   :  { %7328 = dma.done.wait [#allocation4], 1280  }
 0x327   :  { %7329 = vsyncadd [#allocation4], 4294966016 }
 0x328   :  { %6292 = vsyncpa [#allocation3], 1 }
 0x329   :  { %6293 = vsyncpa [#allocation6], 1 }
 0x32a   :  { %6294 = vsyncpa [#allocation4], 1 }

</bundles_post_ra>
